<compile_context>
chip_gen: v5e
topology: v5e:2x2
jax: 0.10.0
libtpu: 0.0.40
codegen_flags: <defaults>
</compile_context>

<pallas_src>
import math
from functools import partial

import jax
import jax.numpy as jnp
import numpy as np
from jax.experimental import pallas as pl
from jax.experimental.pallas import tpu as pltpu


def _round_up(x, m):
    return ((x + m - 1) // m) * m


_VMEM = pl.BlockSpec(memory_space=pltpu.MemorySpace.VMEM)


# -----------------------------------------------------------------------------
# Fused Pallas kernel: all GRU layers + final Linear in one pallas_call
# -----------------------------------------------------------------------------
def make_fused_gru_kernel(num_layers, T, B_pad, H_pad):
    G = 3 * H_pad
    H2 = 2 * H_pad

    def kernel(*args):
        # args layout:
        #   x_ref,
        #   [w_ih_t, w_hh_t, b_gi, b_hn] * num_layers,
        #   fc_w_t, fc_b,
        #   out_ref,
        #   seq_scratch (T,B_pad,H_pad), gi_scratch (T,B_pad,3H_pad)
        x_ref = args[0]
        fc_w_ref = args[1 + 4 * num_layers]
        fc_b_ref = args[2 + 4 * num_layers]
        out_ref = args[3 + 4 * num_layers]
        seq_scratch = args[4 + 4 * num_layers]
        gi_scratch = args[5 + 4 * num_layers]

        h_last = None
        for layer in range(num_layers):
            w_ih_t_ref = args[1 + 4 * layer]
            w_hh_t_ref = args[2 + 4 * layer]
            b_gi_ref = args[3 + 4 * layer]
            b_hn_ref = args[4 + 4 * layer]

            # ---- input projection for the whole sequence: ONE big MXU matmul
            #      (biases for r/z already folded with b_hh; n gets b_in here).
            if layer == 0:
                xin = x_ref[...]            # (T, B_pad, I_pad)
            else:
                xin = seq_scratch[...]      # (T, B_pad, H_pad)
            F = xin.shape[-1]
            gi_all = jnp.dot(xin.reshape(T * B_pad, F), w_ih_t_ref[...],
                             preferred_element_type=jnp.float32)
            gi_all = gi_all + b_gi_ref[...]
            gi_scratch[...] = gi_all.reshape(T, B_pad, G)

            # ---- hoist loop-invariant weights / biases out of the recurrence
            w_hh = w_hh_t_ref[...]                                   # (H_pad, G)
            b_hn = jnp.broadcast_to(b_hn_ref[...], (B_pad, H_pad))   # hoisted bcast

            is_last = layer == num_layers - 1

            def step(t, h, w_hh=w_hh, b_hn=b_hn, is_last=is_last):
                gi = gi_scratch[t]                                   # (B_pad, 3H_pad)
                gh = jnp.dot(h, w_hh, preferred_element_type=jnp.float32)
                # r and z share one fused sigmoid over the first 2*H_pad lanes
                rz = jax.nn.sigmoid(gi[:, 0:H2] + gh[:, 0:H2])
                r = rz[:, 0:H_pad]
                z = rz[:, H_pad:H2]
                n = jnp.tanh(gi[:, H2:G] + r * (gh[:, H2:G] + b_hn))
                h_new = (1.0 - z) * n + z * h
                if not is_last:
                    # only intermediate layers need the full sequence
                    seq_scratch[t] = h_new
                return h_new

            h0 = jnp.zeros((B_pad, H_pad), dtype=jnp.float32)
            h_last = jax.lax.fori_loop(0, T, step, h0, unroll=True)

        # ---- final Linear on the last timestep of the last layer (in-kernel)
        out_ref[...] = (jnp.dot(h_last, fc_w_ref[...],
                                preferred_element_type=jnp.float32)
                        + fc_b_ref[...])

    return kernel


# -----------------------------------------------------------------------------
# One-time parameter preparation: transpose, per-gate lane padding, bias folding
# -----------------------------------------------------------------------------
def prepare_params(params, input_size, hidden_size, output_size):
    H = hidden_size
    H_pad = _round_up(H, 128)
    I_pad = _round_up(input_size, 128)
    O_pad = _round_up(output_size, 128)

    def pad_gate_cols(w_t, H, H_pad):
        # (F, 3H) -> (F, 3H_pad), zero-padding each gate block to H_pad lanes
        blocks = []
        for g in range(3):
            blk = w_t[:, g * H:(g + 1) * H]
            blocks.append(jnp.pad(blk, ((0, 0), (0, H_pad - H))))
        return jnp.concatenate(blocks, axis=1)

    def pad_gate_vec(v, H, H_pad):
        blocks = []
        for g in range(3):
            blocks.append(jnp.pad(v[g * H:(g + 1) * H], (0, H_pad - H)))
        return jnp.concatenate(blocks)

    layers = []
    for layer, (w_ih, w_hh, b_ih, b_hh) in enumerate(params["gru"]):
        in_sz = w_ih.shape[1]
        F_pad = I_pad if layer == 0 else H_pad
        w_ih_t = jnp.pad(w_ih.T, ((0, F_pad - in_sz), (0, 0)))       # (F_pad, 3H)
        w_ih_t = pad_gate_cols(w_ih_t, H, H_pad)                     # (F_pad, 3H_pad)
        w_hh_t = jnp.pad(w_hh.T, ((0, H_pad - H), (0, 0)))
        w_hh_t = pad_gate_cols(w_hh_t, H, H_pad)                     # (H_pad, 3H_pad)
        # fold b_ih + b_hh for r/z gates; keep n-gate hidden bias separate
        b_gi = jnp.concatenate([b_ih[:2 * H] + b_hh[:2 * H], b_ih[2 * H:]])
        b_gi = pad_gate_vec(b_gi, H, H_pad).reshape(1, 3 * H_pad)
        b_hn = jnp.pad(b_hh[2 * H:], (0, H_pad - H)).reshape(1, H_pad)
        layers.append((w_ih_t, w_hh_t, b_gi, b_hn))

    fc_w_t = jnp.pad(params["fc_w"].T,
                     ((0, H_pad - H), (0, O_pad - output_size)))     # (H_pad, O_pad)
    fc_b = jnp.pad(params["fc_b"], (0, O_pad - output_size)).reshape(1, O_pad)
    return {"layers": layers, "fc_w_t": fc_w_t, "fc_b": fc_b}


# -----------------------------------------------------------------------------
# Forward wrapper (jit-able; pads x, calls the single fused kernel, slices out)
# -----------------------------------------------------------------------------
def gru_model_forward(x, prep, *, output_size):
    """x: (B, T, input_size) float32 -> (B, output_size) float32."""
    B, T, I = x.shape
    num_layers = len(prep["layers"])
    I_pad = prep["layers"][0][0].shape[0]
    H_pad = prep["fc_w_t"].shape[0]
    O_pad = prep["fc_w_t"].shape[1]
    B_pad = _round_up(max(B, 8), 8)
    G = 3 * H_pad

    # batch-first -> time-major + pad (fused into one small XLA prologue)
    x_tm = jnp.transpose(x, (1, 0, 2))
    x_tm = jnp.pad(x_tm, ((0, 0), (0, B_pad - B), (0, I_pad - I)))

    flat_inputs = [x_tm]
    for layer_refs in prep["layers"]:
        flat_inputs.extend(layer_refs)
    flat_inputs.extend([prep["fc_w_t"], prep["fc_b"]])

    kernel = make_fused_gru_kernel(num_layers, T, B_pad, H_pad)

    out_pad = pl.pallas_call(
        kernel,
        out_shape=jax.ShapeDtypeStruct((B_pad, O_pad), jnp.float32),
        in_specs=[_VMEM] * len(flat_inputs),
        out_specs=_VMEM,
        scratch_shapes=[
            pltpu.VMEM((T, B_pad, H_pad), jnp.float32),   # layer-to-layer sequence
            pltpu.VMEM((T, B_pad, G), jnp.float32),       # hoisted input projection
        ],
        compiler_params=pltpu.CompilerParams(vmem_limit_bytes=32 * 1024 * 1024),
    )(*flat_inputs)

    return out_pad[:B, :output_size]


# -----------------------------------------------------------------------------
# Deterministic parameter init (PyTorch-style uniform(-1/sqrt(H), 1/sqrt(H)))
# -----------------------------------------------------------------------------
def init_params(key, input_size, hidden_size, num_layers, output_size):
    bound = 1.0 / math.sqrt(hidden_size)
    gru_layers = []
    for layer in range(num_layers):
        in_sz = input_size if layer == 0 else hidden_size
        key, k1, k2, k3, k4 = jax.random.split(key, 5)
        w_ih = jax.random.uniform(k1, (3 * hidden_size, in_sz), jnp.float32,
                                  -bound, bound)
        w_hh = jax.random.uniform(k2, (3 * hidden_size, hidden_size),
                                  jnp.float32, -bound, bound)
        b_ih = jax.random.uniform(k3, (3 * hidden_size,), jnp.float32,
                                  -bound, bound)
        b_hh = jax.random.uniform(k4, (3 * hidden_size,), jnp.float32,
                                  -bound, bound)
        gru_layers.append((w_ih, w_hh, b_ih, b_hh))

    key, k5, k6 = jax.random.split(key, 3)
    fc_w = jax.random.uniform(k5, (output_size, hidden_size), jnp.float32,
                              -bound, bound)
    fc_b = jax.random.uniform(k6, (output_size,), jnp.float32, -bound, bound)
    return {"gru": gru_layers, "fc_w": fc_w, "fc_b": fc_b}


# -----------------------------------------------------------------------------
# Pure-JAX reference (mirrors torch.nn.GRU math) for a sanity check
# -----------------------------------------------------------------------------
def reference_forward(x, params):
    B, T, _ = x.shape
    seq = x
    for (w_ih, w_hh, b_ih, b_hh) in params["gru"]:
        H = w_hh.shape[1]
        h = jnp.zeros((B, H), jnp.float32)
        outs = []
        for t in range(T):
            gi = seq[:, t, :] @ w_ih.T + b_ih
            gh = h @ w_hh.T + b_hh
            r = jax.nn.sigmoid(gi[:, :H] + gh[:, :H])
            z = jax.nn.sigmoid(gi[:, H:2 * H] + gh[:, H:2 * H])
            n = jnp.tanh(gi[:, 2 * H:] + r * gh[:, 2 * H:])
            h = (1.0 - z) * n + z * h
            outs.append(h)
        seq = jnp.stack(outs, axis=1)
    return seq[:, -1, :] @ params["fc_w"].T + params["fc_b"]


if __name__ == "__main__":
    # Small shapes consistent with the module's forward.
    batch, seq_len = 2, 8
    input_size, hidden_size, num_layers, output_size = 16, 32, 2, 8

    key = jax.random.PRNGKey(0)
    key, kx = jax.random.split(key)
    x = jax.random.normal(kx, (batch, seq_len, input_size), jnp.float32)

    params = init_params(key, input_size, hidden_size, num_layers, output_size)
    prep = prepare_params(params, input_size, hidden_size, output_size)

    fwd = jax.jit(partial(gru_model_forward, output_size=output_size))
    out = fwd(x, prep)
    out = jax.block_until_ready(out)

    ref = reference_forward(x, params)
    np.testing.assert_allclose(np.asarray(out), np.asarray(ref),
                               rtol=1e-3, atol=1e-3)

    print("KERNEL_OK")
</pallas_src>

<mosaic_0001>
module attributes {stable_mosaic.version = 11 : i64} {
  func.func @kernel(%arg0: memref<8x8x128xf32, #tpu.memory_space<vmem>>, %arg1: memref<128x384xf32, #tpu.memory_space<vmem>>, %arg2: memref<128x384xf32, #tpu.memory_space<vmem>>, %arg3: memref<1x384xf32, #tpu.memory_space<vmem>>, %arg4: memref<1x128xf32, #tpu.memory_space<vmem>>, %arg5: memref<128x384xf32, #tpu.memory_space<vmem>>, %arg6: memref<128x384xf32, #tpu.memory_space<vmem>>, %arg7: memref<1x384xf32, #tpu.memory_space<vmem>>, %arg8: memref<1x128xf32, #tpu.memory_space<vmem>>, %arg9: memref<128x128xf32, #tpu.memory_space<vmem>>, %arg10: memref<1x128xf32, #tpu.memory_space<vmem>>, %arg11: memref<8x128xf32, #tpu.memory_space<vmem>>, %arg12: memref<8x8x128xf32, #tpu.memory_space<vmem>>, %arg13: memref<8x8x384xf32, #tpu.memory_space<vmem>>) attributes {dimension_semantics = [], scalar_prefetch = 0 : i64, scratch_operands = 2 : i64, tpu.core_type = #tpu.core_type<tc>} {
    %c0 = arith.constant 0 : index
    %c0_0 = arith.constant 0 : index
    %c0_1 = arith.constant 0 : index
    %0 = vector.load %arg0[%c0, %c0_0, %c0_1] : memref<8x8x128xf32, #tpu.memory_space<vmem>>, vector<8x8x128xf32>
    %1 = vector.shape_cast %0 : vector<8x8x128xf32> to vector<64x128xf32>
    %c0_2 = arith.constant 0 : index
    %c0_3 = arith.constant 0 : index
    %2 = vector.load %arg1[%c0_2, %c0_3] : memref<128x384xf32, #tpu.memory_space<vmem>>, vector<128x384xf32>
    %cst = arith.constant dense<0.000000e+00> : vector<64x384xf32>
    %3 = tpu.matmul %1, %2, %cst {dimension_numbers = #tpu.dot_dimension_numbers<[1], [0], [0], [1], [0, 0, 1, 1], [], []>} : vector<64x128xf32>, vector<128x384xf32>, vector<64x384xf32> -> vector<64x384xf32>
    %c0_4 = arith.constant 0 : index
    %c0_5 = arith.constant 0 : index
    %4 = vector.load %arg3[%c0_4, %c0_5] : memref<1x384xf32, #tpu.memory_space<vmem>>, vector<1x384xf32>
    %5 = vector.broadcast %4 : vector<1x384xf32> to vector<64x384xf32>
    %6 = arith.addf %3, %5 : vector<64x384xf32>
    %7 = vector.shape_cast %6 : vector<64x384xf32> to vector<8x8x384xf32>
    %c0_6 = arith.constant 0 : index
    %c0_7 = arith.constant 0 : index
    %c0_8 = arith.constant 0 : index
    %8 = vector.load %arg13[%c0_6, %c0_7, %c0_8] : memref<8x8x384xf32, #tpu.memory_space<vmem>>, vector<8x8x384xf32>
    tpu.vector_store %arg13[%c0_6, %c0_7, %c0_8], %7 {strides = array<i32>} : memref<8x8x384xf32, #tpu.memory_space<vmem>>, vector<8x8x384xf32>,
    %c0_9 = arith.constant 0 : index
    %c0_10 = arith.constant 0 : index
    %9 = vector.load %arg2[%c0_9, %c0_10] : memref<128x384xf32, #tpu.memory_space<vmem>>, vector<128x384xf32>
    %c0_11 = arith.constant 0 : index
    %c0_12 = arith.constant 0 : index
    %10 = vector.load %arg4[%c0_11, %c0_12] : memref<1x128xf32, #tpu.memory_space<vmem>>, vector<1x128xf32>
    %11 = vector.shape_cast %10 : vector<1x128xf32> to vector<1x128xf32>
    %12 = vector.broadcast %11 : vector<1x128xf32> to vector<8x128xf32>
    %cst_13 = arith.constant 0.000000e+00 : f32
    %13 = vector.broadcast %cst_13 : f32 to vector<8x128xf32>
    %c0_i32 = arith.constant 0 : i32
    %14 = arith.index_cast %c0_i32 : i32 to index
    %c0_14 = arith.constant 0 : index
    %c0_15 = arith.constant 0 : index
    %15 = vector.load %arg13[%14, %c0_14, %c0_15] : memref<8x8x384xf32, #tpu.memory_space<vmem>>, vector<1x8x384xf32>
    %16 = vector.shape_cast %15 : vector<1x8x384xf32> to vector<8x384xf32>
    %cst_16 = arith.constant dense<0.000000e+00> : vector<8x384xf32>
    %17 = tpu.matmul %13, %9, %cst_16 {dimension_numbers = #tpu.dot_dimension_numbers<[1], [0], [0], [1], [0, 0, 1, 1], [], []>} : vector<8x128xf32>, vector<128x384xf32>, vector<8x384xf32> -> vector<8x384xf32>
    %18 = vector.extract_strided_slice %16 {offsets = [0, 0], sizes = [8, 256], strides = [1, 1]} : vector<8x384xf32> to vector<8x256xf32>
    %19 = vector.extract_strided_slice %17 {offsets = [0, 0], sizes = [8, 256], strides = [1, 1]} : vector<8x384xf32> to vector<8x256xf32>
    %20 = arith.addf %18, %19 : vector<8x256xf32>
    %21 = arith.negf %20 : vector<8x256xf32>
    %22 = math.exp %21 : vector<8x256xf32>
    %cst_17 = arith.constant 1.000000e+00 : f32
    %23 = vector.broadcast %cst_17 : f32 to vector<8x256xf32>
    %24 = arith.addf %23, %22 : vector<8x256xf32>
    %25 = arith.divf %23, %24 : vector<8x256xf32>
    %26 = vector.extract_strided_slice %25 {offsets = [0, 0], sizes = [8, 128], strides = [1, 1]} : vector<8x256xf32> to vector<8x128xf32>
    %27 = vector.extract_strided_slice %25 {offsets = [0, 128], sizes = [8, 128], strides = [1, 1]} : vector<8x256xf32> to vector<8x128xf32>
    %28 = vector.extract_strided_slice %16 {offsets = [0, 256], sizes = [8, 128], strides = [1, 1]} : vector<8x384xf32> to vector<8x128xf32>
    %29 = vector.extract_strided_slice %17 {offsets = [0, 256], sizes = [8, 128], strides = [1, 1]} : vector<8x384xf32> to vector<8x128xf32>
    %30 = arith.addf %29, %12 : vector<8x128xf32>
    %31 = arith.mulf %26, %30 : vector<8x128xf32>
    %32 = arith.addf %28, %31 : vector<8x128xf32>
    %33 = math.tanh %32 : vector<8x128xf32>
    %cst_18 = arith.constant 1.000000e+00 : f32
    %34 = vector.broadcast %cst_18 : f32 to vector<8x128xf32>
    %35 = arith.subf %34, %27 : vector<8x128xf32>
    %36 = arith.mulf %35, %33 : vector<8x128xf32>
    %37 = arith.mulf %27, %13 : vector<8x128xf32>
    %38 = arith.addf %36, %37 : vector<8x128xf32>
    %39 = arith.index_cast %c0_i32 : i32 to index
    %c0_19 = arith.constant 0 : index
    %c0_20 = arith.constant 0 : index
    %40 = vector.load %arg12[%39, %c0_19, %c0_20] : memref<8x8x128xf32, #tpu.memory_space<vmem>>, vector<1x8x128xf32>
    %41 = vector.shape_cast %40 : vector<1x8x128xf32> to vector<8x128xf32>
    %42 = vector.shape_cast %38 : vector<8x128xf32> to vector<1x8x128xf32>
    tpu.vector_store %arg12[%39, %c0_19, %c0_20], %42 {strides = array<i32>} : memref<8x8x128xf32, #tpu.memory_space<vmem>>, vector<1x8x128xf32>,
    %c1_i32 = arith.constant 1 : i32
    %43 = arith.index_cast %c1_i32 : i32 to index
    %c0_21 = arith.constant 0 : index
    %c0_22 = arith.constant 0 : index
    %44 = vector.load %arg13[%43, %c0_21, %c0_22] : memref<8x8x384xf32, #tpu.memory_space<vmem>>, vector<1x8x384xf32>
    %45 = vector.shape_cast %44 : vector<1x8x384xf32> to vector<8x384xf32>
    %cst_23 = arith.constant dense<0.000000e+00> : vector<8x384xf32>
    %46 = tpu.matmul %38, %9, %cst_23 {dimension_numbers = #tpu.dot_dimension_numbers<[1], [0], [0], [1], [0, 0, 1, 1], [], []>} : vector<8x128xf32>, vector<128x384xf32>, vector<8x384xf32> -> vector<8x384xf32>
    %47 = vector.extract_strided_slice %45 {offsets = [0, 0], sizes = [8, 256], strides = [1, 1]} : vector<8x384xf32> to vector<8x256xf32>
    %48 = vector.extract_strided_slice %46 {offsets = [0, 0], sizes = [8, 256], strides = [1, 1]} : vector<8x384xf32> to vector<8x256xf32>
    %49 = arith.addf %47, %48 : vector<8x256xf32>
    %50 = arith.negf %49 : vector<8x256xf32>
    %51 = math.exp %50 : vector<8x256xf32>
    %cst_24 = arith.constant 1.000000e+00 : f32
    %52 = vector.broadcast %cst_24 : f32 to vector<8x256xf32>
    %53 = arith.addf %52, %51 : vector<8x256xf32>
    %54 = arith.divf %52, %53 : vector<8x256xf32>
    %55 = vector.extract_strided_slice %54 {offsets = [0, 0], sizes = [8, 128], strides = [1, 1]} : vector<8x256xf32> to vector<8x128xf32>
    %56 = vector.extract_strided_slice %54 {offsets = [0, 128], sizes = [8, 128], strides = [1, 1]} : vector<8x256xf32> to vector<8x128xf32>
    %57 = vector.extract_strided_slice %45 {offsets = [0, 256], sizes = [8, 128], strides = [1, 1]} : vector<8x384xf32> to vector<8x128xf32>
    %58 = vector.extract_strided_slice %46 {offsets = [0, 256], sizes = [8, 128], strides = [1, 1]} : vector<8x384xf32> to vector<8x128xf32>
    %59 = arith.addf %58, %12 : vector<8x128xf32>
    %60 = arith.mulf %55, %59 : vector<8x128xf32>
    %61 = arith.addf %57, %60 : vector<8x128xf32>
    %62 = math.tanh %61 : vector<8x128xf32>
    %cst_25 = arith.constant 1.000000e+00 : f32
    %63 = vector.broadcast %cst_25 : f32 to vector<8x128xf32>
    %64 = arith.subf %63, %56 : vector<8x128xf32>
    %65 = arith.mulf %64, %62 : vector<8x128xf32>
    %66 = arith.mulf %56, %38 : vector<8x128xf32>
    %67 = arith.addf %65, %66 : vector<8x128xf32>
    %68 = arith.index_cast %c1_i32 : i32 to index
    %c0_26 = arith.constant 0 : index
    %c0_27 = arith.constant 0 : index
    %69 = vector.load %arg12[%68, %c0_26, %c0_27] : memref<8x8x128xf32, #tpu.memory_space<vmem>>, vector<1x8x128xf32>
    %70 = vector.shape_cast %69 : vector<1x8x128xf32> to vector<8x128xf32>
    %71 = vector.shape_cast %67 : vector<8x128xf32> to vector<1x8x128xf32>
    tpu.vector_store %arg12[%68, %c0_26, %c0_27], %71 {strides = array<i32>} : memref<8x8x128xf32, #tpu.memory_space<vmem>>, vector<1x8x128xf32>,
    %c2_i32 = arith.constant 2 : i32
    %72 = arith.index_cast %c2_i32 : i32 to index
    %c0_28 = arith.constant 0 : index
    %c0_29 = arith.constant 0 : index
    %73 = vector.load %arg13[%72, %c0_28, %c0_29] : memref<8x8x384xf32, #tpu.memory_space<vmem>>, vector<1x8x384xf32>
    %74 = vector.shape_cast %73 : vector<1x8x384xf32> to vector<8x384xf32>
    %cst_30 = arith.constant dense<0.000000e+00> : vector<8x384xf32>
    %75 = tpu.matmul %67, %9, %cst_30 {dimension_numbers = #tpu.dot_dimension_numbers<[1], [0], [0], [1], [0, 0, 1, 1], [], []>} : vector<8x128xf32>, vector<128x384xf32>, vector<8x384xf32> -> vector<8x384xf32>
    %76 = vector.extract_strided_slice %74 {offsets = [0, 0], sizes = [8, 256], strides = [1, 1]} : vector<8x384xf32> to vector<8x256xf32>
    %77 = vector.extract_strided_slice %75 {offsets = [0, 0], sizes = [8, 256], strides = [1, 1]} : vector<8x384xf32> to vector<8x256xf32>
    %78 = arith.addf %76, %77 : vector<8x256xf32>
    %79 = arith.negf %78 : vector<8x256xf32>
    %80 = math.exp %79 : vector<8x256xf32>
    %cst_31 = arith.constant 1.000000e+00 : f32
    %81 = vector.broadcast %cst_31 : f32 to vector<8x256xf32>
    %82 = arith.addf %81, %80 : vector<8x256xf32>
    %83 = arith.divf %81, %82 : vector<8x256xf32>
    %84 = vector.extract_strided_slice %83 {offsets = [0, 0], sizes = [8, 128], strides = [1, 1]} : vector<8x256xf32> to vector<8x128xf32>
    %85 = vector.extract_strided_slice %83 {offsets = [0, 128], sizes = [8, 128], strides = [1, 1]} : vector<8x256xf32> to vector<8x128xf32>
    %86 = vector.extract_strided_slice %74 {offsets = [0, 256], sizes = [8, 128], strides = [1, 1]} : vector<8x384xf32> to vector<8x128xf32>
    %87 = vector.extract_strided_slice %75 {offsets = [0, 256], sizes = [8, 128], strides = [1, 1]} : vector<8x384xf32> to vector<8x128xf32>
    %88 = arith.addf %87, %12 : vector<8x128xf32>
    %89 = arith.mulf %84, %88 : vector<8x128xf32>
    %90 = arith.addf %86, %89 : vector<8x128xf32>
    %91 = math.tanh %90 : vector<8x128xf32>
    %cst_32 = arith.constant 1.000000e+00 : f32
    %92 = vector.broadcast %cst_32 : f32 to vector<8x128xf32>
    %93 = arith.subf %92, %85 : vector<8x128xf32>
    %94 = arith.mulf %93, %91 : vector<8x128xf32>
    %95 = arith.mulf %85, %67 : vector<8x128xf32>
    %96 = arith.addf %94, %95 : vector<8x128xf32>
    %97 = arith.index_cast %c2_i32 : i32 to index
    %c0_33 = arith.constant 0 : index
    %c0_34 = arith.constant 0 : index
    %98 = vector.load %arg12[%97, %c0_33, %c0_34] : memref<8x8x128xf32, #tpu.memory_space<vmem>>, vector<1x8x128xf32>
    %99 = vector.shape_cast %98 : vector<1x8x128xf32> to vector<8x128xf32>
    %100 = vector.shape_cast %96 : vector<8x128xf32> to vector<1x8x128xf32>
    tpu.vector_store %arg12[%97, %c0_33, %c0_34], %100 {strides = array<i32>} : memref<8x8x128xf32, #tpu.memory_space<vmem>>, vector<1x8x128xf32>,
    %c3_i32 = arith.constant 3 : i32
    %101 = arith.index_cast %c3_i32 : i32 to index
    %c0_35 = arith.constant 0 : index
    %c0_36 = arith.constant 0 : index
    %102 = vector.load %arg13[%101, %c0_35, %c0_36] : memref<8x8x384xf32, #tpu.memory_space<vmem>>, vector<1x8x384xf32>
    %103 = vector.shape_cast %102 : vector<1x8x384xf32> to vector<8x384xf32>
    %cst_37 = arith.constant dense<0.000000e+00> : vector<8x384xf32>
    %104 = tpu.matmul %96, %9, %cst_37 {dimension_numbers = #tpu.dot_dimension_numbers<[1], [0], [0], [1], [0, 0, 1, 1], [], []>} : vector<8x128xf32>, vector<128x384xf32>, vector<8x384xf32> -> vector<8x384xf32>
    %105 = vector.extract_strided_slice %103 {offsets = [0, 0], sizes = [8, 256], strides = [1, 1]} : vector<8x384xf32> to vector<8x256xf32>
    %106 = vector.extract_strided_slice %104 {offsets = [0, 0], sizes = [8, 256], strides = [1, 1]} : vector<8x384xf32> to vector<8x256xf32>
    %107 = arith.addf %105, %106 : vector<8x256xf32>
    %108 = arith.negf %107 : vector<8x256xf32>
    %109 = math.exp %108 : vector<8x256xf32>
    %cst_38 = arith.constant 1.000000e+00 : f32
    %110 = vector.broadcast %cst_38 : f32 to vector<8x256xf32>
    %111 = arith.addf %110, %109 : vector<8x256xf32>
    %112 = arith.divf %110, %111 : vector<8x256xf32>
    %113 = vector.extract_strided_slice %112 {offsets = [0, 0], sizes = [8, 128], strides = [1, 1]} : vector<8x256xf32> to vector<8x128xf32>
    %114 = vector.extract_strided_slice %112 {offsets = [0, 128], sizes = [8, 128], strides = [1, 1]} : vector<8x256xf32> to vector<8x128xf32>
    %115 = vector.extract_strided_slice %103 {offsets = [0, 256], sizes = [8, 128], strides = [1, 1]} : vector<8x384xf32> to vector<8x128xf32>
    %116 = vector.extract_strided_slice %104 {offsets = [0, 256], sizes = [8, 128], strides = [1, 1]} : vector<8x384xf32> to vector<8x128xf32>
    %117 = arith.addf %116, %12 : vector<8x128xf32>
    %118 = arith.mulf %113, %117 : vector<8x128xf32>
    %119 = arith.addf %115, %118 : vector<8x128xf32>
    %120 = math.tanh %119 : vector<8x128xf32>
    %cst_39 = arith.constant 1.000000e+00 : f32
    %121 = vector.broadcast %cst_39 : f32 to vector<8x128xf32>
    %122 = arith.subf %121, %114 : vector<8x128xf32>
    %123 = arith.mulf %122, %120 : vector<8x128xf32>
    %124 = arith.mulf %114, %96 : vector<8x128xf32>
    %125 = arith.addf %123, %124 : vector<8x128xf32>
    %126 = arith.index_cast %c3_i32 : i32 to index
    %c0_40 = arith.constant 0 : index
    %c0_41 = arith.constant 0 : index
    %127 = vector.load %arg12[%126, %c0_40, %c0_41] : memref<8x8x128xf32, #tpu.memory_space<vmem>>, vector<1x8x128xf32>
    %128 = vector.shape_cast %127 : vector<1x8x128xf32> to vector<8x128xf32>
    %129 = vector.shape_cast %125 : vector<8x128xf32> to vector<1x8x128xf32>
    tpu.vector_store %arg12[%126, %c0_40, %c0_41], %129 {strides = array<i32>} : memref<8x8x128xf32, #tpu.memory_space<vmem>>, vector<1x8x128xf32>,
    %c4_i32 = arith.constant 4 : i32
    %130 = arith.index_cast %c4_i32 : i32 to index
    %c0_42 = arith.constant 0 : index
    %c0_43 = arith.constant 0 : index
    %131 = vector.load %arg13[%130, %c0_42, %c0_43] : memref<8x8x384xf32, #tpu.memory_space<vmem>>, vector<1x8x384xf32>
    %132 = vector.shape_cast %131 : vector<1x8x384xf32> to vector<8x384xf32>
    %cst_44 = arith.constant dense<0.000000e+00> : vector<8x384xf32>
    %133 = tpu.matmul %125, %9, %cst_44 {dimension_numbers = #tpu.dot_dimension_numbers<[1], [0], [0], [1], [0, 0, 1, 1], [], []>} : vector<8x128xf32>, vector<128x384xf32>, vector<8x384xf32> -> vector<8x384xf32>
    %134 = vector.extract_strided_slice %132 {offsets = [0, 0], sizes = [8, 256], strides = [1, 1]} : vector<8x384xf32> to vector<8x256xf32>
    %135 = vector.extract_strided_slice %133 {offsets = [0, 0], sizes = [8, 256], strides = [1, 1]} : vector<8x384xf32> to vector<8x256xf32>
    %136 = arith.addf %134, %135 : vector<8x256xf32>
    %137 = arith.negf %136 : vector<8x256xf32>
    %138 = math.exp %137 : vector<8x256xf32>
    %cst_45 = arith.constant 1.000000e+00 : f32
    %139 = vector.broadcast %cst_45 : f32 to vector<8x256xf32>
    %140 = arith.addf %139, %138 : vector<8x256xf32>
    %141 = arith.divf %139, %140 : vector<8x256xf32>
    %142 = vector.extract_strided_slice %141 {offsets = [0, 0], sizes = [8, 128], strides = [1, 1]} : vector<8x256xf32> to vector<8x128xf32>
    %143 = vector.extract_strided_slice %141 {offsets = [0, 128], sizes = [8, 128], strides = [1, 1]} : vector<8x256xf32> to vector<8x128xf32>
    %144 = vector.extract_strided_slice %132 {offsets = [0, 256], sizes = [8, 128], strides = [1, 1]} : vector<8x384xf32> to vector<8x128xf32>
    %145 = vector.extract_strided_slice %133 {offsets = [0, 256], sizes = [8, 128], strides = [1, 1]} : vector<8x384xf32> to vector<8x128xf32>
    %146 = arith.addf %145, %12 : vector<8x128xf32>
    %147 = arith.mulf %142, %146 : vector<8x128xf32>
    %148 = arith.addf %144, %147 : vector<8x128xf32>
    %149 = math.tanh %148 : vector<8x128xf32>
    %cst_46 = arith.constant 1.000000e+00 : f32
    %150 = vector.broadcast %cst_46 : f32 to vector<8x128xf32>
    %151 = arith.subf %150, %143 : vector<8x128xf32>
    %152 = arith.mulf %151, %149 : vector<8x128xf32>
    %153 = arith.mulf %143, %125 : vector<8x128xf32>
    %154 = arith.addf %152, %153 : vector<8x128xf32>
    %155 = arith.index_cast %c4_i32 : i32 to index
    %c0_47 = arith.constant 0 : index
    %c0_48 = arith.constant 0 : index
    %156 = vector.load %arg12[%155, %c0_47, %c0_48] : memref<8x8x128xf32, #tpu.memory_space<vmem>>, vector<1x8x128xf32>
    %157 = vector.shape_cast %156 : vector<1x8x128xf32> to vector<8x128xf32>
    %158 = vector.shape_cast %154 : vector<8x128xf32> to vector<1x8x128xf32>
    tpu.vector_store %arg12[%155, %c0_47, %c0_48], %158 {strides = array<i32>} : memref<8x8x128xf32, #tpu.memory_space<vmem>>, vector<1x8x128xf32>,
    %c5_i32 = arith.constant 5 : i32
    %159 = arith.index_cast %c5_i32 : i32 to index
    %c0_49 = arith.constant 0 : index
    %c0_50 = arith.constant 0 : index
    %160 = vector.load %arg13[%159, %c0_49, %c0_50] : memref<8x8x384xf32, #tpu.memory_space<vmem>>, vector<1x8x384xf32>
    %161 = vector.shape_cast %160 : vector<1x8x384xf32> to vector<8x384xf32>
    %cst_51 = arith.constant dense<0.000000e+00> : vector<8x384xf32>
    %162 = tpu.matmul %154, %9, %cst_51 {dimension_numbers = #tpu.dot_dimension_numbers<[1], [0], [0], [1], [0, 0, 1, 1], [], []>} : vector<8x128xf32>, vector<128x384xf32>, vector<8x384xf32> -> vector<8x384xf32>
    %163 = vector.extract_strided_slice %161 {offsets = [0, 0], sizes = [8, 256], strides = [1, 1]} : vector<8x384xf32> to vector<8x256xf32>
    %164 = vector.extract_strided_slice %162 {offsets = [0, 0], sizes = [8, 256], strides = [1, 1]} : vector<8x384xf32> to vector<8x256xf32>
    %165 = arith.addf %163, %164 : vector<8x256xf32>
    %166 = arith.negf %165 : vector<8x256xf32>
    %167 = math.exp %166 : vector<8x256xf32>
    %cst_52 = arith.constant 1.000000e+00 : f32
    %168 = vector.broadcast %cst_52 : f32 to vector<8x256xf32>
    %169 = arith.addf %168, %167 : vector<8x256xf32>
    %170 = arith.divf %168, %169 : vector<8x256xf32>
    %171 = vector.extract_strided_slice %170 {offsets = [0, 0], sizes = [8, 128], strides = [1, 1]} : vector<8x256xf32> to vector<8x128xf32>
    %172 = vector.extract_strided_slice %170 {offsets = [0, 128], sizes = [8, 128], strides = [1, 1]} : vector<8x256xf32> to vector<8x128xf32>
    %173 = vector.extract_strided_slice %161 {offsets = [0, 256], sizes = [8, 128], strides = [1, 1]} : vector<8x384xf32> to vector<8x128xf32>
    %174 = vector.extract_strided_slice %162 {offsets = [0, 256], sizes = [8, 128], strides = [1, 1]} : vector<8x384xf32> to vector<8x128xf32>
    %175 = arith.addf %174, %12 : vector<8x128xf32>
    %176 = arith.mulf %171, %175 : vector<8x128xf32>
    %177 = arith.addf %173, %176 : vector<8x128xf32>
    %178 = math.tanh %177 : vector<8x128xf32>
    %cst_53 = arith.constant 1.000000e+00 : f32
    %179 = vector.broadcast %cst_53 : f32 to vector<8x128xf32>
    %180 = arith.subf %179, %172 : vector<8x128xf32>
    %181 = arith.mulf %180, %178 : vector<8x128xf32>
    %182 = arith.mulf %172, %154 : vector<8x128xf32>
    %183 = arith.addf %181, %182 : vector<8x128xf32>
    %184 = arith.index_cast %c5_i32 : i32 to index
    %c0_54 = arith.constant 0 : index
    %c0_55 = arith.constant 0 : index
    %185 = vector.load %arg12[%184, %c0_54, %c0_55] : memref<8x8x128xf32, #tpu.memory_space<vmem>>, vector<1x8x128xf32>
    %186 = vector.shape_cast %185 : vector<1x8x128xf32> to vector<8x128xf32>
    %187 = vector.shape_cast %183 : vector<8x128xf32> to vector<1x8x128xf32>
    tpu.vector_store %arg12[%184, %c0_54, %c0_55], %187 {strides = array<i32>} : memref<8x8x128xf32, #tpu.memory_space<vmem>>, vector<1x8x128xf32>,
    %c6_i32 = arith.constant 6 : i32
    %188 = arith.index_cast %c6_i32 : i32 to index
    %c0_56 = arith.constant 0 : index
    %c0_57 = arith.constant 0 : index
    %189 = vector.load %arg13[%188, %c0_56, %c0_57] : memref<8x8x384xf32, #tpu.memory_space<vmem>>, vector<1x8x384xf32>
    %190 = vector.shape_cast %189 : vector<1x8x384xf32> to vector<8x384xf32>
    %cst_58 = arith.constant dense<0.000000e+00> : vector<8x384xf32>
    %191 = tpu.matmul %183, %9, %cst_58 {dimension_numbers = #tpu.dot_dimension_numbers<[1], [0], [0], [1], [0, 0, 1, 1], [], []>} : vector<8x128xf32>, vector<128x384xf32>, vector<8x384xf32> -> vector<8x384xf32>
    %192 = vector.extract_strided_slice %190 {offsets = [0, 0], sizes = [8, 256], strides = [1, 1]} : vector<8x384xf32> to vector<8x256xf32>
    %193 = vector.extract_strided_slice %191 {offsets = [0, 0], sizes = [8, 256], strides = [1, 1]} : vector<8x384xf32> to vector<8x256xf32>
    %194 = arith.addf %192, %193 : vector<8x256xf32>
    %195 = arith.negf %194 : vector<8x256xf32>
    %196 = math.exp %195 : vector<8x256xf32>
    %cst_59 = arith.constant 1.000000e+00 : f32
    %197 = vector.broadcast %cst_59 : f32 to vector<8x256xf32>
    %198 = arith.addf %197, %196 : vector<8x256xf32>
    %199 = arith.divf %197, %198 : vector<8x256xf32>
    %200 = vector.extract_strided_slice %199 {offsets = [0, 0], sizes = [8, 128], strides = [1, 1]} : vector<8x256xf32> to vector<8x128xf32>
    %201 = vector.extract_strided_slice %199 {offsets = [0, 128], sizes = [8, 128], strides = [1, 1]} : vector<8x256xf32> to vector<8x128xf32>
    %202 = vector.extract_strided_slice %190 {offsets = [0, 256], sizes = [8, 128], strides = [1, 1]} : vector<8x384xf32> to vector<8x128xf32>
    %203 = vector.extract_strided_slice %191 {offsets = [0, 256], sizes = [8, 128], strides = [1, 1]} : vector<8x384xf32> to vector<8x128xf32>
    %204 = arith.addf %203, %12 : vector<8x128xf32>
    %205 = arith.mulf %200, %204 : vector<8x128xf32>
    %206 = arith.addf %202, %205 : vector<8x128xf32>
    %207 = math.tanh %206 : vector<8x128xf32>
    %cst_60 = arith.constant 1.000000e+00 : f32
    %208 = vector.broadcast %cst_60 : f32 to vector<8x128xf32>
    %209 = arith.subf %208, %201 : vector<8x128xf32>
    %210 = arith.mulf %209, %207 : vector<8x128xf32>
    %211 = arith.mulf %201, %183 : vector<8x128xf32>
    %212 = arith.addf %210, %211 : vector<8x128xf32>
    %213 = arith.index_cast %c6_i32 : i32 to index
    %c0_61 = arith.constant 0 : index
    %c0_62 = arith.constant 0 : index
    %214 = vector.load %arg12[%213, %c0_61, %c0_62] : memref<8x8x128xf32, #tpu.memory_space<vmem>>, vector<1x8x128xf32>
    %215 = vector.shape_cast %214 : vector<1x8x128xf32> to vector<8x128xf32>
    %216 = vector.shape_cast %212 : vector<8x128xf32> to vector<1x8x128xf32>
    tpu.vector_store %arg12[%213, %c0_61, %c0_62], %216 {strides = array<i32>} : memref<8x8x128xf32, #tpu.memory_space<vmem>>, vector<1x8x128xf32>,
    %c7_i32 = arith.constant 7 : i32
    %217 = arith.index_cast %c7_i32 : i32 to index
    %c0_63 = arith.constant 0 : index
    %c0_64 = arith.constant 0 : index
    %218 = vector.load %arg13[%217, %c0_63, %c0_64] : memref<8x8x384xf32, #tpu.memory_space<vmem>>, vector<1x8x384xf32>
    %219 = vector.shape_cast %218 : vector<1x8x384xf32> to vector<8x384xf32>
    %cst_65 = arith.constant dense<0.000000e+00> : vector<8x384xf32>
    %220 = tpu.matmul %212, %9, %cst_65 {dimension_numbers = #tpu.dot_dimension_numbers<[1], [0], [0], [1], [0, 0, 1, 1], [], []>} : vector<8x128xf32>, vector<128x384xf32>, vector<8x384xf32> -> vector<8x384xf32>
    %221 = vector.extract_strided_slice %219 {offsets = [0, 0], sizes = [8, 256], strides = [1, 1]} : vector<8x384xf32> to vector<8x256xf32>
    %222 = vector.extract_strided_slice %220 {offsets = [0, 0], sizes = [8, 256], strides = [1, 1]} : vector<8x384xf32> to vector<8x256xf32>
    %223 = arith.addf %221, %222 : vector<8x256xf32>
    %224 = arith.negf %223 : vector<8x256xf32>
    %225 = math.exp %224 : vector<8x256xf32>
    %cst_66 = arith.constant 1.000000e+00 : f32
    %226 = vector.broadcast %cst_66 : f32 to vector<8x256xf32>
    %227 = arith.addf %226, %225 : vector<8x256xf32>
    %228 = arith.divf %226, %227 : vector<8x256xf32>
    %229 = vector.extract_strided_slice %228 {offsets = [0, 0], sizes = [8, 128], strides = [1, 1]} : vector<8x256xf32> to vector<8x128xf32>
    %230 = vector.extract_strided_slice %228 {offsets = [0, 128], sizes = [8, 128], strides = [1, 1]} : vector<8x256xf32> to vector<8x128xf32>
    %231 = vector.extract_strided_slice %219 {offsets = [0, 256], sizes = [8, 128], strides = [1, 1]} : vector<8x384xf32> to vector<8x128xf32>
    %232 = vector.extract_strided_slice %220 {offsets = [0, 256], sizes = [8, 128], strides = [1, 1]} : vector<8x384xf32> to vector<8x128xf32>
    %233 = arith.addf %232, %12 : vector<8x128xf32>
    %234 = arith.mulf %229, %233 : vector<8x128xf32>
    %235 = arith.addf %231, %234 : vector<8x128xf32>
    %236 = math.tanh %235 : vector<8x128xf32>
    %cst_67 = arith.constant 1.000000e+00 : f32
    %237 = vector.broadcast %cst_67 : f32 to vector<8x128xf32>
    %238 = arith.subf %237, %230 : vector<8x128xf32>
    %239 = arith.mulf %238, %236 : vector<8x128xf32>
    %240 = arith.mulf %230, %212 : vector<8x128xf32>
    %241 = arith.addf %239, %240 : vector<8x128xf32>
    %242 = arith.index_cast %c7_i32 : i32 to index
    %c0_68 = arith.constant 0 : index
    %c0_69 = arith.constant 0 : index
    %243 = vector.load %arg12[%242, %c0_68, %c0_69] : memref<8x8x128xf32, #tpu.memory_space<vmem>>, vector<1x8x128xf32>
    %244 = vector.shape_cast %243 : vector<1x8x128xf32> to vector<8x128xf32>
    %245 = vector.shape_cast %241 : vector<8x128xf32> to vector<1x8x128xf32>
    tpu.vector_store %arg12[%242, %c0_68, %c0_69], %245 {strides = array<i32>} : memref<8x8x128xf32, #tpu.memory_space<vmem>>, vector<1x8x128xf32>,
    %c8_i32 = arith.constant 8 : i32
    %c0_70 = arith.constant 0 : index
    %c0_71 = arith.constant 0 : index
    %c0_72 = arith.constant 0 : index
    %246 = vector.load %arg12[%c0_70, %c0_71, %c0_72] : memref<8x8x128xf32, #tpu.memory_space<vmem>>, vector<8x8x128xf32>
    %247 = vector.shape_cast %246 : vector<8x8x128xf32> to vector<64x128xf32>
    %c0_73 = arith.constant 0 : index
    %c0_74 = arith.constant 0 : index
    %248 = vector.load %arg5[%c0_73, %c0_74] : memref<128x384xf32, #tpu.memory_space<vmem>>, vector<128x384xf32>
    %cst_75 = arith.constant dense<0.000000e+00> : vector<64x384xf32>
    %249 = tpu.matmul %247, %248, %cst_75 {dimension_numbers = #tpu.dot_dimension_numbers<[1], [0], [0], [1], [0, 0, 1, 1], [], []>} : vector<64x128xf32>, vector<128x384xf32>, vector<64x384xf32> -> vector<64x384xf32>
    %c0_76 = arith.constant 0 : index
    %c0_77 = arith.constant 0 : index
    %250 = vector.load %arg7[%c0_76, %c0_77] : memref<1x384xf32, #tpu.memory_space<vmem>>, vector<1x384xf32>
    %251 = vector.broadcast %250 : vector<1x384xf32> to vector<64x384xf32>
    %252 = arith.addf %249, %251 : vector<64x384xf32>
    %253 = vector.shape_cast %252 : vector<64x384xf32> to vector<8x8x384xf32>
    %c0_78 = arith.constant 0 : index
    %c0_79 = arith.constant 0 : index
    %c0_80 = arith.constant 0 : index
    %254 = vector.load %arg13[%c0_78, %c0_79, %c0_80] : memref<8x8x384xf32, #tpu.memory_space<vmem>>, vector<8x8x384xf32>
    tpu.vector_store %arg13[%c0_78, %c0_79, %c0_80], %253 {strides = array<i32>} : memref<8x8x384xf32, #tpu.memory_space<vmem>>, vector<8x8x384xf32>,
    %c0_81 = arith.constant 0 : index
    %c0_82 = arith.constant 0 : index
    %255 = vector.load %arg6[%c0_81, %c0_82] : memref<128x384xf32, #tpu.memory_space<vmem>>, vector<128x384xf32>
    %c0_83 = arith.constant 0 : index
    %c0_84 = arith.constant 0 : index
    %256 = vector.load %arg8[%c0_83, %c0_84] : memref<1x128xf32, #tpu.memory_space<vmem>>, vector<1x128xf32>
    %257 = vector.shape_cast %256 : vector<1x128xf32> to vector<1x128xf32>
    %258 = vector.broadcast %257 : vector<1x128xf32> to vector<8x128xf32>
    %cst_85 = arith.constant 0.000000e+00 : f32
    %259 = vector.broadcast %cst_85 : f32 to vector<8x128xf32>
    %c0_i32_86 = arith.constant 0 : i32
    %260 = arith.index_cast %c0_i32_86 : i32 to index
    %c0_87 = arith.constant 0 : index
    %c0_88 = arith.constant 0 : index
    %261 = vector.load %arg13[%260, %c0_87, %c0_88] : memref<8x8x384xf32, #tpu.memory_space<vmem>>, vector<1x8x384xf32>
    %262 = vector.shape_cast %261 : vector<1x8x384xf32> to vector<8x384xf32>
    %cst_89 = arith.constant dense<0.000000e+00> : vector<8x384xf32>
    %263 = tpu.matmul %259, %255, %cst_89 {dimension_numbers = #tpu.dot_dimension_numbers<[1], [0], [0], [1], [0, 0, 1, 1], [], []>} : vector<8x128xf32>, vector<128x384xf32>, vector<8x384xf32> -> vector<8x384xf32>
    %264 = vector.extract_strided_slice %262 {offsets = [0, 0], sizes = [8, 256], strides = [1, 1]} : vector<8x384xf32> to vector<8x256xf32>
    %265 = vector.extract_strided_slice %263 {offsets = [0, 0], sizes = [8, 256], strides = [1, 1]} : vector<8x384xf32> to vector<8x256xf32>
    %266 = arith.addf %264, %265 : vector<8x256xf32>
    %267 = arith.negf %266 : vector<8x256xf32>
    %268 = math.exp %267 : vector<8x256xf32>
    %cst_90 = arith.constant 1.000000e+00 : f32
    %269 = vector.broadcast %cst_90 : f32 to vector<8x256xf32>
    %270 = arith.addf %269, %268 : vector<8x256xf32>
    %271 = arith.divf %269, %270 : vector<8x256xf32>
    %272 = vector.extract_strided_slice %271 {offsets = [0, 0], sizes = [8, 128], strides = [1, 1]} : vector<8x256xf32> to vector<8x128xf32>
    %273 = vector.extract_strided_slice %271 {offsets = [0, 128], sizes = [8, 128], strides = [1, 1]} : vector<8x256xf32> to vector<8x128xf32>
    %274 = vector.extract_strided_slice %262 {offsets = [0, 256], sizes = [8, 128], strides = [1, 1]} : vector<8x384xf32> to vector<8x128xf32>
    %275 = vector.extract_strided_slice %263 {offsets = [0, 256], sizes = [8, 128], strides = [1, 1]} : vector<8x384xf32> to vector<8x128xf32>
    %276 = arith.addf %275, %258 : vector<8x128xf32>
    %277 = arith.mulf %272, %276 : vector<8x128xf32>
    %278 = arith.addf %274, %277 : vector<8x128xf32>
    %279 = math.tanh %278 : vector<8x128xf32>
    %cst_91 = arith.constant 1.000000e+00 : f32
    %280 = vector.broadcast %cst_91 : f32 to vector<8x128xf32>
    %281 = arith.subf %280, %273 : vector<8x128xf32>
    %282 = arith.mulf %281, %279 : vector<8x128xf32>
    %283 = arith.mulf %273, %259 : vector<8x128xf32>
    %284 = arith.addf %282, %283 : vector<8x128xf32>
    %c1_i32_92 = arith.constant 1 : i32
    %285 = arith.index_cast %c1_i32_92 : i32 to index
    %c0_93 = arith.constant 0 : index
    %c0_94 = arith.constant 0 : index
    %286 = vector.load %arg13[%285, %c0_93, %c0_94] : memref<8x8x384xf32, #tpu.memory_space<vmem>>, vector<1x8x384xf32>
    %287 = vector.shape_cast %286 : vector<1x8x384xf32> to vector<8x384xf32>
    %cst_95 = arith.constant dense<0.000000e+00> : vector<8x384xf32>
    %288 = tpu.matmul %284, %255, %cst_95 {dimension_numbers = #tpu.dot_dimension_numbers<[1], [0], [0], [1], [0, 0, 1, 1], [], []>} : vector<8x128xf32>, vector<128x384xf32>, vector<8x384xf32> -> vector<8x384xf32>
    %289 = vector.extract_strided_slice %287 {offsets = [0, 0], sizes = [8, 256], strides = [1, 1]} : vector<8x384xf32> to vector<8x256xf32>
    %290 = vector.extract_strided_slice %288 {offsets = [0, 0], sizes = [8, 256], strides = [1, 1]} : vector<8x384xf32> to vector<8x256xf32>
    %291 = arith.addf %289, %290 : vector<8x256xf32>
    %292 = arith.negf %291 : vector<8x256xf32>
    %293 = math.exp %292 : vector<8x256xf32>
    %cst_96 = arith.constant 1.000000e+00 : f32
    %294 = vector.broadcast %cst_96 : f32 to vector<8x256xf32>
    %295 = arith.addf %294, %293 : vector<8x256xf32>
    %296 = arith.divf %294, %295 : vector<8x256xf32>
    %297 = vector.extract_strided_slice %296 {offsets = [0, 0], sizes = [8, 128], strides = [1, 1]} : vector<8x256xf32> to vector<8x128xf32>
    %298 = vector.extract_strided_slice %296 {offsets = [0, 128], sizes = [8, 128], strides = [1, 1]} : vector<8x256xf32> to vector<8x128xf32>
    %299 = vector.extract_strided_slice %287 {offsets = [0, 256], sizes = [8, 128], strides = [1, 1]} : vector<8x384xf32> to vector<8x128xf32>
    %300 = vector.extract_strided_slice %288 {offsets = [0, 256], sizes = [8, 128], strides = [1, 1]} : vector<8x384xf32> to vector<8x128xf32>
    %301 = arith.addf %300, %258 : vector<8x128xf32>
    %302 = arith.mulf %297, %301 : vector<8x128xf32>
    %303 = arith.addf %299, %302 : vector<8x128xf32>
    %304 = math.tanh %303 : vector<8x128xf32>
    %cst_97 = arith.constant 1.000000e+00 : f32
    %305 = vector.broadcast %cst_97 : f32 to vector<8x128xf32>
    %306 = arith.subf %305, %298 : vector<8x128xf32>
    %307 = arith.mulf %306, %304 : vector<8x128xf32>
    %308 = arith.mulf %298, %284 : vector<8x128xf32>
    %309 = arith.addf %307, %308 : vector<8x128xf32>
    %c2_i32_98 = arith.constant 2 : i32
    %310 = arith.index_cast %c2_i32_98 : i32 to index
    %c0_99 = arith.constant 0 : index
    %c0_100 = arith.constant 0 : index
    %311 = vector.load %arg13[%310, %c0_99, %c0_100] : memref<8x8x384xf32, #tpu.memory_space<vmem>>, vector<1x8x384xf32>
    %312 = vector.shape_cast %311 : vector<1x8x384xf32> to vector<8x384xf32>
    %cst_101 = arith.constant dense<0.000000e+00> : vector<8x384xf32>
    %313 = tpu.matmul %309, %255, %cst_101 {dimension_numbers = #tpu.dot_dimension_numbers<[1], [0], [0], [1], [0, 0, 1, 1], [], []>} : vector<8x128xf32>, vector<128x384xf32>, vector<8x384xf32> -> vector<8x384xf32>
    %314 = vector.extract_strided_slice %312 {offsets = [0, 0], sizes = [8, 256], strides = [1, 1]} : vector<8x384xf32> to vector<8x256xf32>
    %315 = vector.extract_strided_slice %313 {offsets = [0, 0], sizes = [8, 256], strides = [1, 1]} : vector<8x384xf32> to vector<8x256xf32>
    %316 = arith.addf %314, %315 : vector<8x256xf32>
    %317 = arith.negf %316 : vector<8x256xf32>
    %318 = math.exp %317 : vector<8x256xf32>
    %cst_102 = arith.constant 1.000000e+00 : f32
    %319 = vector.broadcast %cst_102 : f32 to vector<8x256xf32>
    %320 = arith.addf %319, %318 : vector<8x256xf32>
    %321 = arith.divf %319, %320 : vector<8x256xf32>
    %322 = vector.extract_strided_slice %321 {offsets = [0, 0], sizes = [8, 128], strides = [1, 1]} : vector<8x256xf32> to vector<8x128xf32>
    %323 = vector.extract_strided_slice %321 {offsets = [0, 128], sizes = [8, 128], strides = [1, 1]} : vector<8x256xf32> to vector<8x128xf32>
    %324 = vector.extract_strided_slice %312 {offsets = [0, 256], sizes = [8, 128], strides = [1, 1]} : vector<8x384xf32> to vector<8x128xf32>
    %325 = vector.extract_strided_slice %313 {offsets = [0, 256], sizes = [8, 128], strides = [1, 1]} : vector<8x384xf32> to vector<8x128xf32>
    %326 = arith.addf %325, %258 : vector<8x128xf32>
    %327 = arith.mulf %322, %326 : vector<8x128xf32>
    %328 = arith.addf %324, %327 : vector<8x128xf32>
    %329 = math.tanh %328 : vector<8x128xf32>
    %cst_103 = arith.constant 1.000000e+00 : f32
    %330 = vector.broadcast %cst_103 : f32 to vector<8x128xf32>
    %331 = arith.subf %330, %323 : vector<8x128xf32>
    %332 = arith.mulf %331, %329 : vector<8x128xf32>
    %333 = arith.mulf %323, %309 : vector<8x128xf32>
    %334 = arith.addf %332, %333 : vector<8x128xf32>
    %c3_i32_104 = arith.constant 3 : i32
    %335 = arith.index_cast %c3_i32_104 : i32 to index
    %c0_105 = arith.constant 0 : index
    %c0_106 = arith.constant 0 : index
    %336 = vector.load %arg13[%335, %c0_105, %c0_106] : memref<8x8x384xf32, #tpu.memory_space<vmem>>, vector<1x8x384xf32>
    %337 = vector.shape_cast %336 : vector<1x8x384xf32> to vector<8x384xf32>
    %cst_107 = arith.constant dense<0.000000e+00> : vector<8x384xf32>
    %338 = tpu.matmul %334, %255, %cst_107 {dimension_numbers = #tpu.dot_dimension_numbers<[1], [0], [0], [1], [0, 0, 1, 1], [], []>} : vector<8x128xf32>, vector<128x384xf32>, vector<8x384xf32> -> vector<8x384xf32>
    %339 = vector.extract_strided_slice %337 {offsets = [0, 0], sizes = [8, 256], strides = [1, 1]} : vector<8x384xf32> to vector<8x256xf32>
    %340 = vector.extract_strided_slice %338 {offsets = [0, 0], sizes = [8, 256], strides = [1, 1]} : vector<8x384xf32> to vector<8x256xf32>
    %341 = arith.addf %339, %340 : vector<8x256xf32>
    %342 = arith.negf %341 : vector<8x256xf32>
    %343 = math.exp %342 : vector<8x256xf32>
    %cst_108 = arith.constant 1.000000e+00 : f32
    %344 = vector.broadcast %cst_108 : f32 to vector<8x256xf32>
    %345 = arith.addf %344, %343 : vector<8x256xf32>
    %346 = arith.divf %344, %345 : vector<8x256xf32>
    %347 = vector.extract_strided_slice %346 {offsets = [0, 0], sizes = [8, 128], strides = [1, 1]} : vector<8x256xf32> to vector<8x128xf32>
    %348 = vector.extract_strided_slice %346 {offsets = [0, 128], sizes = [8, 128], strides = [1, 1]} : vector<8x256xf32> to vector<8x128xf32>
    %349 = vector.extract_strided_slice %337 {offsets = [0, 256], sizes = [8, 128], strides = [1, 1]} : vector<8x384xf32> to vector<8x128xf32>
    %350 = vector.extract_strided_slice %338 {offsets = [0, 256], sizes = [8, 128], strides = [1, 1]} : vector<8x384xf32> to vector<8x128xf32>
    %351 = arith.addf %350, %258 : vector<8x128xf32>
    %352 = arith.mulf %347, %351 : vector<8x128xf32>
    %353 = arith.addf %349, %352 : vector<8x128xf32>
    %354 = math.tanh %353 : vector<8x128xf32>
    %cst_109 = arith.constant 1.000000e+00 : f32
    %355 = vector.broadcast %cst_109 : f32 to vector<8x128xf32>
    %356 = arith.subf %355, %348 : vector<8x128xf32>
    %357 = arith.mulf %356, %354 : vector<8x128xf32>
    %358 = arith.mulf %348, %334 : vector<8x128xf32>
    %359 = arith.addf %357, %358 : vector<8x128xf32>
    %c4_i32_110 = arith.constant 4 : i32
    %360 = arith.index_cast %c4_i32_110 : i32 to index
    %c0_111 = arith.constant 0 : index
    %c0_112 = arith.constant 0 : index
    %361 = vector.load %arg13[%360, %c0_111, %c0_112] : memref<8x8x384xf32, #tpu.memory_space<vmem>>, vector<1x8x384xf32>
    %362 = vector.shape_cast %361 : vector<1x8x384xf32> to vector<8x384xf32>
    %cst_113 = arith.constant dense<0.000000e+00> : vector<8x384xf32>
    %363 = tpu.matmul %359, %255, %cst_113 {dimension_numbers = #tpu.dot_dimension_numbers<[1], [0], [0], [1], [0, 0, 1, 1], [], []>} : vector<8x128xf32>, vector<128x384xf32>, vector<8x384xf32> -> vector<8x384xf32>
    %364 = vector.extract_strided_slice %362 {offsets = [0, 0], sizes = [8, 256], strides = [1, 1]} : vector<8x384xf32> to vector<8x256xf32>
    %365 = vector.extract_strided_slice %363 {offsets = [0, 0], sizes = [8, 256], strides = [1, 1]} : vector<8x384xf32> to vector<8x256xf32>
    %366 = arith.addf %364, %365 : vector<8x256xf32>
    %367 = arith.negf %366 : vector<8x256xf32>
    %368 = math.exp %367 : vector<8x256xf32>
    %cst_114 = arith.constant 1.000000e+00 : f32
    %369 = vector.broadcast %cst_114 : f32 to vector<8x256xf32>
    %370 = arith.addf %369, %368 : vector<8x256xf32>
    %371 = arith.divf %369, %370 : vector<8x256xf32>
    %372 = vector.extract_strided_slice %371 {offsets = [0, 0], sizes = [8, 128], strides = [1, 1]} : vector<8x256xf32> to vector<8x128xf32>
    %373 = vector.extract_strided_slice %371 {offsets = [0, 128], sizes = [8, 128], strides = [1, 1]} : vector<8x256xf32> to vector<8x128xf32>
    %374 = vector.extract_strided_slice %362 {offsets = [0, 256], sizes = [8, 128], strides = [1, 1]} : vector<8x384xf32> to vector<8x128xf32>
    %375 = vector.extract_strided_slice %363 {offsets = [0, 256], sizes = [8, 128], strides = [1, 1]} : vector<8x384xf32> to vector<8x128xf32>
    %376 = arith.addf %375, %258 : vector<8x128xf32>
    %377 = arith.mulf %372, %376 : vector<8x128xf32>
    %378 = arith.addf %374, %377 : vector<8x128xf32>
    %379 = math.tanh %378 : vector<8x128xf32>
    %cst_115 = arith.constant 1.000000e+00 : f32
    %380 = vector.broadcast %cst_115 : f32 to vector<8x128xf32>
    %381 = arith.subf %380, %373 : vector<8x128xf32>
    %382 = arith.mulf %381, %379 : vector<8x128xf32>
    %383 = arith.mulf %373, %359 : vector<8x128xf32>
    %384 = arith.addf %382, %383 : vector<8x128xf32>
    %c5_i32_116 = arith.constant 5 : i32
    %385 = arith.index_cast %c5_i32_116 : i32 to index
    %c0_117 = arith.constant 0 : index
    %c0_118 = arith.constant 0 : index
    %386 = vector.load %arg13[%385, %c0_117, %c0_118] : memref<8x8x384xf32, #tpu.memory_space<vmem>>, vector<1x8x384xf32>
    %387 = vector.shape_cast %386 : vector<1x8x384xf32> to vector<8x384xf32>
    %cst_119 = arith.constant dense<0.000000e+00> : vector<8x384xf32>
    %388 = tpu.matmul %384, %255, %cst_119 {dimension_numbers = #tpu.dot_dimension_numbers<[1], [0], [0], [1], [0, 0, 1, 1], [], []>} : vector<8x128xf32>, vector<128x384xf32>, vector<8x384xf32> -> vector<8x384xf32>
    %389 = vector.extract_strided_slice %387 {offsets = [0, 0], sizes = [8, 256], strides = [1, 1]} : vector<8x384xf32> to vector<8x256xf32>
    %390 = vector.extract_strided_slice %388 {offsets = [0, 0], sizes = [8, 256], strides = [1, 1]} : vector<8x384xf32> to vector<8x256xf32>
    %391 = arith.addf %389, %390 : vector<8x256xf32>
    %392 = arith.negf %391 : vector<8x256xf32>
    %393 = math.exp %392 : vector<8x256xf32>
    %cst_120 = arith.constant 1.000000e+00 : f32
    %394 = vector.broadcast %cst_120 : f32 to vector<8x256xf32>
    %395 = arith.addf %394, %393 : vector<8x256xf32>
    %396 = arith.divf %394, %395 : vector<8x256xf32>
    %397 = vector.extract_strided_slice %396 {offsets = [0, 0], sizes = [8, 128], strides = [1, 1]} : vector<8x256xf32> to vector<8x128xf32>
    %398 = vector.extract_strided_slice %396 {offsets = [0, 128], sizes = [8, 128], strides = [1, 1]} : vector<8x256xf32> to vector<8x128xf32>
    %399 = vector.extract_strided_slice %387 {offsets = [0, 256], sizes = [8, 128], strides = [1, 1]} : vector<8x384xf32> to vector<8x128xf32>
    %400 = vector.extract_strided_slice %388 {offsets = [0, 256], sizes = [8, 128], strides = [1, 1]} : vector<8x384xf32> to vector<8x128xf32>
    %401 = arith.addf %400, %258 : vector<8x128xf32>
    %402 = arith.mulf %397, %401 : vector<8x128xf32>
    %403 = arith.addf %399, %402 : vector<8x128xf32>
    %404 = math.tanh %403 : vector<8x128xf32>
    %cst_121 = arith.constant 1.000000e+00 : f32
    %405 = vector.broadcast %cst_121 : f32 to vector<8x128xf32>
    %406 = arith.subf %405, %398 : vector<8x128xf32>
    %407 = arith.mulf %406, %404 : vector<8x128xf32>
    %408 = arith.mulf %398, %384 : vector<8x128xf32>
    %409 = arith.addf %407, %408 : vector<8x128xf32>
    %c6_i32_122 = arith.constant 6 : i32
    %410 = arith.index_cast %c6_i32_122 : i32 to index
    %c0_123 = arith.constant 0 : index
    %c0_124 = arith.constant 0 : index
    %411 = vector.load %arg13[%410, %c0_123, %c0_124] : memref<8x8x384xf32, #tpu.memory_space<vmem>>, vector<1x8x384xf32>
    %412 = vector.shape_cast %411 : vector<1x8x384xf32> to vector<8x384xf32>
    %cst_125 = arith.constant dense<0.000000e+00> : vector<8x384xf32>
    %413 = tpu.matmul %409, %255, %cst_125 {dimension_numbers = #tpu.dot_dimension_numbers<[1], [0], [0], [1], [0, 0, 1, 1], [], []>} : vector<8x128xf32>, vector<128x384xf32>, vector<8x384xf32> -> vector<8x384xf32>
    %414 = vector.extract_strided_slice %412 {offsets = [0, 0], sizes = [8, 256], strides = [1, 1]} : vector<8x384xf32> to vector<8x256xf32>
    %415 = vector.extract_strided_slice %413 {offsets = [0, 0], sizes = [8, 256], strides = [1, 1]} : vector<8x384xf32> to vector<8x256xf32>
    %416 = arith.addf %414, %415 : vector<8x256xf32>
    %417 = arith.negf %416 : vector<8x256xf32>
    %418 = math.exp %417 : vector<8x256xf32>
    %cst_126 = arith.constant 1.000000e+00 : f32
    %419 = vector.broadcast %cst_126 : f32 to vector<8x256xf32>
    %420 = arith.addf %419, %418 : vector<8x256xf32>
    %421 = arith.divf %419, %420 : vector<8x256xf32>
    %422 = vector.extract_strided_slice %421 {offsets = [0, 0], sizes = [8, 128], strides = [1, 1]} : vector<8x256xf32> to vector<8x128xf32>
    %423 = vector.extract_strided_slice %421 {offsets = [0, 128], sizes = [8, 128], strides = [1, 1]} : vector<8x256xf32> to vector<8x128xf32>
    %424 = vector.extract_strided_slice %412 {offsets = [0, 256], sizes = [8, 128], strides = [1, 1]} : vector<8x384xf32> to vector<8x128xf32>
    %425 = vector.extract_strided_slice %413 {offsets = [0, 256], sizes = [8, 128], strides = [1, 1]} : vector<8x384xf32> to vector<8x128xf32>
    %426 = arith.addf %425, %258 : vector<8x128xf32>
    %427 = arith.mulf %422, %426 : vector<8x128xf32>
    %428 = arith.addf %424, %427 : vector<8x128xf32>
    %429 = math.tanh %428 : vector<8x128xf32>
    %cst_127 = arith.constant 1.000000e+00 : f32
    %430 = vector.broadcast %cst_127 : f32 to vector<8x128xf32>
    %431 = arith.subf %430, %423 : vector<8x128xf32>
    %432 = arith.mulf %431, %429 : vector<8x128xf32>
    %433 = arith.mulf %423, %409 : vector<8x128xf32>
    %434 = arith.addf %432, %433 : vector<8x128xf32>
    %c7_i32_128 = arith.constant 7 : i32
    %435 = arith.index_cast %c7_i32_128 : i32 to index
    %c0_129 = arith.constant 0 : index
    %c0_130 = arith.constant 0 : index
    %436 = vector.load %arg13[%435, %c0_129, %c0_130] : memref<8x8x384xf32, #tpu.memory_space<vmem>>, vector<1x8x384xf32>
    %437 = vector.shape_cast %436 : vector<1x8x384xf32> to vector<8x384xf32>
    %cst_131 = arith.constant dense<0.000000e+00> : vector<8x384xf32>
    %438 = tpu.matmul %434, %255, %cst_131 {dimension_numbers = #tpu.dot_dimension_numbers<[1], [0], [0], [1], [0, 0, 1, 1], [], []>} : vector<8x128xf32>, vector<128x384xf32>, vector<8x384xf32> -> vector<8x384xf32>
    %439 = vector.extract_strided_slice %437 {offsets = [0, 0], sizes = [8, 256], strides = [1, 1]} : vector<8x384xf32> to vector<8x256xf32>
    %440 = vector.extract_strided_slice %438 {offsets = [0, 0], sizes = [8, 256], strides = [1, 1]} : vector<8x384xf32> to vector<8x256xf32>
    %441 = arith.addf %439, %440 : vector<8x256xf32>
    %442 = arith.negf %441 : vector<8x256xf32>
    %443 = math.exp %442 : vector<8x256xf32>
    %cst_132 = arith.constant 1.000000e+00 : f32
    %444 = vector.broadcast %cst_132 : f32 to vector<8x256xf32>
    %445 = arith.addf %444, %443 : vector<8x256xf32>
    %446 = arith.divf %444, %445 : vector<8x256xf32>
    %447 = vector.extract_strided_slice %446 {offsets = [0, 0], sizes = [8, 128], strides = [1, 1]} : vector<8x256xf32> to vector<8x128xf32>
    %448 = vector.extract_strided_slice %446 {offsets = [0, 128], sizes = [8, 128], strides = [1, 1]} : vector<8x256xf32> to vector<8x128xf32>
    %449 = vector.extract_strided_slice %437 {offsets = [0, 256], sizes = [8, 128], strides = [1, 1]} : vector<8x384xf32> to vector<8x128xf32>
    %450 = vector.extract_strided_slice %438 {offsets = [0, 256], sizes = [8, 128], strides = [1, 1]} : vector<8x384xf32> to vector<8x128xf32>
    %451 = arith.addf %450, %258 : vector<8x128xf32>
    %452 = arith.mulf %447, %451 : vector<8x128xf32>
    %453 = arith.addf %449, %452 : vector<8x128xf32>
    %454 = math.tanh %453 : vector<8x128xf32>
    %cst_133 = arith.constant 1.000000e+00 : f32
    %455 = vector.broadcast %cst_133 : f32 to vector<8x128xf32>
    %456 = arith.subf %455, %448 : vector<8x128xf32>
    %457 = arith.mulf %456, %454 : vector<8x128xf32>
    %458 = arith.mulf %448, %434 : vector<8x128xf32>
    %459 = arith.addf %457, %458 : vector<8x128xf32>
    %c8_i32_134 = arith.constant 8 : i32
    %c0_135 = arith.constant 0 : index
    %c0_136 = arith.constant 0 : index
    %460 = vector.load %arg9[%c0_135, %c0_136] : memref<128x128xf32, #tpu.memory_space<vmem>>, vector<128x128xf32>
    %cst_137 = arith.constant dense<0.000000e+00> : vector<8x128xf32>
    %461 = tpu.matmul %459, %460, %cst_137 {dimension_numbers = #tpu.dot_dimension_numbers<[1], [0], [0], [1], [0, 0, 1, 1], [], []>} : vector<8x128xf32>, vector<128x128xf32>, vector<8x128xf32> -> vector<8x128xf32>
    %c0_138 = arith.constant 0 : index
    %c0_139 = arith.constant 0 : index
    %462 = vector.load %arg10[%c0_138, %c0_139] : memref<1x128xf32, #tpu.memory_space<vmem>>, vector<1x128xf32>
    %463 = vector.broadcast %462 : vector<1x128xf32> to vector<8x128xf32>
    %464 = arith.addf %461, %463 : vector<8x128xf32>
    %c0_140 = arith.constant 0 : index
    %c0_141 = arith.constant 0 : index
    %465 = vector.load %arg11[%c0_140, %c0_141] : memref<8x128xf32, #tpu.memory_space<vmem>>, vector<8x128xf32>
    tpu.vector_store %arg11[%c0_140, %c0_141], %464 {strides = array<i32>} : memref<8x128xf32, #tpu.memory_space<vmem>>, vector<8x128xf32>,
    return
  }
}

</mosaic_0001>

<bundles_post_ra>
// kernel: gru_model_forward.1
= control target key start
LH: loop header
LB: loop body
LE: loop exit
PB: predicated region body
PF: predicated region fallthrough
CT: control target
= control target key end

     0   :  { %16 = vsyncpa [#allocation5], 0  ;;  %s4562_s0 = inlined_call_operand.vmem [shape: f32[8,8,128], index: 0, kind: input, shape index: {}]   ;;  %s4563_s1 = inlined_call_operand.hbm [shape: f32[128,384], index: 1, kind: input, shape index: {}]   ;;  %s4564_s2 = inlined_call_operand.hbm [shape: f32[128,384], index: 2, kind: input, shape index: {}]   ;;  %s4565_s3 = inlined_call_operand.vmem [shape: f32[1,384], index: 3, kind: input, shape index: {}]   ;;  %s4566_s4 = inlined_call_operand.vmem [shape: f32[1,128], index: 4, kind: input, shape index: {}]   ;;  %s4567_s5 = inlined_call_operand.hbm [shape: f32[128,384], index: 5, kind: input, shape index: {}]   ;;  %s4568_s6 = inlined_call_operand.hbm [shape: f32[128,384], index: 6, kind: input, shape index: {}]   ;;  %s4569_s7 = inlined_call_operand.vmem [shape: f32[1,384], index: 7, kind: input, shape index: {}]   ;;  %s4570_s8 = inlined_call_operand.vmem [shape: f32[1,128], index: 8, kind: input, shape index: {}]   ;;  %s4571_s9 = inlined_call_operand.hbm [shape: f32[128,128], index: 9, kind: input, shape index: {}]   ;;  %s4572_s10 = inlined_call_operand.vmem [shape: f32[1,128], index: 10, kind: input, shape index: {}]   ;;  %s4573_s11 = inlined_call_operand.vmem [shape: f32[8,128], index: 11, kind: output, shape index: {}]  }
   0x1   :  { %17 = vsyncpa [#allocation7], 0 }
   0x2   :  { %18 = vsyncpa [#allocation10], 0  ;;  %s38_s19 = sshll.u32 %s4564_s2, 4  ;;  %s2917_s20 = smov [#allocation6]   ;;  %s39_s19 = int_to_ptr.hbm [resolvable:$true] %s38_s19 }
   0x3   :  { %s40_s21 = sshll.u32 %s2917_s20, 4  ;;  %s68_s24 = sshll.u32 %s4568_s6, 4  ;;  %s41_s21 = int_to_ptr.vmem [resolvable:$true] %s40_s21  ;;  %s69_s24 = int_to_ptr.hbm [resolvable:$true] %s68_s24 }
   0x4   :  { %s2918_s25 = smov 384   ;;  %s2919_s26 = smov 24  }
   0x5   :  { %46 = dma.hbm_to_vmem [thread:$0]  %s39_s19, 6144, %s41_s21, [#allocation7], %s2918_s25, %s2918_s25, %s2919_s26  }
   0x6   :  { %s2920_s27 = smov [#allocation9]   ;;  %s25_s12 = sshll.u32 %s4563_s1, 4  ;;  %s26_s12 = int_to_ptr.hbm [resolvable:$true] %s25_s12 }
   0x7   :  { %s70_s28 = sshll.u32 %s2920_s27, 4  ;;  %s55_s14 = sshll.u32 %s4567_s5, 4  ;;  %s71_s28 = int_to_ptr.vmem [resolvable:$true] %s70_s28  ;;  %s56_s14 = int_to_ptr.hbm [resolvable:$true] %s55_s14 }
   0x8   :  { %76 = dma.hbm_to_vmem [thread:$0]  %s69_s24, 6144, %s71_s28, [#allocation10], %s2918_s25, %s2918_s25, %s2919_s26  }
   0x9   :  { %s2921_s15 = smov [#allocation4]   ;;  %s2922_s6 = smov [#allocation8]  }
   0xa   :  { %s27_s16 = sshll.u32 %s2921_s15, 4  ;;  %s57_s17 = sshll.u32 %s2922_s6, 4  ;;  %s28_s16 = int_to_ptr.vmem [resolvable:$true] %s27_s16  ;;  %s58_s17 = int_to_ptr.vmem [resolvable:$true] %s57_s17 }
   0xb   :  { %33 = dma.hbm_to_vmem [thread:$0]  %s26_s12, 6144, %s28_s16, [#allocation5], %s2918_s25, %s2918_s25, %s2919_s26  }
   0xc   :  { %s85_s20 = sshll.u32 %s4571_s9, 4  ;;  %s2923_s1 = smov [#allocation11]   ;;  %s86_s20 = int_to_ptr.hbm [resolvable:$true] %s85_s20 }
   0xd   :  { %63 = dma.hbm_to_vmem [thread:$0]  %s56_s14, 6144, %s58_s17, [#allocation7], %s2918_s25, %s2918_s25, %s2919_s26  }
   0xe   :  { %s87_s21 = sshll.u32 %s2923_s1, 4  ;;  %s2924_s22 = smov 128   ;;  %s88_s21 = int_to_ptr.vmem [resolvable:$true] %s87_s21 }
   0xf   :  { %s2925_s23 = smov 8  }
  0x10   :  { %93 = dma.hbm_to_vmem [thread:$0]  %s86_s20, 2048, %s88_s21, [#allocation10], %s2924_s22, %s2924_s22, %s2925_s23  }
  0x11   :  { %2911 = dma.done.wait [#allocation5], 6144  }
  0x12   :  { %2912 = vsyncadd [#allocation5], 4294961152 }
  0x13   :  { %2913 = dma.done.wait [#allocation7], 12288  }
  0x14   :  { %2914 = vsyncadd [#allocation7], 4294955008 }
  0x15   :  { %2915 = dma.done.wait [#allocation10], 8192  }
  0x16   :  { %2916 = vsyncadd [#allocation10], 4294959104  ;;  %v169_v0 = vld [vmem:[#allocation4 + $0x168] sm:$0xff]  ;;  %v166_v2 = vld [vmem:[#allocation4 + $0x150] sm:$0xff]  ;;  %v4574_v47 = vmov 0.0  }
  0x17   :  { %v3002_v1 = vld [vmem:[#allocation6 + $0x168] sm:$0xff]  ;;  %180 = vmatpush.msra.mxu0 %v169_v0  ;;  %v3005_v3 = vld [vmem:[#allocation6 + $0x150] sm:$0xff]  ;;  %v163_v4 = vld [vmem:[#allocation4 + $0x138] sm:$0xff] }
  0x18   :  { %382 = vmatpush.msra.mxu3 %v3002_v1  ;;  %v3007_v5 = vld [vmem:[#allocation6 + $0x138] sm:$0xff]  ;;  %v160_v6 = vld [vmem:[#allocation4 + $0x120] sm:$0xff]  ;;  %v157_v8 = vld [vmem:[#allocation4 + $0x108] sm:$0xff] }
  0x19   :  { %181 = vmatpush.msra.mxu0 %v166_v2  ;;  %v3010_v7 = vld [vmem:[#allocation6 + $0x120] sm:$0xff]  ;;  %v3013_v9 = vld [vmem:[#allocation6 + $0x108] sm:$0xff]  ;;  %v154_v10 = vld [vmem:[#allocation4 + $0xf0] sm:$0xff] }
  0x1a   :  { %383 = vmatpush.msra.mxu3 %v3005_v3  ;;  %v3016_v11 = vld [vmem:[#allocation6 + $0xf0] sm:$0xff]  ;;  %v151_v12 = vld [vmem:[#allocation4 + $0xd8] sm:$0xff]  ;;  %v148_v14 = vld [vmem:[#allocation4 + $0xc0] sm:$0xff] }
  0x1b   :  { %182 = vmatpush.msra.mxu0 %v163_v4  ;;  %v3019_v13 = vld [vmem:[#allocation6 + $0xd8] sm:$0xff]  ;;  %v3022_v15 = vld [vmem:[#allocation6 + $0xc0] sm:$0xff]  ;;  %v170_v16 = vld [vmem:[#allocation4 + $0x170] sm:$0xff] }
  0x1c   :  { %384 = vmatpush.msra.mxu3 %v3007_v5  ;;  %v167_v17 = vld [vmem:[#allocation4 + $0x158] sm:$0xff]  ;;  %v145_v18 = vld [vmem:[#allocation4 + $0xa8] sm:$0xff]  ;;  %221 = vmatpush.msra.mxu1 %v170_v16  ;;  %v164_v20 = vld [vmem:[#allocation4 + $0x140] sm:$0xff] }
  0x1d   :  { %183 = vmatpush.msra.mxu0 %v160_v6  ;;  %v3025_v19 = vld [vmem:[#allocation6 + $0xa8] sm:$0xff]  ;;  %v142_v21 = vld [vmem:[#allocation4 + $0x90] sm:$0xff]  ;;  %v139_v24 = vld [vmem:[#allocation4 + $0x78] sm:$0xff] }
  0x1e   :  { %385 = vmatpush.msra.mxu3 %v3010_v7  ;;  %v3028_v22 = vld [vmem:[#allocation6 + $0x90] sm:$0xff]  ;;  %222 = vmatpush.msra.mxu1 %v167_v17  ;;  %v161_v23 = vld [vmem:[#allocation4 + $0x128] sm:$0xff]  ;;  %v3031_v25 = vld [vmem:[#allocation6 + $0x78] sm:$0xff] }
  0x1f   :  { %184 = vmatpush.msra.mxu0 %v157_v8  ;;  %v136_v26 = vld [vmem:[#allocation4 + $0x60] sm:$0xff]  ;;  %v158_v28 = vld [vmem:[#allocation4 + $0x110] sm:$0xff]  ;;  %v155_v29 = vld [vmem:[#allocation4 + $0xf8] sm:$0xff] }
  0x20   :  { %386 = vmatpush.msra.mxu3 %v3013_v9  ;;  %223 = vmatpush.msra.mxu1 %v164_v20  ;;  %v3034_v27 = vld [vmem:[#allocation6 + $0x60] sm:$0xff]  ;;  %v133_v30 = vld [vmem:[#allocation4 + $0x48] sm:$0xff]  ;;  %v130_v33 = vld [vmem:[#allocation4 + $0x30] sm:$0xff] }
  0x21   :  { %185 = vmatpush.msra.mxu0 %v154_v10  ;;  %v3037_v31 = vld [vmem:[#allocation6 + $0x48] sm:$0xff]  ;;  %v152_v32 = vld [vmem:[#allocation4 + $0xe0] sm:$0xff]  ;;  %v3040_v34 = vld [vmem:[#allocation6 + $0x30] sm:$0xff] }
  0x22   :  { %387 = vmatpush.msra.mxu3 %v3016_v11  ;;  %224 = vmatpush.msra.mxu1 %v161_v23  ;;  %v149_v35 = vld [vmem:[#allocation4 + $0xc8] sm:$0xff]  ;;  %v127_v36 = vld [vmem:[#allocation4 + $0x18] sm:$0xff]  ;;  %v146_v38 = vld [vmem:[#allocation4 + $0xb0] sm:$0xff] }
  0x23   :  { %186 = vmatpush.msra.mxu0 %v151_v12  ;;  %v3043_v37 = vld [vmem:[#allocation6 + $0x18] sm:$0xff]  ;;  %v124_v39 = vld [vmem:[#allocation4] sm:$0xff]  ;;  %v3054_v43 = vld [vmem:[#allocation6 + $0x170] sm:$0xff] }
  0x24   :  { %388 = vmatpush.msra.mxu3 %v3019_v13  ;;  %225 = vmatpush.msra.mxu1 %v158_v28  ;;  %4623 = vst [vmem:[#allocation15_spill] sm:$0xff] %v3043_v37  ;;  %v3046_v40 = vld [vmem:[#allocation6] sm:$0xff]  ;;  %v171_v42 = vld [vmem:[#allocation4 + $0x178] sm:$0xff]  ;;  %v165_v51 = vld [vmem:[#allocation4 + $0x148] sm:$0xff] }
  0x25   :  { %187 = vmatpush.msra.mxu0 %v148_v14  ;;  %4624 = vst [vmem:[#allocation16_spill] sm:$0xff] %v3046_v40  ;;  %v3052_v41 = vld [vmem:[%s4562_s0] sm:$0xff]  ;;  %v3056_v44 = vld [vmem:[#allocation6 + $0x178] sm:$0xff]  ;;  %262 = vmatpush.msra.mxu2 %v171_v42  ;;  %v3069_v53 = vld [vmem:[#allocation6 + $0x148] sm:$0xff] }
  0x26   :  { %389 = vmatpush.msra.mxu3 %v3022_v15  ;;  %226 = vmatpush.msra.mxu1 %v155_v29  ;;  %v143_v45 = vld [vmem:[#allocation4 + $0x98] sm:$0xff]  ;;  %v168_v46 = vld [vmem:[#allocation4 + $0x160] sm:$0xff]  ;;  %v137_v54 = vld [vmem:[#allocation4 + $0x68] sm:$0xff] }
  0x27   :  { %188 = vmatpush.msra.mxu0 %v145_v18  ;;  %v3061_v48 = vld [vmem:[#allocation6 + $0x158] sm:$0xff]  ;;  %v3063_v49 = vld [vmem:[#allocation6 + $0x160] sm:$0xff]  ;;  %263 = vmatpush.msra.mxu2 %v168_v46  ;;  %v162_v55 = vld [vmem:[#allocation4 + $0x130] sm:$0xff] }
  0x28   :  { %390 = vmatpush.msra.mxu3 %v3025_v19  ;;  %227 = vmatpush.msra.mxu1 %v152_v32  ;;  %v140_v50 = vld [vmem:[#allocation4 + $0x80] sm:$0xff]  ;;  %v3073_v56 = vld [vmem:[#allocation6 + $0x128] sm:$0xff]  ;;  %v3075_v57 = vld [vmem:[#allocation6 + $0x130] sm:$0xff] }
  0x29   :  { %189 = vmatpush.msra.mxu0 %v142_v21  ;;  %v3067_v52 = vld [vmem:[#allocation6 + $0x140] sm:$0xff]  ;;  %264 = vmatpush.msra.mxu2 %v165_v51  ;;  %v3081_v58 = vld [vmem:[%s4562_s0 + $0x8] sm:$0xff]  ;;  %v134_v59 = vld [vmem:[#allocation4 + $0x50] sm:$0xff] }
  0x2a   :  { %391 = vmatpush.msra.mxu3 %v3028_v22  ;;  %228 = vmatpush.msra.mxu1 %v149_v35  ;;  %v3084_v60 = vld [vmem:[#allocation6 + $0x110] sm:$0xff]  ;;  %v3086_v61 = vld [vmem:[#allocation6 + $0x118] sm:$0xff]  ;;  %v3093_v2 = vld [vmem:[#allocation6 + $0x100] sm:$0xff] }
  0x2b   :  { %190 = vmatpush.msra.mxu0 %v139_v24  ;;  %265 = vmatpush.msra.mxu2 %v162_v55  ;;  %v131_v62 = vld [vmem:[#allocation4 + $0x38] sm:$0xff]  ;;  %v128_v4 = vld [vmem:[#allocation4 + $0x20] sm:$0xff]  ;;  %v3099_v10 = vld [vmem:[#allocation6 + $0xe8] sm:$0xff] }
  0x2c   :  { %392 = vmatpush.msra.mxu3 %v3031_v25  ;;  %229 = vmatpush.msra.mxu1 %v146_v38  ;;  %v159_v63 = vld [vmem:[#allocation4 + $0x118] sm:$0xff]  ;;  %v156_v6 = vld [vmem:[#allocation4 + $0x100] sm:$0xff]  ;;  %v125_v12 = vld [vmem:[#allocation4 + $0x8] sm:$0xff] }
  0x2d   :  { %191 = vmatpush.msra.mxu0 %v136_v26  ;;  %v3091_v0 = vld [vmem:[#allocation6 + $0xf8] sm:$0xff]  ;;  %v3097_v8 = vld [vmem:[#allocation6 + $0xe0] sm:$0xff]  ;;  %266 = vmatpush.msra.mxu2 %v159_v63  ;;  %v153_v14 = vld [vmem:[#allocation4 + $0xe8] sm:$0xff] }
  0x2e   :  { %393 = vmatpush.msra.mxu3 %v3034_v27  ;;  %230 = vmatpush.msra.mxu1 %v143_v45  ;;  %v3103_v16 = vld [vmem:[#allocation6 + $0xc8] sm:$0xff]  ;;  %v3105_v17 = vld [vmem:[#allocation6 + $0xd0] sm:$0xff]  ;;  %v3116_v21 = vld [vmem:[#allocation6 + $0xb8] sm:$0xff] }
  0x2f   :  { %192 = vmatpush.msra.mxu0 %v133_v30  ;;  %267 = vmatpush.msra.mxu2 %v156_v6  ;;  %v3111_v18 = vld [vmem:[%s4562_s0 + $0x10] sm:$0xff]  ;;  %v3121_v24 = vld [vmem:[#allocation6 + $0x98] sm:$0xff]  ;;  %v3124_v26 = vld [vmem:[#allocation6 + $0xa0] sm:$0xff] }
  0x30   :  { %394 = vmatpush.msra.mxu3 %v3037_v31  ;;  %231 = vmatpush.msra.mxu1 %v140_v50  ;;  %v3114_v20 = vld [vmem:[#allocation6 + $0xb0] sm:$0xff]  ;;  %v147_v28 = vld [vmem:[#allocation4 + $0xb8] sm:$0xff]  ;;  %v3128_v29 = vld [vmem:[#allocation6 + $0x80] sm:$0xff] }
  0x31   :  { %193 = vmatpush.msra.mxu0 %v130_v33  ;;  %268 = vmatpush.msra.mxu2 %v153_v14  ;;  %v150_v23 = vld [vmem:[#allocation4 + $0xd0] sm:$0xff]  ;;  %v3130_v30 = vld [vmem:[#allocation6 + $0x88] sm:$0xff]  ;;  %v144_v32 = vld [vmem:[#allocation4 + $0xa0] sm:$0xff] }
  0x32   :  { %395 = vmatpush.msra.mxu3 %v3040_v34  ;;  %232 = vmatpush.msra.mxu1 %v137_v54  ;;  %v3135_v33 = vld [vmem:[#allocation6 + $0x68] sm:$0xff]  ;;  %v3137_v35 = vld [vmem:[#allocation6 + $0x70] sm:$0xff]  ;;  %v3149_v42 = vld [vmem:[#allocation6 + $0x58] sm:$0xff] }
  0x33   :  { %194 = vmatpush.msra.mxu0 %v127_v36  ;;  %269 = vmatpush.msra.mxu2 %v150_v23  ;;  %v3144_v36 = vld [vmem:[%s4562_s0 + $0x18] sm:$0xff]  ;;  %v141_v38 = vld [vmem:[#allocation4 + $0x88] sm:$0xff]  ;;  %v138_v45 = vld [vmem:[#allocation4 + $0x70] sm:$0xff] }
  0x34   :  { %396 = vmatpush.msra.mxu3 %v3043_v37  ;;  %233 = vmatpush.msra.mxu1 %v134_v59  ;;  %v3155_v46 = vld [vmem:[#allocation6 + $0x38] sm:$0xff]  ;;  %v3157_v50 = vld [vmem:[#allocation6 + $0x40] sm:$0xff]  ;;  %v3163_v55 = vld [vmem:[#allocation6 + $0x28] sm:$0xff] }
  0x35   :  { %195 = vmatpush.msra.mxu0 %v124_v39  ;;  %270 = vmatpush.msra.mxu2 %v147_v28  ;;  %v3147_v39 = vld [vmem:[#allocation6 + $0x50] sm:$0xff]  ;;  %4625 = vst [vmem:[#allocation17_spill] sm:$0xff] %v3155_v46  ;;  %v135_v51 = vld [vmem:[#allocation4 + $0x58] sm:$0xff]  ;;  %v3161_v54 = vld [vmem:[#allocation6 + $0x20] sm:$0xff] }
  0x36   :  { %397 = vmatpush.msra.mxu3 %v3046_v40  ;;  %196 = vmatmul.f32.vlgmr.msra.gmra.mxu0 %v3052_v41  ;;  %4626 = vst [vmem:[#allocation18_spill] sm:$0xff] %v3161_v54  ;;  %v132_v59 = vld [vmem:[#allocation4 + $0x40] sm:$0xff]  ;;  %v3170_v63 = vld [vmem:[#allocation6 + $0x10] sm:$0xff]  ;;  %v129_v6 = vld [vmem:[#allocation4 + $0x28] sm:$0xff] }
  0x37   :  { %398 = vmatmul.f32.vlgmr.msra.gmra.mxu3 %v4574_v47  ;;  %422 = vmatpush.msrb.mxu0 %v3056_v44  ;;  %4627 = vst [vmem:[#allocation19_spill] sm:$0xff] %v3163_v55  ;;  %v3194_v14 = vld [vmem:[%s4562_s0 + $0x28] sm:$0xff]  ;;  %v172_v23 = vld [vmem:[%s4565_s3] sm:$0x7] }
  0x38   :  { %402 = vmatpush.msrb.mxu3 %v3054_v43  ;;  %234 = vmatpush.msra.mxu1 %v131_v62  ;;  %v3168_v62 = vld [vmem:[#allocation6 + $0x8] sm:$0xff]  ;;  %4629 = vst [vmem:[#allocation21_spill] sm:$0xff] %v3170_v63 }
  0x39   :  { %423 = vmatpush.msrb.mxu0 %v3063_v49  ;;  %271 = vmatpush.msra.mxu2 %v144_v32  ;;  %4628 = vst [vmem:[#allocation20_spill] sm:$0xff] %v3168_v62  ;;  %v3346_v32 = vperm.slane %v172_v23, 0 }
  0x3a   :  { %403 = vmatpush.msrb.mxu3 %v3061_v48  ;;  %235 = vmatpush.msra.mxu1 %v128_v4  ;;  %v3177_v4 = vld [vmem:[%s4562_s0 + $0x20] sm:$0xff] }
  0x3b   :  { %424 = vmatpush.msrb.mxu0 %v3069_v53  ;;  %272 = vmatpush.msra.mxu2 %v141_v38  ;;  %4631 = vst [vmem:[#allocation23_spill] sm:$0xff] %v3346_v32 }
  0x3c   :  { %404 = vmatpush.msrb.mxu3 %v3067_v52  ;;  %236 = vmatpush.msra.mxu1 %v125_v12  ;;  %v126_v12 = vld [vmem:[#allocation4 + $0x10] sm:$0xff] }
  0x3d   :  { %425 = vmatpush.msrb.mxu0 %v3075_v57  ;;  %237 = vmatmul.f32.vlgmr.msra.gmra.mxu1 %v3052_v41 }
  0x3e   :  { %405 = vmatpush.msrb.mxu3 %v3073_v56  ;;  %199 = vmatmul.f32.gmra.mxu0 %v3081_v58 }
  0x3f   :  { %426 = vmatpush.msrb.mxu0 %v3086_v61  ;;  %495 = vmatpush.msrb.mxu1 %v3002_v1 }
  0x40   :  { %406 = vmatpush.msrb.mxu3 %v3084_v60  ;;  %273 = vmatpush.msra.mxu2 %v138_v45 }
  0x41   :  { %427 = vmatpush.msrb.mxu0 %v3093_v2  ;;  %496 = vmatpush.msrb.mxu1 %v3005_v3 }
  0x42   :  { %407 = vmatpush.msrb.mxu3 %v3091_v0  ;;  %274 = vmatpush.msra.mxu2 %v135_v51 }
  0x43   :  { %428 = vmatpush.msrb.mxu0 %v3099_v10  ;;  %497 = vmatpush.msrb.mxu1 %v3007_v5 }
  0x44   :  { %408 = vmatpush.msrb.mxu3 %v3097_v8  ;;  %275 = vmatpush.msra.mxu2 %v132_v59 }
  0x45   :  { %429 = vmatpush.msrb.mxu0 %v3105_v17  ;;  %240 = vmatmul.f32.gmra.mxu1 %v3081_v58 }
  0x46   :  { %409 = vmatpush.msrb.mxu3 %v3103_v16  ;;  %202 = vmatmul.f32.gmra.mxu0 %v3111_v18 }
  0x47   :  { %430 = vmatpush.msrb.mxu0 %v3116_v21  ;;  %498 = vmatpush.msrb.mxu1 %v3010_v7 }
  0x48   :  { %410 = vmatpush.msrb.mxu3 %v3114_v20  ;;  %276 = vmatpush.msra.mxu2 %v129_v6 }
  0x49   :  { %431 = vmatpush.msrb.mxu0 %v3124_v26  ;;  %499 = vmatpush.msrb.mxu1 %v3013_v9 }
  0x4a   :  { %411 = vmatpush.msrb.mxu3 %v3121_v24  ;;  %277 = vmatpush.msra.mxu2 %v126_v12  ;;  %v3353_v12 = vperm.slane %v172_v23, 1 }
  0x4b   :  { %432 = vmatpush.msrb.mxu0 %v3130_v30  ;;  %500 = vmatpush.msrb.mxu1 %v3016_v11 }
  0x4c   :  { %412 = vmatpush.msrb.mxu3 %v3128_v29  ;;  %278 = vmatmul.f32.vlgmr.msra.gmra.mxu2 %v3052_v41  ;;  %v3215_v41 = vld [vmem:[%s4562_s0 + $0x30] sm:$0xff]  ;;  %4634 = vst [vmem:[#allocation26_spill] sm:$0xff] %v3353_v12 }
  0x4d   :  { %433 = vmatpush.msrb.mxu0 %v3137_v35  ;;  %243 = vmatmul.f32.gmra.mxu1 %v3111_v18 }
  0x4e   :  { %413 = vmatpush.msrb.mxu3 %v3135_v33  ;;  %205 = vmatmul.f32.gmra.mxu0 %v3144_v36 }
  0x4f   :  { %434 = vmatpush.msrb.mxu0 %v3149_v42  ;;  %501 = vmatpush.msrb.mxu1 %v3019_v13 }
  0x50   :  { %414 = vmatpush.msrb.mxu3 %v3147_v39  ;;  %515 = vmatpush.msrb.mxu2 %v3054_v43 }
  0x51   :  { %435 = vmatpush.msrb.mxu0 %v3157_v50  ;;  %502 = vmatpush.msrb.mxu1 %v3022_v15 }
  0x52   :  { %415 = vmatpush.msrb.mxu3 %v3155_v46  ;;  %516 = vmatpush.msrb.mxu2 %v3061_v48 }
  0x53   :  { %436 = vmatpush.msrb.mxu0 %v3163_v55  ;;  %503 = vmatpush.msrb.mxu1 %v3025_v19 }
  0x54   :  { %416 = vmatpush.msrb.mxu3 %v3161_v54  ;;  %517 = vmatpush.msrb.mxu2 %v3067_v52 }
  0x55   :  { %437 = vmatpush.msrb.mxu0 %v3170_v63  ;;  %504 = vmatpush.msrb.mxu1 %v3028_v22 }
  0x56   :  { %417 = vmatpush.msrb.mxu3 %v3168_v62  ;;  %208 = vmatmul.f32.gmra.mxu0 %v3177_v4 }
  0x57   :  { %418 = vmatmul.f32.vlgmr.msrb.gmra.mxu3 %v4574_v47  ;;  %609 = vmatpush.msra.mxu0 %v3002_v1 }
  0x58   :  { %535 = vmatpush.msra.mxu3 %v3056_v44  ;;  %246 = vmatmul.f32.gmra.mxu1 %v3144_v36 }
  0x59   :  { %518 = vmatpush.msrb.mxu2 %v3073_v56  ;;  %505 = vmatpush.msrb.mxu1 %v3031_v25 }
  0x5a   :  { %536 = vmatpush.msra.mxu3 %v3063_v49  ;;  %281 = vmatmul.f32.gmra.mxu2 %v3081_v58  ;;  %v3236_v58 = vld [vmem:[%s4562_s0 + $0x38] sm:$0xff] }
  0x5b   :  { %519 = vmatpush.msrb.mxu2 %v3084_v60  ;;  %506 = vmatpush.msrb.mxu1 %v3034_v27 }
  0x5c   :  { %537 = vmatpush.msra.mxu3 %v3069_v53  ;;  %610 = vmatpush.msra.mxu0 %v3005_v3 }
  0x5d   :  { %520 = vmatpush.msrb.mxu2 %v3091_v0  ;;  %507 = vmatpush.msrb.mxu1 %v3037_v31 }
  0x5e   :  { %211 = vmatmul.f32.gmra.mxu0 %v3194_v14  ;;  %538 = vmatpush.msra.mxu3 %v3075_v57 }
  0x5f   :  { %521 = vmatpush.msrb.mxu2 %v3097_v8  ;;  %508 = vmatpush.msrb.mxu1 %v3040_v34 }
  0x60   :  { %539 = vmatpush.msra.mxu3 %v3086_v61  ;;  %249 = vmatmul.f32.gmra.mxu1 %v3177_v4 }
  0x61   :  { %522 = vmatpush.msrb.mxu2 %v3103_v16  ;;  %509 = vmatpush.msrb.mxu1 %v3043_v37 }
  0x62   :  { %540 = vmatpush.msra.mxu3 %v3093_v2  ;;  %284 = vmatmul.f32.gmra.mxu2 %v3111_v18 }
  0x63   :  { %523 = vmatpush.msrb.mxu2 %v3114_v20  ;;  %510 = vmatpush.msrb.mxu1 %v3046_v40 }
  0x64   :  { %541 = vmatpush.msra.mxu3 %v3099_v10  ;;  %611 = vmatpush.msra.mxu0 %v3007_v5 }
  0x65   :  { %629 = vmatpush.msra.mxu1 %v3054_v43  ;;  %524 = vmatpush.msrb.mxu2 %v3121_v24 }
  0x66   :  { %214 = vmatmul.f32.gmra.mxu0 %v3215_v41  ;;  %542 = vmatpush.msra.mxu3 %v3105_v17 }
  0x67   :  { %525 = vmatpush.msrb.mxu2 %v3128_v29  ;;  %630 = vmatpush.msra.mxu1 %v3061_v48 }
  0x68   :  { %543 = vmatpush.msra.mxu3 %v3116_v21  ;;  %252 = vmatmul.f32.gmra.mxu1 %v3194_v14 }
  0x69   :  { %526 = vmatpush.msrb.mxu2 %v3135_v33  ;;  %631 = vmatpush.msra.mxu1 %v3067_v52 }
  0x6a   :  { %544 = vmatpush.msra.mxu3 %v3124_v26  ;;  %287 = vmatmul.f32.gmra.mxu2 %v3144_v36 }
  0x6b   :  { %527 = vmatpush.msrb.mxu2 %v3147_v39  ;;  %612 = vmatpush.msra.mxu0 %v3010_v7 }
  0x6c   :  { %545 = vmatpush.msra.mxu3 %v3130_v30  ;;  %632 = vmatpush.msra.mxu1 %v3073_v56 }
  0x6d   :  { %528 = vmatpush.msrb.mxu2 %v3155_v46  ;;  %613 = vmatpush.msra.mxu0 %v3013_v9 }
  0x6e   :  { %217 = vmatmul.f32.gmra.mxu0 %v3236_v58  ;;  %546 = vmatpush.msra.mxu3 %v3137_v35 }
  0x6f   :  { %529 = vmatpush.msrb.mxu2 %v3161_v54  ;;  %633 = vmatpush.msra.mxu1 %v3084_v60 }
  0x70   :  { %547 = vmatpush.msra.mxu3 %v3149_v42  ;;  %255 = vmatmul.f32.gmra.mxu1 %v3215_v41 }
  0x71   :  { %614 = vmatpush.msra.mxu0 %v3016_v11  ;;  %530 = vmatpush.msrb.mxu2 %v3168_v62 }
  0x72   :  { %548 = vmatpush.msra.mxu3 %v3157_v50  ;;  %634 = vmatpush.msra.mxu1 %v3091_v0 }
  0x73   :  { %290 = vmatmul.f32.gmra.mxu2 %v3177_v4  ;;  %615 = vmatpush.msra.mxu0 %v3019_v13 }
  0x74   :  { %549 = vmatpush.msra.mxu3 %v3163_v55  ;;  %649 = vmatpush.msra.mxu2 %v3056_v44 }
  0x75   :  { %635 = vmatpush.msra.mxu1 %v3097_v8  ;;  %616 = vmatpush.msra.mxu0 %v3022_v15 }
  0x76   :  { %438 = vmatmul.f32.vlgmr.msrb.gmra.mxu0 %v4574_v47  ;;  %550 = vmatpush.msra.mxu3 %v3170_v63 }
  0x77   :  { %650 = vmatpush.msra.mxu2 %v3063_v49  ;;  %636 = vmatpush.msra.mxu1 %v3103_v16 }
  0x78   :  { %723 = vmatpush.msrb.mxu3 %v3002_v1  ;;  %617 = vmatpush.msra.mxu0 %v3025_v19 }
  0x79   :  { %651 = vmatpush.msra.mxu2 %v3069_v53  ;;  %637 = vmatpush.msra.mxu1 %v3114_v20 }
  0x7a   :  { %724 = vmatpush.msrb.mxu3 %v3005_v3  ;;  %258 = vmatmul.f32.gmra.mxu1 %v3236_v58 }
  0x7b   :  { %618 = vmatpush.msra.mxu0 %v3028_v22  ;;  %652 = vmatpush.msra.mxu2 %v3075_v57 }
  0x7c   :  { %638 = vmatpush.msra.mxu1 %v3121_v24  ;;  %293 = vmatmul.f32.gmra.mxu2 %v3194_v14 }
  0x7d   :  { %619 = vmatpush.msra.mxu0 %v3031_v25  ;;  %653 = vmatpush.msra.mxu2 %v3086_v61 }
  0x7e   :  { %639 = vmatpush.msra.mxu1 %v3128_v29  ;;  %725 = vmatpush.msrb.mxu3 %v3007_v5 }
  0x7f   :  { %620 = vmatpush.msra.mxu0 %v3034_v27  ;;  %654 = vmatpush.msra.mxu2 %v3093_v2 }
  0x80   :  { %640 = vmatpush.msra.mxu1 %v3135_v33  ;;  %726 = vmatpush.msrb.mxu3 %v3010_v7 }
  0x81   :  { %621 = vmatpush.msra.mxu0 %v3037_v31  ;;  %655 = vmatpush.msra.mxu2 %v3099_v10 }
  0x82   :  { %641 = vmatpush.msra.mxu1 %v3147_v39  ;;  %727 = vmatpush.msrb.mxu3 %v3013_v9 }
  0x83   :  { %622 = vmatpush.msra.mxu0 %v3040_v34  ;;  %656 = vmatpush.msra.mxu2 %v3105_v17 }
  0x84   :  { %642 = vmatpush.msra.mxu1 %v3155_v46  ;;  %296 = vmatmul.f32.gmra.mxu2 %v3215_v41 }
  0x85   :  { %623 = vmatpush.msra.mxu0 %v3043_v37  ;;  %657 = vmatpush.msra.mxu2 %v3116_v21 }
  0x86   :  { %643 = vmatpush.msra.mxu1 %v3161_v54  ;;  %728 = vmatpush.msrb.mxu3 %v3016_v11 }
  0x87   :  { %624 = vmatpush.msra.mxu0 %v3046_v40  ;;  %658 = vmatpush.msra.mxu2 %v3124_v26 }
  0x88   :  { %644 = vmatpush.msra.mxu1 %v3168_v62  ;;  %729 = vmatpush.msrb.mxu3 %v3019_v13 }
  0x89   :  { %743 = vmatpush.msrb.mxu0 %v3054_v43  ;;  %659 = vmatpush.msra.mxu2 %v3130_v30 }
  0x8a   :  { %730 = vmatpush.msrb.mxu3 %v3022_v15 }
  0x8b   :  { %744 = vmatpush.msrb.mxu0 %v3061_v48  ;;  %660 = vmatpush.msra.mxu2 %v3137_v35 }
  0x8c   :  { %299 = vmatmul.f32.gmra.mxu2 %v3236_v58  ;;  %731 = vmatpush.msrb.mxu3 %v3025_v19 }
  0x8d   :  { %745 = vmatpush.msrb.mxu0 %v3067_v52  ;;  %661 = vmatpush.msra.mxu2 %v3149_v42 }
  0x8e   :  { %732 = vmatpush.msrb.mxu3 %v3028_v22 }
  0x8f   :  { %746 = vmatpush.msrb.mxu0 %v3073_v56  ;;  %662 = vmatpush.msra.mxu2 %v3157_v50 }
  0x90   :  { %733 = vmatpush.msrb.mxu3 %v3031_v25 }
  0x91   :  { %747 = vmatpush.msrb.mxu0 %v3084_v60  ;;  %663 = vmatpush.msra.mxu2 %v3163_v55 }
  0x92   :  { %734 = vmatpush.msrb.mxu3 %v3034_v27 }
  0x93   :  { %748 = vmatpush.msrb.mxu0 %v3091_v0  ;;  %664 = vmatpush.msra.mxu2 %v3170_v63 }
  0x94   :  { %735 = vmatpush.msrb.mxu3 %v3037_v31 }
  0x95   :  { %749 = vmatpush.msrb.mxu0 %v3097_v8 }
  0x96   :  { %736 = vmatpush.msrb.mxu3 %v3040_v34 }
  0x97   :  { %750 = vmatpush.msrb.mxu0 %v3103_v16 }
  0x98   :  { %737 = vmatpush.msrb.mxu3 %v3043_v37 }
  0x99   :  { %751 = vmatpush.msrb.mxu0 %v3114_v20 }
  0x9a   :  { %738 = vmatpush.msrb.mxu3 %v3046_v40 }
  0x9b   :  { %752 = vmatpush.msrb.mxu0 %v3121_v24 }
  0x9d   :  { %753 = vmatpush.msrb.mxu0 %v3128_v29 }
  0x9f   :  { %754 = vmatpush.msrb.mxu0 %v3135_v33 }
  0xa1   :  { %755 = vmatpush.msrb.mxu0 %v3147_v39 }
  0xa3   :  { %756 = vmatpush.msrb.mxu0 %v3155_v46 }
  0xa5   :  { %757 = vmatpush.msrb.mxu0 %v3161_v54 }
  0xa7   :  { %758 = vmatpush.msrb.mxu0 %v3168_v62 }
  0xb3   :  { %v197_v18 = vpop.f32.mrf.mxu0 }
  0xb4   :  { %v198_v38 = vadd.f32 %v197_v18, %v3346_v32 }
  0xba   :  { %v399_v36 = vpop.f32.mrf.mxu3  ;;  %v238_v41 = vpop.f32.mrf.mxu1 }
  0xbb   :  { %v3344_v28 = vpop.f32.mrf.mxu0  ;;  %v442_v51 = vadd.f32 %v399_v36, %v198_v38 }
  0xbc   :  { %4630 = vst [vmem:[#allocation22_spill] sm:$0xff] %v3344_v28  ;;  %v239_v28 = vadd.f32 %v238_v41, %v3353_v12 }
  0xbd   :  { %v2488_v59 = vmul.f32 -1.442695, %v442_v51 }
  0xbf   :  { %2533 = vpow2.f32 %v2488_v59 }
  0xc3   :  { %v3349_v45 = vpop.f32.mrf.mxu0 }
  0xc4   :  { %4632 = vst [vmem:[#allocation24_spill] sm:$0xff] %v3349_v45 }
  0xc5   :  { %v2534_v6 = vpop.eup %2533 }
  0xc6   :  { %v450_v47 = vadd.f32 1.0, %v2534_v6 }
  0xc8   :  { %2535 = vrcp.f32 %v450_v47  ;;  %v463_v54 = vand.u32 2147483648, %v450_v47  ;;  %vm457_vm1 = vweird.f32 %v450_v47 }
  0xcb   :  { %v3351_v4 = vpop.f32.mrf.mxu0 }
  0xcc   :  { %4633 = vst [vmem:[#allocation25_spill] sm:$0xff] %v3351_v4 }
  0xce   :  { %v2536_v59 = vpop.eup %2535 }
  0xcf   :  { %v279_v51 = vpop.f32.mrf.mxu2  ;;  %v453_v4 = vmul.f32 %v2536_v59, %v450_v47  ;;  %vm458_vm0 = vweird.f32 %v2536_v59 }
  0xd0   :  { %vm459_vm2 = vmor %vm457_vm1, %vm458_vm0 }
  0xd3   :  { %v209_v14 = vpop.f32.mrf.mxu0 }
  0xd4   :  { %v3356_v58 = vadd.f32 %v209_v14, %v3346_v32 }
  0xd6   :  { %4635 = vst [vmem:[#allocation27_spill] sm:$0xff] %v3356_v58  ;;  %v454_v58 = vsub.f32 1.0, %v453_v4  ;;  %v3377_v4 = vperm.slane %v172_v23, 2 }
  0xd8   :  { %4641 = vst [vmem:[#allocation33_spill] sm:$0xff] %v3377_v4 }
  0xda   :  { %v419_v18 = vpop.f32.mrf.mxu3 }
  0xdb   :  { %v443_v62 = vadd.f32 %v419_v18, %v239_v28  ;;  %v212_v45 = vpop.f32.mrf.mxu0  ;;  %v455_v28 = vmul.f32 %v2536_v59, %v454_v58 }
  0xdc   :  { %v3360_v38 = vadd.f32 %v212_v45, %v3346_v32 }
  0xdd   :  { %v2489_v36 = vmul.f32 -1.442695, %v443_v62  ;;  %v3365_v41 = vpop.f32.mrf.mxu2 }
  0xde   :  { %4636 = vst [vmem:[#allocation28_spill] sm:$0xff] %v3360_v38  ;;  %v456_v38 = vadd.f32 %v2536_v59, %v455_v28 }
  0xdf   :  { %2537 = vpow2.f32 %v2489_v36  ;;  %4638 = vst [vmem:[#allocation30_spill] sm:$0xff] %v3365_v41 }
  0xe3   :  { %v215_v40 = vpop.f32.mrf.mxu0 }
  0xe4   :  { %v3363_v14 = vadd.f32 %v215_v40, %v3346_v32  ;;  %v3375_v40 = vld [vmem:[%s4566_s4] ss:$0 sm:$0xff] }
  0xe5   :  { %v2538_v63 = vpop.eup %2537  ;;  %v3370_v12 = vpop.f32.mrf.mxu2 }
  0xe6   :  { %4637 = vst [vmem:[#allocation29_spill] sm:$0xff] %v3363_v14  ;;  %v451_v6 = vadd.f32 1.0, %v2538_v63  ;;  %v461_v63 = vand.u32 2147483647, %v450_v47  ;;  %v464_v14 = vor.u32 1.1754944e-38, %v463_v54 }
  0xe7   :  { %4640 = vst [vmem:[#allocation32_spill] sm:$0xff] %v3370_v12  ;;  %v280_v12 = vadd.f32 %v279_v51, %v3377_v4 }
  0xe8   :  { %2539 = vrcp.f32 %v451_v6  ;;  %vm462_vm3 = vcmp.eq.f32.partialorder %v461_v63, 8.507059e+37  ;;  %vm472_vm4 = vweird.f32 %v451_v6  ;;  %v476_v47 = vand.u32 2147483647, %v451_v6 }
  0xea   :  { %vm477_vm7 = vcmp.eq.f32.partialorder %v476_v47, 8.507059e+37 }
  0xeb   :  { %v218_v18 = vpop.f32.mrf.mxu0 }
  0xec   :  { %v3368_v62 = vadd.f32 %v218_v18, %v3346_v32  ;;  %v460_v18 = vsel %vm459_vm2, %v2536_v59, %v456_v38  ;;  %v478_v32 = vand.u32 2147483648, %v451_v6 }
  0xed   :  { %v465_v41 = vsel %vm462_vm3, %v464_v14, %v460_v18  ;;  %v288_v46 = vpop.f32.mrf.mxu2 }
  0xee   :  { %4639 = vst [vmem:[#allocation31_spill] sm:$0xff] %v3368_v62  ;;  %v2540_v45 = vpop.eup %2539  ;;  %v3382_v23 = vadd.f32 %v288_v46, %v3377_v4  ;;  %v479_v54 = vor.u32 1.1754944e-38, %v478_v32 }
  0xef   :  { %v468_v36 = vmul.f32 %v2540_v45, %v451_v6  ;;  %vm473_vm5 = vweird.f32 %v2540_v45 }
  0xf0   :  { %vm474_vm6 = vmor %vm472_vm4, %vm473_vm5 }
  0xf1   :  { %v469_v37 = vsub.f32 1.0, %v468_v36 }
  0xf3   :  { %v470_v58 = vmul.f32 %v2540_v45, %v469_v37  ;;  %v439_v62 = vpop.f32.mrf.mxu0 }
  0xf4   :  { %v482_v28 = vadd.f32 %v3375_v40, %v439_v62 }
  0xf5   :  { %v471_v36 = vadd.f32 %v2540_v45, %v470_v58 }
  0xf6   :  { %v483_v55 = vmul.f32 %v482_v28, %v465_v41  ;;  %v291_v62 = vpop.f32.mrf.mxu2  ;;  %v4659_v28 = vld [vmem:[#allocation22_spill] sm:$0xff] }
  0xf7   :  { %v475_v38 = vsel %vm474_vm6, %v2540_v45, %v471_v36  ;;  %v3385_v63 = vadd.f32 %v291_v62, %v3377_v4  ;;  %v4658_v45 = vld [vmem:[#allocation23_spill] sm:$0xff] }
  0xf8   :  { %v484_v37 = vadd.f32 %v483_v55, %v280_v12  ;;  %v480_v59 = vsel %vm477_vm7, %v479_v54, %v475_v38  ;;  %v201_v36 = vadd.f32 %v4659_v28, %v4658_v45  ;;  %v4660_v54 = vld [vmem:[#allocation26_spill] sm:$0xff] }
  0xf9   :  { %v486_v51 = vsub.f32 1.0, %v480_v59  ;;  %4642 = vst [vmem:[#allocation34_spill] sm:$0xff] %v3385_v63  ;;  %v488_v41 = vmul.f32 0.0, %v480_v59 }
  0xfa   :  { %2541 = vtanh.f32 %v484_v37 }
  0xff   :  { %v294_v46 = vpop.f32.mrf.mxu2 }
 0x100   :  { %v2542_v14 = vpop.eup %2541  ;;  %v3394_v55 = vadd.f32 %v294_v46, %v3377_v4 }
 0x101   :  { %v487_v58 = vmul.f32 %v2542_v14, %v486_v51 }
 0x102   :  { %4644 = vst [vmem:[#allocation36_spill] sm:$0xff] %v3394_v55 }
 0x103   :  { %v3387_v18 = vadd.f32 %v488_v41, %v487_v58 }
 0x105   :  { %4643 = vst [vmem:[#allocation35_spill] sm:$0xff] %v3387_v18  ;;  %511 = vmatmul.f32.vlgmr.msrb.gmra.mxu1 %v3387_v18  ;;  %531 = vmatmul.f32.vlgmr.msrb.gmra.mxu2 %v3387_v18 }
 0x106   :  { %551 = vmatmul.f32.vlgmr.msra.gmra.mxu3 %v3387_v18  ;;  %763 = vmatpush.msrb.mxu1 %v3056_v44 }
 0x107   :  { %837 = vmatpush.msrb.mxu2 %v3002_v1  ;;  %857 = vmatpush.msra.mxu3 %v3054_v43  ;;  %v297_v1 = vpop.f32.mrf.mxu2 }
 0x108   :  { %764 = vmatpush.msrb.mxu1 %v3063_v49  ;;  %v3409_v32 = vadd.f32 %v297_v1, %v3377_v4 }
 0x109   :  { %838 = vmatpush.msrb.mxu2 %v3005_v3  ;;  %858 = vmatpush.msra.mxu3 %v3061_v48  ;;  %v4646_v3 = vld [vmem:[#allocation17_spill] sm:$0xff] }
 0x10a   :  { %765 = vmatpush.msrb.mxu1 %v3069_v53  ;;  %4645 = vst [vmem:[#allocation37_spill] sm:$0xff] %v3409_v32 }
 0x10b   :  { %839 = vmatpush.msrb.mxu2 %v3007_v5  ;;  %859 = vmatpush.msra.mxu3 %v3067_v52  ;;  %v4647_v5 = vld [vmem:[#allocation19_spill] sm:$0xff] }
 0x10c   :  { %766 = vmatpush.msrb.mxu1 %v3075_v57 }
 0x10d   :  { %840 = vmatpush.msrb.mxu2 %v3010_v7  ;;  %860 = vmatpush.msra.mxu3 %v3073_v56  ;;  %v4648_v7 = vld [vmem:[#allocation15_spill] sm:$0xff] }
 0x10e   :  { %767 = vmatpush.msrb.mxu1 %v3086_v61 }
 0x10f   :  { %841 = vmatpush.msrb.mxu2 %v3013_v9  ;;  %861 = vmatpush.msra.mxu3 %v3084_v60  ;;  %v4649_v9 = vld [vmem:[#allocation18_spill] sm:$0xff]  ;;  %v3458_v6 = vpop.f32.mrf.mxu2 }
 0x110   :  { %768 = vmatpush.msrb.mxu1 %v3093_v2 }
 0x111   :  { %842 = vmatpush.msrb.mxu2 %v3016_v11  ;;  %862 = vmatpush.msra.mxu3 %v3091_v0  ;;  %v4650_v11 = vld [vmem:[#allocation21_spill] sm:$0xff] }
 0x112   :  { %769 = vmatpush.msrb.mxu1 %v3099_v10  ;;  %4657 = vst [vmem:[#allocation21_spill] sm:$0xff] %v3458_v6 }
 0x113   :  { %843 = vmatpush.msrb.mxu2 %v3019_v13  ;;  %863 = vmatpush.msra.mxu3 %v3097_v8  ;;  %v4651_v13 = vld [vmem:[#allocation16_spill] sm:$0xff] }
 0x114   :  { %770 = vmatpush.msrb.mxu1 %v3105_v17 }
 0x115   :  { %844 = vmatpush.msrb.mxu2 %v3022_v15  ;;  %864 = vmatpush.msra.mxu3 %v3103_v16  ;;  %v4652_v15 = vld [vmem:[#allocation20_spill] sm:$0xff] }
 0x116   :  { %771 = vmatpush.msrb.mxu1 %v3116_v21 }
 0x117   :  { %845 = vmatpush.msrb.mxu2 %v3025_v19  ;;  %865 = vmatpush.msra.mxu3 %v3114_v20  ;;  %v241_v19 = vpop.f32.mrf.mxu1 }
 0x118   :  { %772 = vmatpush.msrb.mxu1 %v3124_v26  ;;  %v242_v59 = vadd.f32 %v241_v19, %v4660_v54 }
 0x119   :  { %846 = vmatpush.msrb.mxu2 %v3028_v22  ;;  %866 = vmatpush.msra.mxu3 %v3121_v24 }
 0x11a   :  { %773 = vmatpush.msrb.mxu1 %v3130_v30 }
 0x11b   :  { %847 = vmatpush.msrb.mxu2 %v3031_v25  ;;  %867 = vmatpush.msra.mxu3 %v3128_v29 }
 0x11c   :  { %774 = vmatpush.msrb.mxu1 %v3137_v35 }
 0x11d   :  { %848 = vmatpush.msrb.mxu2 %v3034_v27  ;;  %868 = vmatpush.msra.mxu3 %v3135_v33 }
 0x11e   :  { %775 = vmatpush.msrb.mxu1 %v3149_v42 }
 0x11f   :  { %849 = vmatpush.msrb.mxu2 %v3037_v31  ;;  %869 = vmatpush.msra.mxu3 %v3147_v39  ;;  %v3446_v22 = vpop.f32.mrf.mxu1 }
 0x120   :  { %776 = vmatpush.msrb.mxu1 %v3157_v50 }
 0x121   :  { %850 = vmatpush.msrb.mxu2 %v3040_v34  ;;  %870 = vmatpush.msra.mxu3 %v4646_v3 }
 0x122   :  { %777 = vmatpush.msrb.mxu1 %v4647_v5 }
 0x123   :  { %851 = vmatpush.msrb.mxu2 %v4648_v7  ;;  %871 = vmatpush.msra.mxu3 %v4649_v9 }
 0x124   :  { %778 = vmatpush.msrb.mxu1 %v4650_v11 }
 0x125   :  { %852 = vmatpush.msrb.mxu2 %v4651_v13  ;;  %872 = vmatpush.msra.mxu3 %v4652_v15 }
 0x127   :  { %v3448_v25 = vpop.f32.mrf.mxu1 }
 0x12f   :  { %v3450_v27 = vpop.f32.mrf.mxu1 }
 0x130   :  { %4653 = vst [vmem:[#allocation17_spill] sm:$0xff] %v3450_v27 }
 0x137   :  { %v3452_v31 = vpop.f32.mrf.mxu1 }
 0x138   :  { %4654 = vst [vmem:[#allocation19_spill] sm:$0xff] %v3452_v31 }
 0x13f   :  { %v3454_v34 = vpop.f32.mrf.mxu1 }
 0x140   :  { %4655 = vst [vmem:[#allocation15_spill] sm:$0xff] %v3454_v34 }
 0x147   :  { %v3456_v12 = vpop.f32.mrf.mxu1 }
 0x148   :  { %4656 = vst [vmem:[#allocation18_spill] sm:$0xff] %v3456_v12 }
 0x182   :  { %v512_v47 = vpop.f32.mrf.mxu1 }
 0x183   :  { %v555_v37 = vadd.f32 %v512_v47, %v201_v36 }
 0x185   :  { %v2490_v38 = vmul.f32 -1.442695, %v555_v37 }
 0x187   :  { %2543 = vpow2.f32 %v2490_v38 }
 0x188   :  { %v532_v62 = vpop.f32.mrf.mxu2 }
 0x189   :  { %v556_v51 = vadd.f32 %v532_v62, %v242_v59  ;;  %v552_v19 = vpop.f32.mrf.mxu3 }
 0x18b   :  { %v2491_v14 = vmul.f32 -1.442695, %v556_v51 }
 0x18d   :  { %v2544_v58 = vpop.eup %2543  ;;  %2545 = vpow2.f32 %v2491_v14  ;;  %v595_v14 = vadd.f32 %v3375_v40, %v552_v19 }
 0x18e   :  { %v563_v41 = vadd.f32 1.0, %v2544_v58  ;;  %v4661_v58 = vld [vmem:[#allocation30_spill] sm:$0xff] }
 0x190   :  { %2547 = vrcp.f32 %v563_v41  ;;  %v576_v28 = vand.u32 2147483648, %v563_v41  ;;  %v574_v36 = vand.u32 2147483647, %v563_v41  ;;  %vm570_vm9 = vweird.f32 %v563_v41 }
 0x192   :  { %v577_v59 = vor.u32 1.1754944e-38, %v576_v28  ;;  %vm575_vm11 = vcmp.eq.f32.partialorder %v574_v36, 8.507059e+37 }
 0x193   :  { %v2546_v46 = vpop.eup %2545 }
 0x194   :  { %v564_v1 = vadd.f32 1.0, %v2546_v46  ;;  %v283_v46 = vadd.f32 %v4661_v58, %v3377_v4 }
 0x196   :  { %v2548_v7 = vpop.eup %2547  ;;  %2549 = vrcp.f32 %v564_v1  ;;  %v589_v55 = vand.u32 2147483647, %v564_v1  ;;  %vm585_vm13 = vweird.f32 %v564_v1 }
 0x197   :  { %v566_v13 = vmul.f32 %v2548_v7, %v563_v41  ;;  %vm571_vm8 = vweird.f32 %v2548_v7 }
 0x198   :  { %vm572_vm10 = vmor %vm570_vm9, %vm571_vm8  ;;  %vm590_vm15 = vcmp.eq.f32.partialorder %v589_v55, 8.507059e+37  ;;  %v3478_v55 = vld [vmem:[#allocation6 + $0x150] sm:$0xff] }
 0x199   :  { %v567_v6 = vsub.f32 1.0, %v566_v13 }
 0x19b   :  { %v568_v12 = vmul.f32 %v2548_v7, %v567_v6  ;;  %v591_v6 = vand.u32 2147483648, %v564_v1 }
 0x19c   :  { %v2550_v47 = vpop.eup %2549 }
 0x19d   :  { %v581_v37 = vmul.f32 %v2550_v47, %v564_v1  ;;  %v569_v38 = vadd.f32 %v2548_v7, %v568_v12  ;;  %vm586_vm12 = vweird.f32 %v2550_v47  ;;  %v592_v41 = vor.u32 1.1754944e-38, %v591_v6 }
 0x19e   :  { %vm587_vm14 = vmor %vm585_vm13, %vm586_vm12 }
 0x19f   :  { %v582_v62 = vsub.f32 1.0, %v581_v37  ;;  %v573_v51 = vsel %vm572_vm10, %v2548_v7, %v569_v38 }
 0x1a0   :  { %v578_v13 = vsel %vm575_vm11, %v577_v59, %v573_v51 }
 0x1a1   :  { %v583_v32 = vmul.f32 %v2550_v47, %v582_v62  ;;  %v596_v34 = vmul.f32 %v595_v14, %v578_v13 }
 0x1a3   :  { %v584_v31 = vadd.f32 %v2550_v47, %v583_v32  ;;  %v597_v12 = vadd.f32 %v596_v34, %v283_v46  ;;  %v3473_v32 = vld [vmem:[#allocation6 + $0x168] sm:$0xff] }
 0x1a5   :  { %v588_v28 = vsel %vm587_vm14, %v2550_v47, %v584_v31  ;;  %2551 = vtanh.f32 %v597_v12  ;;  %v3483_v31 = vld [vmem:[#allocation6 + $0x138] sm:$0xff] }
 0x1a6   :  { %v593_v7 = vsel %vm590_vm15, %v592_v41, %v588_v28  ;;  %v4667_v41 = vld [vmem:[#allocation32_spill] sm:$0xff] }
 0x1a7   :  { %v599_v36 = vsub.f32 1.0, %v593_v7  ;;  %v601_v38 = vmul.f32 %v593_v7, %v3387_v18  ;;  %v286_v28 = vadd.f32 %v4667_v41, %v3377_v4  ;;  %v3646_v41 = vld [vmem:[#allocation6 + $0x68] sm:$0xff] }
 0x1ab   :  { %v2552_v19 = vpop.eup %2551 }
 0x1ac   :  { %v600_v37 = vmul.f32 %v2552_v19, %v599_v36 }
 0x1ae   :  { %v3467_v59 = vadd.f32 %v601_v38, %v600_v37 }
 0x1b0   :  { %4662 = vst [vmem:[#allocation16_spill] sm:$0xff] %v3467_v59  ;;  %625 = vmatmul.f32.vlgmr.msra.gmra.mxu0 %v3467_v59  ;;  %645 = vmatmul.f32.vlgmr.msra.gmra.mxu1 %v3467_v59 }
 0x1b1   :  { %665 = vmatmul.f32.vlgmr.msra.gmra.mxu2 %v3467_v59  ;;  %877 = vmatpush.msra.mxu0 %v3056_v44  ;;  %v3488_v44 = vld [vmem:[#allocation6 + $0x120] sm:$0xff] }
 0x1b2   :  { %951 = vmatpush.msra.mxu1 %v3473_v32  ;;  %971 = vmatpush.msra.mxu2 %v3054_v43  ;;  %v3493_v43 = vld [vmem:[#allocation6 + $0x108] sm:$0xff] }
 0x1b3   :  { %878 = vmatpush.msra.mxu0 %v3063_v49  ;;  %v3503_v49 = vld [vmem:[#allocation6 + $0xd8] sm:$0xff] }
 0x1b4   :  { %952 = vmatpush.msra.mxu1 %v3478_v55  ;;  %972 = vmatpush.msra.mxu2 %v3061_v48  ;;  %v3498_v48 = vld [vmem:[#allocation6 + $0xf0] sm:$0xff] }
 0x1b5   :  { %879 = vmatpush.msra.mxu0 %v3069_v53  ;;  %v3513_v53 = vld [vmem:[#allocation6 + $0xa8] sm:$0xff] }
 0x1b6   :  { %953 = vmatpush.msra.mxu1 %v3483_v31  ;;  %973 = vmatpush.msra.mxu2 %v3067_v52  ;;  %v3508_v52 = vld [vmem:[#allocation6 + $0xc0] sm:$0xff] }
 0x1b7   :  { %880 = vmatpush.msra.mxu0 %v3075_v57  ;;  %v3523_v57 = vld [vmem:[#allocation6 + $0x78] sm:$0xff] }
 0x1b8   :  { %954 = vmatpush.msra.mxu1 %v3488_v44  ;;  %974 = vmatpush.msra.mxu2 %v3073_v56  ;;  %v3518_v56 = vld [vmem:[#allocation6 + $0x90] sm:$0xff] }
 0x1b9   :  { %881 = vmatpush.msra.mxu0 %v3086_v61  ;;  %v3533_v61 = vld [vmem:[#allocation6 + $0x48] sm:$0xff] }
 0x1ba   :  { %955 = vmatpush.msra.mxu1 %v3493_v43  ;;  %975 = vmatpush.msra.mxu2 %v3084_v60  ;;  %v3528_v60 = vld [vmem:[#allocation6 + $0x60] sm:$0xff] }
 0x1bb   :  { %882 = vmatpush.msra.mxu0 %v3093_v2  ;;  %v3543_v2 = vld [vmem:[#allocation6 + $0x18] sm:$0xff] }
 0x1bc   :  { %956 = vmatpush.msra.mxu1 %v3498_v48  ;;  %976 = vmatpush.msra.mxu2 %v3091_v0  ;;  %v3538_v0 = vld [vmem:[#allocation6 + $0x30] sm:$0xff]  ;;  %4664 = vst [vmem:[#allocation23_spill] sm:$0xff] %v3543_v2 }
 0x1bd   :  { %883 = vmatpush.msra.mxu0 %v3099_v10  ;;  %4663 = vst [vmem:[#allocation20_spill] sm:$0xff] %v3538_v0  ;;  %v4666_v10 = vld [vmem:[#allocation24_spill] sm:$0xff] }
 0x1be   :  { %957 = vmatpush.msra.mxu1 %v3503_v49  ;;  %977 = vmatpush.msra.mxu2 %v3097_v8  ;;  %v3548_v8 = vld [vmem:[#allocation6] sm:$0xff] }
 0x1bf   :  { %884 = vmatpush.msra.mxu0 %v3105_v17  ;;  %4665 = vst [vmem:[#allocation22_spill] sm:$0xff] %v3548_v8  ;;  %v245_v17 = vadd.f32 %v3446_v22, %v4660_v54 }
 0x1c0   :  { %958 = vmatpush.msra.mxu1 %v3508_v52  ;;  %978 = vmatpush.msra.mxu2 %v3103_v16  ;;  %v204_v16 = vadd.f32 %v4666_v10, %v4658_v45 }
 0x1c1   :  { %885 = vmatpush.msra.mxu0 %v3116_v21 }
 0x1c2   :  { %959 = vmatpush.msra.mxu1 %v3513_v53  ;;  %979 = vmatpush.msra.mxu2 %v3114_v20 }
 0x1c3   :  { %886 = vmatpush.msra.mxu0 %v3124_v26 }
 0x1c4   :  { %960 = vmatpush.msra.mxu1 %v3518_v56  ;;  %980 = vmatpush.msra.mxu2 %v3121_v24 }
 0x1c5   :  { %887 = vmatpush.msra.mxu0 %v3130_v30 }
 0x1c6   :  { %961 = vmatpush.msra.mxu1 %v3523_v57  ;;  %981 = vmatpush.msra.mxu2 %v3128_v29 }
 0x1c7   :  { %888 = vmatpush.msra.mxu0 %v3137_v35 }
 0x1c8   :  { %962 = vmatpush.msra.mxu1 %v3528_v60  ;;  %982 = vmatpush.msra.mxu2 %v3135_v33 }
 0x1c9   :  { %889 = vmatpush.msra.mxu0 %v3149_v42 }
 0x1ca   :  { %963 = vmatpush.msra.mxu1 %v3533_v61  ;;  %983 = vmatpush.msra.mxu2 %v3147_v39 }
 0x1cb   :  { %890 = vmatpush.msra.mxu0 %v3157_v50 }
 0x1cc   :  { %964 = vmatpush.msra.mxu1 %v3538_v0  ;;  %984 = vmatpush.msra.mxu2 %v4646_v3 }
 0x1cd   :  { %891 = vmatpush.msra.mxu0 %v4647_v5 }
 0x1ce   :  { %965 = vmatpush.msra.mxu1 %v3543_v2  ;;  %985 = vmatpush.msra.mxu2 %v4649_v9 }
 0x1cf   :  { %892 = vmatpush.msra.mxu0 %v4650_v11 }
 0x1d0   :  { %966 = vmatpush.msra.mxu1 %v3548_v8  ;;  %986 = vmatpush.msra.mxu2 %v4652_v15 }
 0x22d   :  { %v626_v20 = vpop.f32.mrf.mxu0  ;;  %v646_v21 = vpop.f32.mrf.mxu1 }
 0x22e   :  { %v669_v24 = vadd.f32 %v626_v20, %v204_v16  ;;  %v670_v26 = vadd.f32 %v646_v21, %v245_v17 }
 0x230   :  { %v2492_v29 = vmul.f32 -1.442695, %v669_v24  ;;  %v2493_v30 = vmul.f32 -1.442695, %v670_v26 }
 0x232   :  { %2553 = vpow2.f32 %v2492_v29  ;;  %v3565_v29 = vld [vmem:[#allocation6 + $0x178] sm:$0xff] }
 0x233   :  { %2555 = vpow2.f32 %v2493_v30  ;;  %v3569_v30 = vld [vmem:[#allocation6 + $0x170] sm:$0xff] }
 0x234   :  { %v666_v51 = vpop.f32.mrf.mxu2 }
 0x235   :  { %v709_v13 = vadd.f32 %v3375_v40, %v666_v51  ;;  %v3621_v51 = vld [vmem:[#allocation6 + $0xb8] sm:$0xff] }
 0x238   :  { %v2554_v33 = vpop.eup %2553 }
 0x239   :  { %v2556_v35 = vpop.eup %2555  ;;  %v677_v39 = vadd.f32 1.0, %v2554_v33  ;;  %v3572_v33 = vld [vmem:[#allocation6 + $0x160] sm:$0xff] }
 0x23a   :  { %v678_v42 = vadd.f32 1.0, %v2556_v35  ;;  %v3576_v35 = vld [vmem:[#allocation6 + $0x158] sm:$0xff] }
 0x23b   :  { %2557 = vrcp.f32 %v677_v39  ;;  %v690_v34 = vand.u32 2147483648, %v677_v39  ;;  %v688_v47 = vand.u32 2147483647, %v677_v39  ;;  %vm684_vm1 = vweird.f32 %v677_v39 }
 0x23c   :  { %2559 = vrcp.f32 %v678_v42  ;;  %v705_v7 = vand.u32 2147483648, %v678_v42  ;;  %vm699_vm5 = vweird.f32 %v678_v42  ;;  %v703_v19 = vand.u32 2147483647, %v678_v42 }
 0x23d   :  { %v691_v58 = vor.u32 1.1754944e-38, %v690_v34  ;;  %vm689_vm3 = vcmp.eq.f32.partialorder %v688_v47, 8.507059e+37  ;;  %v3607_v34 = vld [vmem:[#allocation6 + $0xe8] sm:$0xff]  ;;  %v3614_v47 = vld [vmem:[#allocation6 + $0xd0] sm:$0xff] }
 0x23e   :  { %v706_v10 = vor.u32 1.1754944e-38, %v705_v7  ;;  %vm704_vm7 = vcmp.eq.f32.partialorder %v703_v19, 8.507059e+37  ;;  %v3653_v7 = vld [vmem:[#allocation6 + $0x50] sm:$0xff]  ;;  %v3660_v19 = vld [vmem:[#allocation6 + $0x38] sm:$0xff] }
 0x23f   :  { %4668 = vst [vmem:[#allocation30_spill] sm:$0xff] %v3660_v19 }
 0x241   :  { %v2558_v50 = vpop.eup %2557 }
 0x242   :  { %v2560_v3 = vpop.eup %2559  ;;  %v680_v5 = vmul.f32 %v2558_v50, %v677_v39  ;;  %vm685_vm0 = vweird.f32 %v2558_v50  ;;  %v3579_v39 = vld [vmem:[#allocation6 + $0x148] sm:$0xff] }
 0x243   :  { %v695_v9 = vmul.f32 %v2560_v3, %v678_v42  ;;  %vm686_vm2 = vmor %vm684_vm1, %vm685_vm0  ;;  %vm700_vm4 = vweird.f32 %v2560_v3  ;;  %v3583_v42 = vld [vmem:[#allocation6 + $0x140] sm:$0xff] }
 0x244   :  { %v681_v15 = vsub.f32 1.0, %v680_v5  ;;  %vm701_vm6 = vmor %vm699_vm5, %vm700_vm4  ;;  %v3593_v5 = vld [vmem:[#allocation6 + $0x118] sm:$0xff] }
 0x245   :  { %v696_v22 = vsub.f32 1.0, %v695_v9  ;;  %v3597_v9 = vld [vmem:[#allocation6 + $0x110] sm:$0xff] }
 0x246   :  { %v682_v1 = vmul.f32 %v2558_v50, %v681_v15  ;;  %v3600_v15 = vld [vmem:[#allocation6 + $0x100] sm:$0xff] }
 0x247   :  { %v697_v62 = vmul.f32 %v2560_v3, %v696_v22  ;;  %v3604_v22 = vld [vmem:[#allocation6 + $0xf8] sm:$0xff] }
 0x248   :  { %v683_v14 = vadd.f32 %v2558_v50, %v682_v1  ;;  %v3611_v1 = vld [vmem:[#allocation6 + $0xe0] sm:$0xff] }
 0x249   :  { %v698_v6 = vadd.f32 %v2560_v3, %v697_v62  ;;  %v3618_v62 = vld [vmem:[#allocation6 + $0xc8] sm:$0xff] }
 0x24a   :  { %v687_v46 = vsel %vm686_vm2, %v2558_v50, %v683_v14  ;;  %v3586_v50 = vld [vmem:[#allocation6 + $0x130] sm:$0xff] }
 0x24b   :  { %v692_v12 = vsel %vm689_vm3, %v691_v58, %v687_v46  ;;  %v702_v38 = vsel %vm701_vm6, %v2560_v3, %v698_v6  ;;  %v3590_v3 = vld [vmem:[#allocation6 + $0x128] sm:$0xff]  ;;  %v3625_v14 = vld [vmem:[#allocation6 + $0xb0] sm:$0xff]  ;;  %v3628_v58 = vld [vmem:[#allocation6 + $0xa0] sm:$0xff] }
 0x24c   :  { %v710_v36 = vmul.f32 %v709_v13, %v692_v12  ;;  %v707_v16 = vsel %vm704_vm7, %v706_v10, %v702_v38  ;;  %v3632_v46 = vld [vmem:[#allocation6 + $0x98] sm:$0xff]  ;;  %v3635_v13 = vld [vmem:[#allocation6 + $0x88] sm:$0xff]  ;;  %v3639_v6 = vld [vmem:[#allocation6 + $0x80] sm:$0xff] }
 0x24d   :  { %v713_v17 = vsub.f32 1.0, %v707_v16  ;;  %v715_v24 = vmul.f32 %v707_v16, %v3467_v59  ;;  %v3642_v12 = vld [vmem:[#allocation6 + $0x70] sm:$0xff]  ;;  %v3667_v38 = vld [vmem:[#allocation6 + $0x20] sm:$0xff]  ;;  %v3672_v10 = vld [vmem:[#allocation6 + $0x8] sm:$0xff]  ;;  %v248_v16 = vadd.f32 %v3448_v25, %v4660_v54 }
 0x24e   :  { %v711_v37 = vadd.f32 %v710_v36, %v286_v28  ;;  %v3649_v28 = vld [vmem:[#allocation6 + $0x58] sm:$0xff]  ;;  %v3656_v36 = vld [vmem:[#allocation6 + $0x40] sm:$0xff]  ;;  %4670 = vst [vmem:[#allocation32_spill] sm:$0xff] %v3667_v38 }
 0x24f   :  { %4671 = vst [vmem:[#allocation38_spill] sm:$0xff] %v3672_v10 }
 0x250   :  { %2561 = vtanh.f32 %v711_v37  ;;  %v3663_v37 = vld [vmem:[#allocation6 + $0x28] sm:$0xff] }
 0x251   :  { %4669 = vst [vmem:[#allocation24_spill] sm:$0xff] %v3663_v37 }
 0x256   :  { %v2562_v20 = vpop.eup %2561 }
 0x257   :  { %v714_v21 = vmul.f32 %v2562_v20, %v713_v17 }
 0x259   :  { %v3560_v26 = vadd.f32 %v715_v24, %v714_v21  ;;  %v4672_v24 = vld [vmem:[#allocation25_spill] sm:$0xff] }
 0x25a   :  { %v207_v4 = vadd.f32 %v4672_v24, %v4658_v45 }
 0x25b   :  { %739 = vmatmul.f32.vlgmr.msrb.gmra.mxu3 %v3560_v26  ;;  %759 = vmatmul.f32.vlgmr.msrb.gmra.mxu0 %v3560_v26 }
 0x25c   :  { %779 = vmatmul.f32.vlgmr.msrb.gmra.mxu1 %v3560_v26  ;;  %991 = vmatpush.msrb.mxu3 %v3565_v29 }
 0x25d   :  { %1065 = vmatpush.msrb.mxu0 %v3473_v32  ;;  %1085 = vmatpush.msrb.mxu1 %v3569_v30 }
 0x25e   :  { %992 = vmatpush.msrb.mxu3 %v3572_v33 }
 0x25f   :  { %1066 = vmatpush.msrb.mxu0 %v3478_v55  ;;  %1086 = vmatpush.msrb.mxu1 %v3576_v35 }
 0x260   :  { %993 = vmatpush.msrb.mxu3 %v3579_v39 }
 0x261   :  { %1067 = vmatpush.msrb.mxu0 %v3483_v31  ;;  %1087 = vmatpush.msrb.mxu1 %v3583_v42 }
 0x262   :  { %994 = vmatpush.msrb.mxu3 %v3586_v50 }
 0x263   :  { %1068 = vmatpush.msrb.mxu0 %v3488_v44  ;;  %1088 = vmatpush.msrb.mxu1 %v3590_v3 }
 0x264   :  { %995 = vmatpush.msrb.mxu3 %v3593_v5 }
 0x265   :  { %1069 = vmatpush.msrb.mxu0 %v3493_v43  ;;  %1089 = vmatpush.msrb.mxu1 %v3597_v9 }
 0x266   :  { %996 = vmatpush.msrb.mxu3 %v3600_v15 }
 0x267   :  { %1070 = vmatpush.msrb.mxu0 %v3498_v48  ;;  %1090 = vmatpush.msrb.mxu1 %v3604_v22 }
 0x268   :  { %997 = vmatpush.msrb.mxu3 %v3607_v34 }
 0x269   :  { %1071 = vmatpush.msrb.mxu0 %v3503_v49  ;;  %1091 = vmatpush.msrb.mxu1 %v3611_v1 }
 0x26a   :  { %998 = vmatpush.msrb.mxu3 %v3614_v47 }
 0x26b   :  { %1072 = vmatpush.msrb.mxu0 %v3508_v52  ;;  %1092 = vmatpush.msrb.mxu1 %v3618_v62 }
 0x26c   :  { %999 = vmatpush.msrb.mxu3 %v3621_v51 }
 0x26d   :  { %1073 = vmatpush.msrb.mxu0 %v3513_v53  ;;  %1093 = vmatpush.msrb.mxu1 %v3625_v14 }
 0x26e   :  { %1000 = vmatpush.msrb.mxu3 %v3628_v58 }
 0x26f   :  { %1074 = vmatpush.msrb.mxu0 %v3518_v56  ;;  %1094 = vmatpush.msrb.mxu1 %v3632_v46 }
 0x270   :  { %1001 = vmatpush.msrb.mxu3 %v3635_v13 }
 0x271   :  { %1075 = vmatpush.msrb.mxu0 %v3523_v57  ;;  %1095 = vmatpush.msrb.mxu1 %v3639_v6 }
 0x272   :  { %1002 = vmatpush.msrb.mxu3 %v3642_v12 }
 0x273   :  { %1076 = vmatpush.msrb.mxu0 %v3528_v60  ;;  %1096 = vmatpush.msrb.mxu1 %v3646_v41 }
 0x274   :  { %1003 = vmatpush.msrb.mxu3 %v3649_v28 }
 0x275   :  { %1077 = vmatpush.msrb.mxu0 %v3533_v61  ;;  %1097 = vmatpush.msrb.mxu1 %v3653_v7 }
 0x276   :  { %1004 = vmatpush.msrb.mxu3 %v3656_v36 }
 0x277   :  { %1078 = vmatpush.msrb.mxu0 %v3538_v0  ;;  %1098 = vmatpush.msrb.mxu1 %v3660_v19 }
 0x278   :  { %1005 = vmatpush.msrb.mxu3 %v3663_v37 }
 0x279   :  { %1079 = vmatpush.msrb.mxu0 %v3543_v2  ;;  %1099 = vmatpush.msrb.mxu1 %v3667_v38 }
 0x27a   :  { %1006 = vmatpush.msrb.mxu3 %v4650_v11 }
 0x27b   :  { %1080 = vmatpush.msrb.mxu0 %v3548_v8  ;;  %1100 = vmatpush.msrb.mxu1 %v3672_v10 }
 0x2d8   :  { %v760_v17 = vpop.f32.mrf.mxu0 }
 0x2d9   :  { %v784_v20 = vadd.f32 %v760_v17, %v248_v16 }
 0x2db   :  { %v2495_v21 = vmul.f32 -1.442695, %v784_v20 }
 0x2dd   :  { %2563 = vpow2.f32 %v2495_v21 }
 0x2de   :  { %v740_v59 = vpop.f32.mrf.mxu3 }
 0x2df   :  { %v783_v18 = vadd.f32 %v740_v59, %v207_v4  ;;  %v780_v4 = vpop.f32.mrf.mxu1 }
 0x2e0   :  { %v823_v59 = vadd.f32 %v3375_v40, %v780_v4 }
 0x2e1   :  { %v2494_v63 = vmul.f32 -1.442695, %v783_v18 }
 0x2e3   :  { %v2564_v11 = vpop.eup %2563  ;;  %2565 = vpow2.f32 %v2494_v63 }
 0x2e4   :  { %v792_v27 = vadd.f32 1.0, %v2564_v11 }
 0x2e6   :  { %2567 = vrcp.f32 %v792_v27  ;;  %v819_v19 = vand.u32 2147483648, %v792_v27  ;;  %vm813_vm13 = vweird.f32 %v792_v27 }
 0x2e8   :  { %v820_v0 = vor.u32 1.1754944e-38, %v819_v19 }
 0x2e9   :  { %v2566_v8 = vpop.eup %2565 }
 0x2ea   :  { %v791_v38 = vadd.f32 1.0, %v2566_v8 }
 0x2ec   :  { %2569 = vrcp.f32 %v791_v38  ;;  %v2568_v10 = vpop.eup %2567  ;;  %v804_v20 = vand.u32 2147483648, %v791_v38  ;;  %v802_v45 = vand.u32 2147483647, %v791_v38  ;;  %vm798_vm9 = vweird.f32 %v791_v38 }
 0x2ed   :  { %v809_v2 = vmul.f32 %v2568_v10, %v792_v27  ;;  %vm814_vm12 = vweird.f32 %v2568_v10 }
 0x2ee   :  { %v805_v63 = vor.u32 1.1754944e-38, %v804_v20  ;;  %vm803_vm11 = vcmp.eq.f32.partialorder %v802_v45, 8.507059e+37  ;;  %vm815_vm14 = vmor %vm813_vm13, %vm814_vm12 }
 0x2ef   :  { %v810_v16 = vsub.f32 1.0, %v809_v2 }
 0x2f1   :  { %v811_v21 = vmul.f32 %v2568_v10, %v810_v16 }
 0x2f2   :  { %v2570_v25 = vpop.eup %2569 }
 0x2f3   :  { %v794_v54 = vmul.f32 %v2570_v25, %v791_v38  ;;  %vm799_vm8 = vweird.f32 %v2570_v25  ;;  %v812_v24 = vadd.f32 %v2568_v10, %v811_v21 }
 0x2f4   :  { %vm800_vm10 = vmor %vm798_vm9, %vm799_vm8 }
 0x2f5   :  { %v795_v17 = vsub.f32 1.0, %v794_v54  ;;  %v817_v54 = vand.u32 2147483647, %v792_v27  ;;  %v816_v16 = vsel %vm815_vm14, %v2568_v10, %v812_v24  ;;  %v4674_v27 = vld [vmem:[#allocation30_spill] sm:$0xff] }
 0x2f7   :  { %v796_v37 = vmul.f32 %v2570_v25, %v795_v17  ;;  %vm818_vm15 = vcmp.eq.f32.partialorder %v817_v54, 8.507059e+37 }
 0x2f9   :  { %v797_v18 = vadd.f32 %v2570_v25, %v796_v37  ;;  %v821_v37 = vsel %vm818_vm15, %v820_v0, %v816_v16 }
 0x2fa   :  { %v827_v38 = vsub.f32 1.0, %v821_v37 }
 0x2fb   :  { %v801_v8 = vsel %vm800_vm10, %v2570_v25, %v797_v18  ;;  %v829_v25 = vmul.f32 %v821_v37, %v3560_v26  ;;  %v4683_v37 = vld [vmem:[#allocation34_spill] sm:$0xff] }
 0x2fc   :  { %v806_v11 = vsel %vm803_vm11, %v805_v63, %v801_v8 }
 0x2fd   :  { %v824_v2 = vmul.f32 %v823_v59, %v806_v11 }
 0x2ff   :  { %v825_v17 = vadd.f32 %v824_v2, %v3382_v23  ;;  %v4673_v23 = vld [vmem:[#allocation20_spill] sm:$0xff] }
 0x301   :  { %2571 = vtanh.f32 %v825_v17 }
 0x307   :  { %v2572_v20 = vpop.eup %2571 }
 0x308   :  { %v828_v45 = vmul.f32 %v2572_v20, %v827_v38 }
 0x30a   :  { %v3682_v21 = vadd.f32 %v829_v25, %v828_v45 }
 0x30c   :  { %853 = vmatmul.f32.vlgmr.msrb.gmra.mxu2 %v3682_v21  ;;  %873 = vmatmul.f32.vlgmr.msra.gmra.mxu3 %v3682_v21 }
 0x30d   :  { %893 = vmatmul.f32.vlgmr.msra.gmra.mxu0 %v3682_v21  ;;  %1105 = vmatpush.msrb.mxu2 %v3565_v29 }
 0x30e   :  { %1179 = vmatpush.msra.mxu3 %v3473_v32  ;;  %1199 = vmatpush.msra.mxu0 %v3569_v30  ;;  %v4675_v32 = vld [vmem:[#allocation24_spill] sm:$0xff] }
 0x30f   :  { %1106 = vmatpush.msrb.mxu2 %v3572_v33 }
 0x310   :  { %1180 = vmatpush.msra.mxu3 %v3478_v55  ;;  %1200 = vmatpush.msra.mxu0 %v3576_v35  ;;  %v4676_v55 = vld [vmem:[#allocation23_spill] sm:$0xff] }
 0x311   :  { %1107 = vmatpush.msrb.mxu2 %v3579_v39 }
 0x312   :  { %1181 = vmatpush.msra.mxu3 %v3483_v31  ;;  %1201 = vmatpush.msra.mxu0 %v3583_v42  ;;  %v4677_v31 = vld [vmem:[#allocation32_spill] sm:$0xff] }
 0x313   :  { %1108 = vmatpush.msrb.mxu2 %v3586_v50 }
 0x314   :  { %1182 = vmatpush.msra.mxu3 %v3488_v44  ;;  %1202 = vmatpush.msra.mxu0 %v3590_v3  ;;  %v3732_v44 = vld [vmem:[#allocation6 + $0x10] sm:$0xff] }
 0x315   :  { %1109 = vmatpush.msrb.mxu2 %v3593_v5 }
 0x316   :  { %1183 = vmatpush.msra.mxu3 %v3493_v43  ;;  %1203 = vmatpush.msra.mxu0 %v3597_v9  ;;  %v4678_v43 = vld [vmem:[#allocation22_spill] sm:$0xff] }
 0x317   :  { %1110 = vmatpush.msrb.mxu2 %v3600_v15 }
 0x318   :  { %1184 = vmatpush.msra.mxu3 %v3498_v48  ;;  %1204 = vmatpush.msra.mxu0 %v3604_v22  ;;  %v4679_v48 = vld [vmem:[#allocation38_spill] sm:$0xff] }
 0x319   :  { %1111 = vmatpush.msrb.mxu2 %v3607_v34 }
 0x31a   :  { %1185 = vmatpush.msra.mxu3 %v3503_v49  ;;  %1205 = vmatpush.msra.mxu0 %v3611_v1  ;;  %v4680_v49 = vld [vmem:[#allocation26_spill] sm:$0xff] }
 0x31b   :  { %1112 = vmatpush.msrb.mxu2 %v3614_v47 }
 0x31c   :  { %1186 = vmatpush.msra.mxu3 %v3508_v52  ;;  %1206 = vmatpush.msra.mxu0 %v3618_v62  ;;  %v4681_v52 = vld [vmem:[#allocation17_spill] sm:$0xff] }
 0x31d   :  { %1113 = vmatpush.msrb.mxu2 %v3621_v51 }
 0x31e   :  { %1187 = vmatpush.msra.mxu3 %v3513_v53  ;;  %1207 = vmatpush.msra.mxu0 %v3625_v14  ;;  %v251_v53 = vadd.f32 %v4681_v52, %v4680_v49  ;;  %v1315_v52 = vld [vmem:[#allocation8 + $0x90] sm:$0xff] }
 0x31f   :  { %1114 = vmatpush.msrb.mxu2 %v3628_v58 }
 0x320   :  { %1188 = vmatpush.msra.mxu3 %v3518_v56  ;;  %1208 = vmatpush.msra.mxu0 %v3632_v46 }
 0x321   :  { %1115 = vmatpush.msrb.mxu2 %v3635_v13 }
 0x322   :  { %1189 = vmatpush.msra.mxu3 %v3523_v57  ;;  %1209 = vmatpush.msra.mxu0 %v3639_v6 }
 0x323   :  { %1116 = vmatpush.msrb.mxu2 %v3642_v12 }
 0x324   :  { %1190 = vmatpush.msra.mxu3 %v3528_v60  ;;  %1210 = vmatpush.msra.mxu0 %v3646_v41  ;;  %v4682_v60 = vld [vmem:[#allocation27_spill] sm:$0xff] }
 0x325   :  { %1117 = vmatpush.msrb.mxu2 %v3649_v28 }
 0x326   :  { %1191 = vmatpush.msra.mxu3 %v3533_v61  ;;  %1211 = vmatpush.msra.mxu0 %v3653_v7 }
 0x327   :  { %1118 = vmatpush.msrb.mxu2 %v3656_v36 }
 0x328   :  { %1192 = vmatpush.msra.mxu3 %v4673_v23  ;;  %1212 = vmatpush.msra.mxu0 %v4674_v27 }
 0x329   :  { %1119 = vmatpush.msrb.mxu2 %v4675_v32 }
 0x32a   :  { %1193 = vmatpush.msra.mxu3 %v4676_v55  ;;  %1213 = vmatpush.msra.mxu0 %v4677_v31 }
 0x32b   :  { %1120 = vmatpush.msrb.mxu2 %v3732_v44 }
 0x32c   :  { %1194 = vmatpush.msra.mxu3 %v4678_v43  ;;  %1214 = vmatpush.msra.mxu0 %v4679_v48  ;;  %v1318_v43 = vld [vmem:[#allocation8 + $0xa8] sm:$0xff] }
 0x38a   :  { %v894_v4 = vpop.f32.mrf.mxu0 }
 0x38b   :  { %v937_v8 = vadd.f32 %v3375_v40, %v894_v4 }
 0x38f   :  { %v854_v56 = vpop.f32.mrf.mxu2  ;;  %v874_v57 = vpop.f32.mrf.mxu3 }
 0x390   :  { %v897_v61 = vadd.f32 %v854_v56, %v4682_v60  ;;  %v898_v0 = vadd.f32 %v874_v57, %v251_v53  ;;  %v1312_v56 = vld [vmem:[#allocation8 + $0x78] sm:$0xff]  ;;  %v1309_v60 = vld [vmem:[#allocation8 + $0x60] sm:$0xff] }
 0x392   :  { %v2496_v30 = vmul.f32 -1.442695, %v897_v61  ;;  %v2497_v35 = vmul.f32 -1.442695, %v898_v0  ;;  %v1306_v61 = vld [vmem:[#allocation8 + $0x48] sm:$0xff]  ;;  %v1303_v0 = vld [vmem:[#allocation8 + $0x30] sm:$0xff] }
 0x394   :  { %2573 = vpow2.f32 %v2496_v30 }
 0x395   :  { %2575 = vpow2.f32 %v2497_v35  ;;  %v1300_v35 = vld [vmem:[#allocation8 + $0x18] sm:$0xff] }
 0x39a   :  { %v2574_v42 = vpop.eup %2573 }
 0x39b   :  { %v2576_v3 = vpop.eup %2575  ;;  %v905_v9 = vadd.f32 1.0, %v2574_v42 }
 0x39c   :  { %v906_v22 = vadd.f32 1.0, %v2576_v3  ;;  %v1297_v3 = vld [vmem:[#allocation8] sm:$0xff] }
 0x39d   :  { %2577 = vrcp.f32 %v905_v9  ;;  %v918_v41 = vand.u32 2147483648, %v905_v9  ;;  %v916_v10 = vand.u32 2147483647, %v905_v9  ;;  %vm912_vm1 = vweird.f32 %v905_v9 }
 0x39e   :  { %2579 = vrcp.f32 %v906_v22  ;;  %v933_v17 = vand.u32 2147483648, %v906_v22  ;;  %vm927_vm5 = vweird.f32 %v906_v22  ;;  %v931_v16 = vand.u32 2147483647, %v906_v22 }
 0x39f   :  { %v919_v59 = vor.u32 1.1754944e-38, %v918_v41  ;;  %vm917_vm3 = vcmp.eq.f32.partialorder %v916_v10, 8.507059e+37 }
 0x3a0   :  { %v934_v25 = vor.u32 1.1754944e-38, %v933_v17  ;;  %vm932_vm7 = vcmp.eq.f32.partialorder %v931_v16, 8.507059e+37  ;;  %v4686_v16 = vld [vmem:[#allocation36_spill] sm:$0xff] }
 0x3a3   :  { %v2578_v1 = vpop.eup %2577 }
 0x3a4   :  { %v2580_v62 = vpop.eup %2579  ;;  %v908_v14 = vmul.f32 %v2578_v1, %v905_v9  ;;  %vm913_vm0 = vweird.f32 %v2578_v1 }
 0x3a5   :  { %v923_v46 = vmul.f32 %v2580_v62, %v906_v22  ;;  %vm914_vm2 = vmor %vm912_vm1, %vm913_vm0  ;;  %vm928_vm4 = vweird.f32 %v2580_v62 }
 0x3a6   :  { %v909_v6 = vsub.f32 1.0, %v908_v14  ;;  %vm929_vm6 = vmor %vm927_vm5, %vm928_vm4 }
 0x3a7   :  { %v924_v7 = vsub.f32 1.0, %v923_v46 }
 0x3a8   :  { %v910_v19 = vmul.f32 %v2578_v1, %v909_v6 }
 0x3a9   :  { %v925_v18 = vmul.f32 %v2580_v62, %v924_v7 }
 0x3aa   :  { %v911_v63 = vadd.f32 %v2578_v1, %v910_v19 }
 0x3ab   :  { %v926_v2 = vadd.f32 %v2580_v62, %v925_v18 }
 0x3ac   :  { %v915_v24 = vsel %vm914_vm2, %v2578_v1, %v911_v63  ;;  %v3770_v63 = vld [vmem:[%s4566_s4] ss:$0 sm:$0xff] }
 0x3ad   :  { %v920_v11 = vsel %vm917_vm3, %v919_v59, %v915_v24  ;;  %v930_v20 = vsel %vm929_vm6, %v2580_v62, %v926_v2 }
 0x3ae   :  { %v938_v54 = vmul.f32 %v937_v8, %v920_v11  ;;  %v935_v45 = vsel %vm932_vm7, %v934_v25, %v930_v20 }
 0x3af   :  { %v941_v23 = vsub.f32 1.0, %v935_v45  ;;  %v943_v55 = vmul.f32 %v935_v45, %v3682_v21 }
 0x3b0   :  { %v939_v38 = vadd.f32 %v938_v54, %v4683_v37 }
 0x3b2   :  { %2581 = vtanh.f32 %v939_v38 }
 0x3b8   :  { %v2582_v27 = vpop.eup %2581 }
 0x3b9   :  { %v942_v40 = vmul.f32 %v2582_v27, %v941_v23 }
 0x3bb   :  { %v3743_v31 = vadd.f32 %v943_v55, %v942_v40 }
 0x3bd   :  { %967 = vmatmul.f32.vlgmr.msra.gmra.mxu1 %v3743_v31  ;;  %987 = vmatmul.f32.vlgmr.msra.gmra.mxu2 %v3743_v31 }
 0x3be   :  { %1007 = vmatmul.f32.vlgmr.msrb.gmra.mxu3 %v3743_v31  ;;  %1219 = vmatpush.msra.mxu1 %v3565_v29  ;;  %v1342_v29 = vld [vmem:[#allocation8 + $0x168] sm:$0xff] }
 0x3bf   :  { %1353 = vmatpush.msra.mxu2 %v1342_v29  ;;  %v4687_v29 = vld [vmem:[#allocation35_spill] sm:$0xff] }
 0x3c0   :  { %1220 = vmatpush.msra.mxu1 %v3572_v33  ;;  %v1339_v33 = vld [vmem:[#allocation8 + $0x150] sm:$0xff] }
 0x3c1   :  { %1354 = vmatpush.msra.mxu2 %v1339_v33  ;;  %v4688_v33 = vld [vmem:[#allocation16_spill] sm:$0xff] }
 0x3c2   :  { %1221 = vmatpush.msra.mxu1 %v3579_v39  ;;  %v1336_v39 = vld [vmem:[#allocation8 + $0x138] sm:$0xff] }
 0x3c3   :  { %1355 = vmatpush.msra.mxu2 %v1336_v39  ;;  %v3786_v39 = vld [vmem:[#allocation9 + $0x168] sm:$0xff] }
 0x3c4   :  { %1222 = vmatpush.msra.mxu1 %v3586_v50  ;;  %v1333_v50 = vld [vmem:[#allocation8 + $0x120] sm:$0xff] }
 0x3c5   :  { %1356 = vmatpush.msra.mxu2 %v1333_v50  ;;  %v3789_v50 = vld [vmem:[#allocation9 + $0x150] sm:$0xff] }
 0x3c6   :  { %1223 = vmatpush.msra.mxu1 %v3593_v5  ;;  %v1330_v5 = vld [vmem:[#allocation8 + $0x108] sm:$0xff] }
 0x3c7   :  { %1357 = vmatpush.msra.mxu2 %v1330_v5  ;;  %v3792_v5 = vld [vmem:[#allocation9 + $0x138] sm:$0xff] }
 0x3c8   :  { %1224 = vmatpush.msra.mxu1 %v3600_v15 }
 0x3ca   :  { %1225 = vmatpush.msra.mxu1 %v3607_v34  ;;  %v4684_v34 = vld [vmem:[#allocation28_spill] sm:$0xff] }
 0x3cc   :  { %1226 = vmatpush.msra.mxu1 %v3614_v47 }
 0x3ce   :  { %1227 = vmatpush.msra.mxu1 %v3621_v51  ;;  %v1327_v51 = vld [vmem:[#allocation8 + $0xf0] sm:$0xff] }
 0x3cf   :  { %1358 = vmatpush.msra.mxu2 %v1327_v51  ;;  %v3798_v51 = vld [vmem:[#allocation9 + $0x108] sm:$0xff] }
 0x3d0   :  { %1228 = vmatpush.msra.mxu1 %v3628_v58 }
 0x3d2   :  { %1229 = vmatpush.msra.mxu1 %v3635_v13  ;;  %v1324_v13 = vld [vmem:[#allocation8 + $0xd8] sm:$0xff] }
 0x3d3   :  { %1359 = vmatpush.msra.mxu2 %v1324_v13  ;;  %v1341_v13 = vld [vmem:[#allocation8 + $0x160] sm:$0xff] }
 0x3d4   :  { %1230 = vmatpush.msra.mxu1 %v3642_v12  ;;  %v4685_v12 = vld [vmem:[#allocation19_spill] sm:$0xff] }
 0x3d6   :  { %1231 = vmatpush.msra.mxu1 %v3649_v28  ;;  %v254_v28 = vadd.f32 %v4685_v12, %v4680_v49  ;;  %v3801_v12 = vld [vmem:[#allocation9 + $0xf0] sm:$0xff] }
 0x3d8   :  { %1232 = vmatpush.msra.mxu1 %v3656_v36  ;;  %v1321_v36 = vld [vmem:[#allocation8 + $0xc0] sm:$0xff] }
 0x3d9   :  { %1360 = vmatpush.msra.mxu2 %v1321_v36  ;;  %v1338_v36 = vld [vmem:[#allocation8 + $0x148] sm:$0xff] }
 0x3da   :  { %1233 = vmatpush.msra.mxu1 %v4675_v32 }
 0x3db   :  { %1361 = vmatpush.msra.mxu2 %v1318_v43  ;;  %v1335_v43 = vld [vmem:[#allocation8 + $0x130] sm:$0xff] }
 0x3dc   :  { %1234 = vmatpush.msra.mxu1 %v3732_v44 }
 0x3dd   :  { %1362 = vmatpush.msra.mxu2 %v1315_v52  ;;  %v4689_v52 = vld [vmem:[#allocation15_spill] sm:$0xff] }
 0x3df   :  { %1363 = vmatpush.msra.mxu2 %v1312_v56  ;;  %v1331_v56 = vld [vmem:[#allocation8 + $0x110] sm:$0xff] }
 0x3e1   :  { %1364 = vmatpush.msra.mxu2 %v1309_v60  ;;  %v3812_v60 = vld [vmem:[#allocation9 + $0xa8] sm:$0xff] }
 0x3e3   :  { %1365 = vmatpush.msra.mxu2 %v1306_v61 }
 0x3e5   :  { %1366 = vmatpush.msra.mxu2 %v1303_v0 }
 0x3e7   :  { %1367 = vmatpush.msra.mxu2 %v1300_v35 }
 0x3e9   :  { %1368 = vmatpush.msra.mxu2 %v1297_v3  ;;  %v1328_v3 = vld [vmem:[#allocation8 + $0xf8] sm:$0xff] }
 0x43a   :  { %v968_v15 = vpop.f32.mrf.mxu1 }
 0x43b   :  { %v1011_v47 = vadd.f32 %v968_v15, %v4684_v34  ;;  %v3795_v15 = vld [vmem:[#allocation9 + $0x120] sm:$0xff]  ;;  %v1343_v34 = vld [vmem:[#allocation8 + $0x170] sm:$0xff] }
 0x43c   :  { %1394 = vmatpush.msrb.mxu3 %v1343_v34  ;;  %v1305_v34 = vld [vmem:[#allocation8 + $0x40] sm:$0xff] }
 0x43d   :  { %v2498_v58 = vmul.f32 -1.442695, %v1011_v47  ;;  %v1344_v47 = vld [vmem:[#allocation8 + $0x178] sm:$0xff] }
 0x43f   :  { %2583 = vpow2.f32 %v2498_v58  ;;  %v1340_v58 = vld [vmem:[#allocation8 + $0x158] sm:$0xff] }
 0x440   :  { %v988_v32 = vpop.f32.mrf.mxu2  ;;  %1395 = vmatpush.msrb.mxu3 %v1340_v58  ;;  %v1301_v58 = vld [vmem:[#allocation8 + $0x20] sm:$0xff] }
 0x441   :  { %v1012_v44 = vadd.f32 %v988_v32, %v254_v28  ;;  %v1008_v41 = vpop.f32.mrf.mxu3  ;;  %v1337_v28 = vld [vmem:[#allocation8 + $0x140] sm:$0xff]  ;;  %v3804_v32 = vld [vmem:[#allocation9 + $0xd8] sm:$0xff] }
 0x442   :  { %v1051_v59 = vadd.f32 %v3770_v63, %v1008_v41  ;;  %1396 = vmatpush.msrb.mxu3 %v1337_v28  ;;  %v1322_v41 = vld [vmem:[#allocation8 + $0xc8] sm:$0xff] }
 0x443   :  { %v2499_v48 = vmul.f32 -1.442695, %v1012_v44  ;;  %v1334_v44 = vld [vmem:[#allocation8 + $0x128] sm:$0xff] }
 0x444   :  { %1397 = vmatpush.msrb.mxu3 %v1334_v44 }
 0x445   :  { %v2584_v53 = vpop.eup %2583  ;;  %2585 = vpow2.f32 %v2499_v48  ;;  %v3807_v48 = vld [vmem:[#allocation9 + $0xc0] sm:$0xff] }
 0x446   :  { %v1019_v57 = vadd.f32 1.0, %v2584_v53  ;;  %v257_v53 = vadd.f32 %v4689_v52, %v4680_v49  ;;  %1398 = vmatpush.msrb.mxu3 %v1331_v56  ;;  %v1299_v52 = vld [vmem:[#allocation8 + $0x10] sm:$0xff] }
 0x448   :  { %2587 = vrcp.f32 %v1019_v57  ;;  %v1032_v62 = vand.u32 2147483648, %v1019_v57  ;;  %v1030_v46 = vand.u32 2147483647, %v1019_v57  ;;  %vm1026_vm9 = vweird.f32 %v1019_v57  ;;  %1399 = vmatpush.msrb.mxu3 %v1328_v3 }
 0x44a   :  { %v1033_v10 = vor.u32 1.1754944e-38, %v1032_v62  ;;  %vm1031_vm11 = vcmp.eq.f32.partialorder %v1030_v46, 8.507059e+37  ;;  %v1326_v46 = vld [vmem:[#allocation8 + $0xe8] sm:$0xff] }
 0x44b   :  { %v2586_v30 = vpop.eup %2585 }
 0x44c   :  { %v1020_v42 = vadd.f32 1.0, %v2586_v30  ;;  %v4690_v30 = vld [vmem:[#allocation29_spill] sm:$0xff] }
 0x44e   :  { %v2588_v9 = vpop.eup %2587  ;;  %2589 = vrcp.f32 %v1020_v42  ;;  %v1047_v11 = vand.u32 2147483648, %v1020_v42  ;;  %v1045_v54 = vand.u32 2147483647, %v1020_v42  ;;  %vm1041_vm13 = vweird.f32 %v1020_v42 }
 0x44f   :  { %v1022_v22 = vmul.f32 %v2588_v9, %v1019_v57  ;;  %vm1027_vm8 = vweird.f32 %v2588_v9  ;;  %v1332_v57 = vld [vmem:[#allocation8 + $0x118] sm:$0xff] }
 0x450   :  { %vm1028_vm10 = vmor %vm1026_vm9, %vm1027_vm8  ;;  %v1048_v38 = vor.u32 1.1754944e-38, %v1047_v11  ;;  %vm1046_vm15 = vcmp.eq.f32.partialorder %v1045_v54, 8.507059e+37  ;;  %v1314_v54 = vld [vmem:[#allocation8 + $0x88] sm:$0xff] }
 0x451   :  { %v1023_v1 = vsub.f32 1.0, %v1022_v22  ;;  %v3816_v22 = vld [vmem:[#allocation9 + $0x90] sm:$0xff] }
 0x453   :  { %v1024_v14 = vmul.f32 %v2588_v9, %v1023_v1 }
 0x454   :  { %v2590_v6 = vpop.eup %2589 }
 0x455   :  { %v1037_v7 = vmul.f32 %v2590_v6, %v1020_v42  ;;  %v1025_v19 = vadd.f32 %v2588_v9, %v1024_v14  ;;  %vm1042_vm12 = vweird.f32 %v2590_v6  ;;  %v1325_v14 = vld [vmem:[#allocation8 + $0xe0] sm:$0xff] }
 0x456   :  { %vm1043_vm14 = vmor %vm1041_vm13, %vm1042_vm12  ;;  %1400 = vmatpush.msrb.mxu3 %v1325_v14 }
 0x457   :  { %v1038_v4 = vsub.f32 1.0, %v1037_v7  ;;  %v1029_v18 = vsel %vm1028_vm10, %v2588_v9, %v1025_v19  ;;  %v1329_v9 = vld [vmem:[#allocation8 + $0x100] sm:$0xff]  ;;  %v1323_v7 = vld [vmem:[#allocation8 + $0xd0] sm:$0xff] }
 0x458   :  { %v1034_v8 = vsel %vm1031_vm11, %v1033_v10, %v1029_v18  ;;  %v3822_v19 = vld [vmem:[#allocation9 + $0x60] sm:$0xff]  ;;  %1401 = vmatpush.msrb.mxu3 %v1322_v41  ;;  %v1319_v10 = vld [vmem:[#allocation8 + $0xb0] sm:$0xff]  ;;  %v3825_v18 = vld [vmem:[#allocation9 + $0x48] sm:$0xff] }
 0x459   :  { %v1039_v24 = vmul.f32 %v2590_v6, %v1038_v4  ;;  %v1052_v2 = vmul.f32 %v1051_v59, %v1034_v8  ;;  %v1320_v4 = vld [vmem:[#allocation8 + $0xb8] sm:$0xff]  ;;  %v1317_v8 = vld [vmem:[#allocation8 + $0xa0] sm:$0xff] }
 0x45a   :  { %1402 = vmatpush.msrb.mxu3 %v1319_v10  ;;  %v1316_v59 = vld [vmem:[#allocation8 + $0x98] sm:$0xff]  ;;  %v4692_v10 = vld [vmem:[#allocation37_spill] sm:$0xff] }
 0x45b   :  { %v1040_v17 = vadd.f32 %v2590_v6, %v1039_v24  ;;  %v1053_v37 = vadd.f32 %v1052_v2, %v4686_v16  ;;  %v3828_v24 = vld [vmem:[#allocation9 + $0x30] sm:$0xff]  ;;  %v1313_v2 = vld [vmem:[#allocation8 + $0x80] sm:$0xff] }
 0x45c   :  { %1403 = vmatpush.msrb.mxu3 %v1316_v59 }
 0x45d   :  { %v1044_v20 = vsel %vm1043_vm14, %v2590_v6, %v1040_v17  ;;  %2591 = vtanh.f32 %v1053_v37  ;;  %v3819_v6 = vld [vmem:[#allocation9 + $0x78] sm:$0xff] }
 0x45e   :  { %v1049_v25 = vsel %vm1046_vm15, %v1048_v38, %v1044_v20  ;;  %v3831_v17 = vld [vmem:[#allocation9 + $0x18] sm:$0xff]  ;;  %1404 = vmatpush.msrb.mxu3 %v1313_v2  ;;  %v1310_v38 = vld [vmem:[#allocation8 + $0x68] sm:$0xff]  ;;  %v1311_v20 = vld [vmem:[#allocation8 + $0x70] sm:$0xff] }
 0x45f   :  { %v1055_v45 = vsub.f32 1.0, %v1049_v25  ;;  %v1057_v40 = vmul.f32 %v1049_v25, %v3743_v31  ;;  %v3833_v25 = vld [vmem:[#allocation9] sm:$0xff] }
 0x460   :  { %4691 = vst [vmem:[#allocation25_spill] sm:$0xff] %v3833_v25  ;;  %1405 = vmatpush.msrb.mxu3 %v1310_v38 }
 0x463   :  { %v2592_v23 = vpop.eup %2591 }
 0x464   :  { %v1056_v27 = vmul.f32 %v2592_v23, %v1055_v45  ;;  %v1307_v23 = vld [vmem:[#allocation8 + $0x50] sm:$0xff] }
 0x465   :  { %1406 = vmatpush.msrb.mxu3 %v1307_v23  ;;  %v3852_v23 = vld [vmem:[#allocation9 + $0x140] sm:$0xff] }
 0x466   :  { %v3775_v55 = vadd.f32 %v1057_v40, %v1056_v27  ;;  %v1308_v27 = vld [vmem:[#allocation8 + $0x58] sm:$0xff] }
 0x467   :  { %v1304_v40 = vld [vmem:[#allocation8 + $0x38] sm:$0xff] }
 0x468   :  { %1081 = vmatmul.f32.vlgmr.msrb.gmra.mxu0 %v3775_v55  ;;  %1101 = vmatmul.f32.vlgmr.msrb.gmra.mxu1 %v3775_v55 }
 0x469   :  { %1121 = vmatmul.f32.vlgmr.msrb.gmra.mxu2 %v3775_v55  ;;  %1555 = vmatpush.msrb.mxu1 %v3786_v39 }
 0x46a   :  { %1435 = vmatpush.msrb.mxu0 %v1344_v47  ;;  %1407 = vmatpush.msrb.mxu3 %v1304_v40  ;;  %v3862_v40 = vld [vmem:[#allocation9 + $0x110] sm:$0xff] }
 0x46b   :  { %1556 = vmatpush.msrb.mxu1 %v3789_v50 }
 0x46c   :  { %1436 = vmatpush.msrb.mxu0 %v1341_v13  ;;  %v1302_v13 = vld [vmem:[#allocation8 + $0x28] sm:$0xff]  ;;  %1408 = vmatpush.msrb.mxu3 %v1301_v58  ;;  %v3873_v58 = vld [vmem:[#allocation9 + $0xe0] sm:$0xff] }
 0x46d   :  { %1557 = vmatpush.msrb.mxu1 %v3792_v5 }
 0x46e   :  { %1437 = vmatpush.msrb.mxu0 %v1338_v36 }
 0x46f   :  { %1558 = vmatpush.msrb.mxu1 %v3795_v15 }
 0x470   :  { %1438 = vmatpush.msrb.mxu0 %v1335_v43  ;;  %v1298_v43 = vld [vmem:[#allocation8 + $0x8] sm:$0xff] }
 0x471   :  { %1369 = vmatmul.f32.vlgmr.msra.gmra.mxu2 %v4687_v29  ;;  %1559 = vmatpush.msrb.mxu1 %v3798_v51 }
 0x472   :  { %1439 = vmatpush.msrb.mxu0 %v1332_v57  ;;  %1409 = vmatpush.msrb.mxu3 %v1298_v43  ;;  %v3910_v43 = vld [vmem:[#allocation9 + $0x38] sm:$0xff] }
 0x473   :  { %1560 = vmatpush.msrb.mxu1 %v3801_v12 }
 0x474   :  { %1440 = vmatpush.msrb.mxu0 %v1329_v9 }
 0x475   :  { %1561 = vmatpush.msrb.mxu1 %v3804_v32 }
 0x476   :  { %1441 = vmatpush.msrb.mxu0 %v1326_v46 }
 0x477   :  { %1562 = vmatpush.msrb.mxu1 %v3807_v48 }
 0x478   :  { %1442 = vmatpush.msrb.mxu0 %v1323_v7 }
 0x479   :  { %1372 = vmatmul.f32.gmra.mxu2 %v4688_v33  ;;  %1563 = vmatpush.msrb.mxu1 %v3812_v60 }
 0x47a   :  { %1443 = vmatpush.msrb.mxu0 %v1320_v4 }
 0x47b   :  { %1564 = vmatpush.msrb.mxu1 %v3816_v22 }
 0x47c   :  { %1444 = vmatpush.msrb.mxu0 %v1317_v8 }
 0x47d   :  { %1565 = vmatpush.msrb.mxu1 %v3819_v6 }
 0x47e   :  { %1445 = vmatpush.msrb.mxu0 %v1314_v54 }
 0x47f   :  { %1566 = vmatpush.msrb.mxu1 %v3822_v19 }
 0x480   :  { %1446 = vmatpush.msrb.mxu0 %v1311_v20  ;;  %v3842_v20 = vld [vmem:[#allocation9 + $0x170] sm:$0xff] }
 0x481   :  { %1375 = vmatmul.f32.gmra.mxu2 %v3560_v26  ;;  %1567 = vmatpush.msrb.mxu1 %v3825_v18 }
 0x482   :  { %1447 = vmatpush.msrb.mxu0 %v1308_v27  ;;  %v3857_v27 = vld [vmem:[#allocation9 + $0x128] sm:$0xff] }
 0x483   :  { %1568 = vmatpush.msrb.mxu1 %v3828_v24 }
 0x484   :  { %1448 = vmatpush.msrb.mxu0 %v1305_v34  ;;  %v4693_v34 = vmov 0.0  }
 0x485   :  { %1569 = vmatpush.msrb.mxu1 %v3831_v17 }
 0x486   :  { %1449 = vmatpush.msrb.mxu0 %v1302_v13  ;;  %v3878_v13 = vld [vmem:[#allocation9 + $0xc8] sm:$0xff] }
 0x487   :  { %1570 = vmatpush.msrb.mxu1 %v3833_v25 }
 0x488   :  { %1450 = vmatpush.msrb.mxu0 %v1299_v52  ;;  %v3912_v52 = vld [vmem:[#allocation9 + $0x178] sm:$0xff] }
 0x489   :  { %1378 = vmatmul.f32.gmra.mxu2 %v3682_v21 }
 0x48a   :  { %1595 = vmatpush.msrb.mxu2 %v3912_v52 }
 0x491   :  { %1381 = vmatmul.f32.gmra.mxu2 %v3743_v31 }
 0x499   :  { %1384 = vmatmul.f32.gmra.mxu2 %v3775_v55 }
 0x4e5   :  { %v1082_v61 = vpop.f32.mrf.mxu0  ;;  %v1102_v0 = vpop.f32.mrf.mxu1 }
 0x4e6   :  { %v1125_v35 = vadd.f32 %v1082_v61, %v4690_v30  ;;  %v1126_v42 = vadd.f32 %v1102_v0, %v257_v53 }
 0x4e8   :  { %v2500_v1 = vmul.f32 -1.442695, %v1125_v35  ;;  %v2501_v62 = vmul.f32 -1.442695, %v1126_v42 }
 0x4ea   :  { %2593 = vpow2.f32 %v2500_v1 }
 0x4eb   :  { %2595 = vpow2.f32 %v2501_v62 }
 0x4ec   :  { %v1122_v35 = vpop.f32.mrf.mxu2 }
 0x4ed   :  { %v1165_v1 = vadd.f32 %v3770_v63, %v1122_v35 }
 0x4f0   :  { %v2594_v11 = vpop.eup %2593 }
 0x4f1   :  { %v2596_v16 = vpop.eup %2595  ;;  %v1133_v37 = vadd.f32 1.0, %v2594_v11 }
 0x4f2   :  { %v1134_v45 = vadd.f32 1.0, %v2596_v16 }
 0x4f3   :  { %2597 = vrcp.f32 %v1133_v37  ;;  %v1146_v57 = vand.u32 2147483648, %v1133_v37  ;;  %v1144_v0 = vand.u32 2147483647, %v1133_v37  ;;  %vm1140_vm1 = vweird.f32 %v1133_v37 }
 0x4f4   :  { %2599 = vrcp.f32 %v1134_v45  ;;  %v1161_v46 = vand.u32 2147483648, %v1134_v45  ;;  %vm1155_vm5 = vweird.f32 %v1134_v45  ;;  %v1159_v7 = vand.u32 2147483647, %v1134_v45 }
 0x4f5   :  { %v1147_v3 = vor.u32 1.1754944e-38, %v1146_v57  ;;  %vm1145_vm3 = vcmp.eq.f32.partialorder %v1144_v0, 8.507059e+37  ;;  %v3975_v0 = vld [vmem:[#allocation9 + $0x130] sm:$0xff] }
 0x4f6   :  { %v1162_v8 = vor.u32 1.1754944e-38, %v1161_v46  ;;  %vm1160_vm7 = vcmp.eq.f32.partialorder %v1159_v7, 8.507059e+37  ;;  %v3997_v46 = vld [vmem:[#allocation9 + $0xb8] sm:$0xff] }
 0x4f9   :  { %v2598_v47 = vpop.eup %2597 }
 0x4fa   :  { %v2600_v28 = vpop.eup %2599  ;;  %v1136_v36 = vmul.f32 %v2598_v47, %v1133_v37  ;;  %vm1141_vm0 = vweird.f32 %v2598_v47 }
 0x4fb   :  { %v1151_v44 = vmul.f32 %v2600_v28, %v1134_v45  ;;  %vm1142_vm2 = vmor %vm1140_vm1, %vm1141_vm0  ;;  %vm1156_vm4 = vweird.f32 %v2600_v28  ;;  %v3848_v45 = vld [vmem:[#allocation9 + $0x158] sm:$0xff] }
 0x4fc   :  { %v1137_v53 = vsub.f32 1.0, %v1136_v36  ;;  %vm1157_vm6 = vmor %vm1155_vm5, %vm1156_vm4  ;;  %v3894_v36 = vld [vmem:[#allocation9 + $0x80] sm:$0xff] }
 0x4fd   :  { %v1152_v56 = vsub.f32 1.0, %v1151_v44  ;;  %v3899_v44 = vld [vmem:[#allocation9 + $0x68] sm:$0xff] }
 0x4fe   :  { %v1138_v61 = vmul.f32 %v2598_v47, %v1137_v53  ;;  %v3917_v53 = vld [vmem:[#allocation9 + $0x20] sm:$0xff] }
 0x4ff   :  { %v1153_v30 = vmul.f32 %v2600_v28, %v1152_v56  ;;  %4694 = vst [vmem:[#allocation20_spill] sm:$0xff] %v3917_v53  ;;  %v3922_v56 = vld [vmem:[#allocation9 + $0x8] sm:$0xff] }
 0x500   :  { %v1139_v42 = vadd.f32 %v2598_v47, %v1138_v61  ;;  %4695 = vst [vmem:[#allocation30_spill] sm:$0xff] %v3922_v56 }
 0x501   :  { %v1154_v62 = vadd.f32 %v2600_v28, %v1153_v30  ;;  %v3977_v30 = vld [vmem:[#allocation9 + $0x118] sm:$0xff] }
 0x502   :  { %v1143_v9 = vsel %vm1142_vm2, %v2598_v47, %v1139_v42  ;;  %v3869_v47 = vld [vmem:[#allocation9 + $0xf8] sm:$0xff]  ;;  %v3981_v42 = vld [vmem:[#allocation9 + $0x100] sm:$0xff] }
 0x503   :  { %v1148_v14 = vsel %vm1145_vm3, %v1147_v3, %v1143_v9  ;;  %v1158_v59 = vsel %vm1157_vm6, %v2600_v28, %v1154_v62  ;;  %v3889_v28 = vld [vmem:[#allocation9 + $0x98] sm:$0xff]  ;;  %v4697_v9 = vld [vmem:[#allocation31_spill] sm:$0xff]  ;;  %v3992_v62 = vld [vmem:[#allocation9 + $0xd0] sm:$0xff] }
 0x504   :  { %v1166_v41 = vmul.f32 %v1165_v1, %v1148_v14  ;;  %v1163_v11 = vsel %vm1160_vm7, %v1162_v8, %v1158_v59  ;;  %v4013_v8 = vld [vmem:[#allocation9 + $0x88] sm:$0xff] }
 0x505   :  { %v1169_v2 = vsub.f32 1.0, %v1163_v11  ;;  %v1171_v37 = vmul.f32 %v1163_v11, %v3775_v55  ;;  %v4018_v11 = vld [vmem:[#allocation9 + $0x70] sm:$0xff] }
 0x506   :  { %v1167_v4 = vadd.f32 %v1166_v41, %v4692_v10  ;;  %v4009_v10 = vld [vmem:[#allocation9 + $0xa0] sm:$0xff] }
 0x508   :  { %2601 = vtanh.f32 %v1167_v4 }
 0x50e   :  { %v2602_v54 = vpop.eup %2601 }
 0x50f   :  { %v1170_v16 = vmul.f32 %v2602_v54, %v1169_v2  ;;  %v4025_v54 = vld [vmem:[#allocation9 + $0x58] sm:$0xff] }
 0x510   :  { %4698 = vst [vmem:[#allocation24_spill] sm:$0xff] %v4025_v54 }
 0x511   :  { %v3840_v38 = vadd.f32 %v1171_v37, %v1170_v16  ;;  %v4032_v37 = vld [vmem:[#allocation9 + $0x40] sm:$0xff] }
 0x512   :  { %4699 = vst [vmem:[#allocation23_spill] sm:$0xff] %v4032_v37 }
 0x513   :  { %1195 = vmatmul.f32.vlgmr.msra.gmra.mxu3 %v3840_v38  ;;  %1215 = vmatmul.f32.vlgmr.msra.gmra.mxu0 %v3840_v38 }
 0x514   :  { %1235 = vmatmul.f32.vlgmr.msra.gmra.mxu1 %v3840_v38  ;;  %1387 = vmatmul.f32.gmra.mxu2 %v3840_v38 }
 0x515   :  { %1575 = vmatpush.msra.mxu1 %v3842_v20  ;;  %1666 = vmatpush.msra.mxu3 %v3786_v39 }
 0x516   :  { %1686 = vmatpush.msra.mxu0 %v3842_v20 }
 0x517   :  { %1576 = vmatpush.msra.mxu1 %v3848_v45  ;;  %1667 = vmatpush.msra.mxu3 %v3789_v50 }
 0x518   :  { %1687 = vmatpush.msra.mxu0 %v3848_v45 }
 0x519   :  { %1577 = vmatpush.msra.mxu1 %v3852_v23  ;;  %1668 = vmatpush.msra.mxu3 %v3792_v5 }
 0x51a   :  { %1688 = vmatpush.msra.mxu0 %v3852_v23 }
 0x51b   :  { %1578 = vmatpush.msra.mxu1 %v3857_v27  ;;  %1410 = vmatmul.f32.vlgmr.msrb.gmra.mxu3 %v4687_v29 }
 0x51c   :  { %1451 = vmatmul.f32.vlgmr.msrb.gmra.mxu0 %v4687_v29  ;;  %1571 = vmatmul.f32.vlgmr.msrb.gmra.mxu1 %v4693_v34  ;;  %v3883_v29 = vld [vmem:[#allocation9 + $0xb0] sm:$0xff] }
 0x51d   :  { %1579 = vmatpush.msra.mxu1 %v3862_v40  ;;  %1669 = vmatpush.msra.mxu3 %v3795_v15 }
 0x51e   :  { %1689 = vmatpush.msra.mxu0 %v3857_v27 }
 0x51f   :  { %1580 = vmatpush.msra.mxu1 %v3869_v47  ;;  %1670 = vmatpush.msra.mxu3 %v3798_v51 }
 0x520   :  { %1690 = vmatpush.msra.mxu0 %v3862_v40 }
 0x521   :  { %1581 = vmatpush.msra.mxu1 %v3873_v58  ;;  %1671 = vmatpush.msra.mxu3 %v3801_v12 }
 0x522   :  { %1691 = vmatpush.msra.mxu0 %v3869_v47 }
 0x523   :  { %1582 = vmatpush.msra.mxu1 %v3878_v13  ;;  %1413 = vmatmul.f32.gmra.mxu3 %v4688_v33 }
 0x524   :  { %1454 = vmatmul.f32.gmra.mxu0 %v4688_v33  ;;  %1672 = vmatpush.msra.mxu3 %v3804_v32  ;;  %v3904_v33 = vld [vmem:[#allocation9 + $0x50] sm:$0xff] }
 0x525   :  { %1583 = vmatpush.msra.mxu1 %v3883_v29  ;;  %1692 = vmatpush.msra.mxu0 %v3873_v58 }
 0x526   :  { %1673 = vmatpush.msra.mxu3 %v3807_v48 }
 0x527   :  { %1584 = vmatpush.msra.mxu1 %v3889_v28  ;;  %1693 = vmatpush.msra.mxu0 %v3878_v13 }
 0x528   :  { %1674 = vmatpush.msra.mxu3 %v3812_v60 }
 0x529   :  { %1585 = vmatpush.msra.mxu1 %v3894_v36  ;;  %1694 = vmatpush.msra.mxu0 %v3883_v29 }
 0x52a   :  { %1675 = vmatpush.msra.mxu3 %v3816_v22 }
 0x52b   :  { %1586 = vmatpush.msra.mxu1 %v3899_v44  ;;  %1416 = vmatmul.f32.gmra.mxu3 %v3560_v26 }
 0x52c   :  { %1457 = vmatmul.f32.gmra.mxu0 %v3560_v26  ;;  %1676 = vmatpush.msra.mxu3 %v3819_v6  ;;  %v3963_v26 = vld [vmem:[#allocation9 + $0x160] sm:$0xff] }
 0x52d   :  { %1587 = vmatpush.msra.mxu1 %v3904_v33  ;;  %1695 = vmatpush.msra.mxu0 %v3889_v28 }
 0x52e   :  { %1677 = vmatpush.msra.mxu3 %v3822_v19  ;;  %1596 = vmatpush.msrb.mxu2 %v3963_v26 }
 0x52f   :  { %1588 = vmatpush.msra.mxu1 %v3910_v43  ;;  %1696 = vmatpush.msra.mxu0 %v3894_v36 }
 0x530   :  { %1678 = vmatpush.msra.mxu3 %v3825_v18 }
 0x531   :  { %1589 = vmatpush.msra.mxu1 %v3917_v53  ;;  %1697 = vmatpush.msra.mxu0 %v3899_v44 }
 0x532   :  { %1679 = vmatpush.msra.mxu3 %v3828_v24 }
 0x533   :  { %1590 = vmatpush.msra.mxu1 %v3922_v56  ;;  %1419 = vmatmul.f32.gmra.mxu3 %v3682_v21 }
 0x534   :  { %1591 = vmatmul.f32.vlgmr.msra.gmra.mxu1 %v4693_v34  ;;  %1460 = vmatmul.f32.gmra.mxu0 %v3682_v21  ;;  %v3965_v21 = vld [vmem:[#allocation9 + $0x148] sm:$0xff] }
 0x535   :  { %1706 = vmatpush.msrb.mxu1 %v3912_v52  ;;  %1680 = vmatpush.msra.mxu3 %v3831_v17 }
 0x536   :  { %1698 = vmatpush.msra.mxu0 %v3904_v33  ;;  %1597 = vmatpush.msrb.mxu2 %v3965_v21 }
 0x537   :  { %1681 = vmatpush.msra.mxu3 %v3833_v25  ;;  %1707 = vmatpush.msrb.mxu1 %v3963_v26 }
 0x538   :  { %1699 = vmatpush.msra.mxu0 %v3910_v43  ;;  %1598 = vmatpush.msrb.mxu2 %v3975_v0 }
 0x539   :  { %1797 = vmatpush.msrb.mxu3 %v3842_v20  ;;  %1708 = vmatpush.msrb.mxu1 %v3965_v21 }
 0x53a   :  { %1700 = vmatpush.msra.mxu0 %v3917_v53  ;;  %1599 = vmatpush.msrb.mxu2 %v3977_v30 }
 0x53b   :  { %1798 = vmatpush.msrb.mxu3 %v3848_v45  ;;  %1709 = vmatpush.msrb.mxu1 %v3975_v0 }
 0x53c   :  { %1422 = vmatmul.f32.gmra.mxu3 %v3743_v31  ;;  %1463 = vmatmul.f32.gmra.mxu0 %v3743_v31  ;;  %v4696_v31 = vld [vmem:[#allocation18_spill] sm:$0xff] }
 0x53d   :  { %1799 = vmatpush.msrb.mxu3 %v3852_v23  ;;  %1701 = vmatpush.msra.mxu0 %v3922_v56 }
 0x53e   :  { %1710 = vmatpush.msrb.mxu1 %v3977_v30  ;;  %1600 = vmatpush.msrb.mxu2 %v3981_v42 }
 0x53f   :  { %1817 = vmatpush.msrb.mxu0 %v3912_v52  ;;  %1800 = vmatpush.msrb.mxu3 %v3857_v27 }
 0x540   :  { %1711 = vmatpush.msrb.mxu1 %v3981_v42 }
 0x541   :  { %1801 = vmatpush.msrb.mxu3 %v3862_v40  ;;  %1818 = vmatpush.msrb.mxu0 %v3963_v26 }
 0x543   :  { %1802 = vmatpush.msrb.mxu3 %v3869_v47  ;;  %1819 = vmatpush.msrb.mxu0 %v3965_v21 }
 0x544   :  { %1425 = vmatmul.f32.gmra.mxu3 %v3775_v55  ;;  %1466 = vmatmul.f32.gmra.mxu0 %v3775_v55  ;;  %v260_v55 = vadd.f32 %v4696_v31, %v4680_v49  ;;  %v3986_v49 = vld [vmem:[#allocation9 + $0xe8] sm:$0xff] }
 0x545   :  { %1803 = vmatpush.msrb.mxu3 %v3873_v58  ;;  %1820 = vmatpush.msrb.mxu0 %v3975_v0 }
 0x546   :  { %1601 = vmatpush.msrb.mxu2 %v3986_v49  ;;  %1712 = vmatpush.msrb.mxu1 %v3986_v49 }
 0x547   :  { %1804 = vmatpush.msrb.mxu3 %v3878_v13  ;;  %1821 = vmatpush.msrb.mxu0 %v3977_v30 }
 0x548   :  { %1602 = vmatpush.msrb.mxu2 %v3992_v62  ;;  %1713 = vmatpush.msrb.mxu1 %v3992_v62 }
 0x549   :  { %1805 = vmatpush.msrb.mxu3 %v3883_v29  ;;  %1822 = vmatpush.msrb.mxu0 %v3981_v42 }
 0x54a   :  { %1603 = vmatpush.msrb.mxu2 %v3997_v46  ;;  %1714 = vmatpush.msrb.mxu1 %v3997_v46 }
 0x54b   :  { %1806 = vmatpush.msrb.mxu3 %v3889_v28  ;;  %1823 = vmatpush.msrb.mxu0 %v3986_v49 }
 0x54c   :  { %1428 = vmatmul.f32.gmra.mxu3 %v3840_v38  ;;  %1469 = vmatmul.f32.gmra.mxu0 %v3840_v38 }
 0x54d   :  { %1807 = vmatpush.msrb.mxu3 %v3894_v36  ;;  %1824 = vmatpush.msrb.mxu0 %v3992_v62 }
 0x54e   :  { %1604 = vmatpush.msrb.mxu2 %v4009_v10  ;;  %1715 = vmatpush.msrb.mxu1 %v4009_v10 }
 0x54f   :  { %1808 = vmatpush.msrb.mxu3 %v3899_v44  ;;  %1825 = vmatpush.msrb.mxu0 %v3997_v46 }
 0x550   :  { %1605 = vmatpush.msrb.mxu2 %v4013_v8  ;;  %1716 = vmatpush.msrb.mxu1 %v4013_v8 }
 0x551   :  { %1809 = vmatpush.msrb.mxu3 %v3904_v33  ;;  %1826 = vmatpush.msrb.mxu0 %v4009_v10 }
 0x552   :  { %1606 = vmatpush.msrb.mxu2 %v4018_v11  ;;  %1717 = vmatpush.msrb.mxu1 %v4018_v11 }
 0x553   :  { %1810 = vmatpush.msrb.mxu3 %v3910_v43  ;;  %1827 = vmatpush.msrb.mxu0 %v4013_v8 }
 0x554   :  { %1607 = vmatpush.msrb.mxu2 %v4025_v54  ;;  %1718 = vmatpush.msrb.mxu1 %v4025_v54 }
 0x555   :  { %1811 = vmatpush.msrb.mxu3 %v3917_v53  ;;  %1828 = vmatpush.msrb.mxu0 %v4018_v11 }
 0x556   :  { %1608 = vmatpush.msrb.mxu2 %v4032_v37  ;;  %1719 = vmatpush.msrb.mxu1 %v4032_v37 }
 0x557   :  { %1812 = vmatpush.msrb.mxu3 %v3922_v56  ;;  %1829 = vmatpush.msrb.mxu0 %v4025_v54 }
 0x559   :  { %1830 = vmatpush.msrb.mxu0 %v4032_v37 }
 0x590   :  { %v1216_v57 = vpop.f32.mrf.mxu0 }
 0x591   :  { %v1240_v61 = vadd.f32 %v1216_v57, %v260_v55  ;;  %v4037_v55 = vld [vmem:[#allocation9 + $0x28] sm:$0xff]  ;;  %v4039_v57 = vld [vmem:[#allocation9 + $0x10] sm:$0xff] }
 0x592   :  { %4700 = vst [vmem:[#allocation32_spill] sm:$0xff] %v4037_v55  ;;  %1609 = vmatpush.msrb.mxu2 %v4037_v55  ;;  %1720 = vmatpush.msrb.mxu1 %v4037_v55 }
 0x593   :  { %v2503_v35 = vmul.f32 -1.442695, %v1240_v61  ;;  %4701 = vst [vmem:[#allocation22_spill] sm:$0xff] %v4039_v57  ;;  %1831 = vmatpush.msrb.mxu0 %v4037_v55 }
 0x594   :  { %1610 = vmatpush.msrb.mxu2 %v4039_v57  ;;  %1721 = vmatpush.msrb.mxu1 %v4039_v57 }
 0x595   :  { %2603 = vpow2.f32 %v2503_v35  ;;  %1832 = vmatpush.msrb.mxu0 %v4039_v57 }
 0x596   :  { %v1196_v3 = vpop.f32.mrf.mxu3  ;;  %1777 = vmatpush.msra.mxu2 %v3786_v39  ;;  %1888 = vmatpush.msra.mxu1 %v3786_v39 }
 0x597   :  { %v1239_v1 = vadd.f32 %v1196_v3, %v4697_v9 }
 0x598   :  { %1778 = vmatpush.msra.mxu2 %v3789_v50  ;;  %1889 = vmatpush.msra.mxu1 %v3789_v50 }
 0x599   :  { %v2502_v14 = vmul.f32 -1.442695, %v1239_v1 }
 0x59a   :  { %1779 = vmatpush.msra.mxu2 %v3792_v5  ;;  %1890 = vmatpush.msra.mxu1 %v3792_v5 }
 0x59b   :  { %v2604_v41 = vpop.eup %2603  ;;  %2605 = vpow2.f32 %v2502_v14 }
 0x59c   :  { %v4003_v7 = vadd.f32 1.0, %v2604_v41  ;;  %v1236_v41 = vpop.f32.mrf.mxu1  ;;  %1780 = vmatpush.msra.mxu2 %v3795_v15  ;;  %1891 = vmatpush.msra.mxu1 %v3795_v15 }
 0x59d   :  { %v1279_v57 = vadd.f32 %v3770_v63, %v1236_v41 }
 0x59e   :  { %2607 = vrcp.f32 %v4003_v7  ;;  %vm1269_vm13 = vweird.f32 %v4003_v7  ;;  %v1273_v63 = vand.u32 2147483647, %v4003_v7  ;;  %1781 = vmatpush.msra.mxu2 %v3798_v51  ;;  %1892 = vmatpush.msra.mxu1 %v3798_v51 }
 0x5a0   :  { %1782 = vmatpush.msra.mxu2 %v3801_v12  ;;  %1893 = vmatpush.msra.mxu1 %v3801_v12  ;;  %vm1274_vm15 = vcmp.eq.f32.partialorder %v1273_v63, 8.507059e+37 }
 0x5a1   :  { %v2606_v4 = vpop.eup %2605 }
 0x5a2   :  { %v1247_v59 = vadd.f32 1.0, %v2606_v4  ;;  %1783 = vmatpush.msra.mxu2 %v3804_v32  ;;  %1894 = vmatpush.msra.mxu1 %v3804_v32 }
 0x5a4   :  { %2609 = vrcp.f32 %v1247_v59  ;;  %v4021_v2 = vpop.eup %2607  ;;  %v1260_v9 = vand.u32 2147483648, %v1247_v59  ;;  %v1258_v14 = vand.u32 2147483647, %v1247_v59  ;;  %vm1254_vm9 = vweird.f32 %v1247_v59  ;;  %1784 = vmatpush.msra.mxu2 %v3807_v48  ;;  %1895 = vmatpush.msra.mxu1 %v3807_v48 }
 0x5a5   :  { %v1265_v16 = vmul.f32 %v4021_v2, %v4003_v7  ;;  %vm1270_vm12 = vweird.f32 %v4021_v2 }
 0x5a6   :  { %vm1259_vm11 = vcmp.eq.f32.partialorder %v1258_v14, 8.507059e+37  ;;  %vm1271_vm14 = vmor %vm1269_vm13, %vm1270_vm12  ;;  %1785 = vmatpush.msra.mxu2 %v3812_v60  ;;  %1896 = vmatpush.msra.mxu1 %v3812_v60 }
 0x5a7   :  { %v1266_v35 = vsub.f32 1.0, %v1265_v16 }
 0x5a8   :  { %1786 = vmatpush.msra.mxu2 %v3816_v22  ;;  %1897 = vmatpush.msra.mxu1 %v3816_v22 }
 0x5a9   :  { %v1267_v4 = vmul.f32 %v4021_v2, %v1266_v35  ;;  %v4703_v35 = vld [vmem:[#allocation21_spill] sm:$0xff] }
 0x5aa   :  { %v2610_v31 = vpop.eup %2609  ;;  %1787 = vmatpush.msra.mxu2 %v3819_v6  ;;  %1898 = vmatpush.msra.mxu1 %v3819_v6 }
 0x5ab   :  { %v1250_v61 = vmul.f32 %v2610_v31, %v1247_v59  ;;  %vm1255_vm8 = vweird.f32 %v2610_v31  ;;  %v1268_v37 = vadd.f32 %v4021_v2, %v1267_v4  ;;  %v4702_v59 = vld [vmem:[#allocation33_spill] sm:$0xff]  ;;  %v1345_v4 = vld [vmem:[%s4569_s7] sm:$0x7] }
 0x5ac   :  { %vm1256_vm10 = vmor %vm1254_vm9, %vm1255_vm8  ;;  %1788 = vmatpush.msra.mxu2 %v3822_v19  ;;  %1899 = vmatpush.msra.mxu1 %v3822_v19 }
 0x5ad   :  { %v1251_v3 = vsub.f32 1.0, %v1250_v61  ;;  %v1261_v61 = vor.u32 1.1754944e-38, %v1260_v9  ;;  %v1275_v9 = vand.u32 2147483648, %v4003_v7  ;;  %v1272_v14 = vsel %vm1271_vm14, %v4021_v2, %v1268_v37 }
 0x5ae   :  { %1789 = vmatpush.msra.mxu2 %v3825_v18  ;;  %1900 = vmatpush.msra.mxu1 %v3825_v18 }
 0x5af   :  { %v1252_v1 = vmul.f32 %v2610_v31, %v1251_v3  ;;  %v1276_v41 = vor.u32 1.1754944e-38, %v1275_v9  ;;  %v1411_v9 = vpop.f32.mrf.mxu3 }
 0x5b0   :  { %1790 = vmatpush.msra.mxu2 %v3828_v24  ;;  %1901 = vmatpush.msra.mxu1 %v3828_v24 }
 0x5b1   :  { %v1253_v16 = vadd.f32 %v2610_v31, %v1252_v1  ;;  %v301_v1 = vadd.f32 %v4703_v35, %v4702_v59 }
 0x5b2   :  { %1791 = vmatpush.msra.mxu2 %v3831_v17  ;;  %1902 = vmatpush.msra.mxu1 %v3831_v17 }
 0x5b3   :  { %v1257_v3 = vsel %vm1256_vm10, %v2610_v31, %v1253_v16 }
 0x5b4   :  { %v1262_v55 = vsel %vm1259_vm11, %v1261_v61, %v1257_v3  ;;  %1792 = vmatpush.msra.mxu2 %v3833_v25  ;;  %1903 = vmatpush.msra.mxu1 %v3833_v25  ;;  %v4115_v61 = vperm.slane %v1345_v4, 0  ;;  %v1572_v3 = vpop.f32.mrf.mxu1 }
 0x5b5   :  { %v1280_v54 = vmul.f32 %v1279_v57, %v1262_v55  ;;  %v1277_v55 = vsel %vm1274_vm15, %v1276_v41, %v1272_v14 }
 0x5b6   :  { %v1283_v7 = vsub.f32 1.0, %v1277_v55  ;;  %v1285_v37 = vmul.f32 %v1277_v55, %v3840_v38  ;;  %v1370_v38 = vpop.f32.mrf.mxu2  ;;  %4706 = vst [vmem:[#allocation17_spill] sm:$0xff] %v4115_v61 }
 0x5b7   :  { %v1281_v31 = vadd.f32 %v1280_v54, %v301_v1  ;;  %v1371_v59 = vadd.f32 %v1370_v38, %v4115_v61  ;;  %v4118_v1 = vperm.slane %v1345_v4, 1 }
 0x5b9   :  { %2611 = vtanh.f32 %v1281_v31  ;;  %v1615_v35 = vadd.f32 %v1572_v3, %v1371_v59  ;;  %4707 = vst [vmem:[#allocation27_spill] sm:$0xff] %v4118_v1  ;;  %v1412_v41 = vadd.f32 %v1411_v9, %v4118_v1 }
 0x5bb   :  { %v2504_v31 = vmul.f32 -1.442695, %v1615_v35 }
 0x5bc   :  { %v1592_v14 = vpop.f32.mrf.mxu1 }
 0x5bd   :  { %v1616_v55 = vadd.f32 %v1592_v14, %v1412_v41  ;;  %2613 = vpow2.f32 %v2504_v31 }
 0x5bf   :  { %v2612_v2 = vpop.eup %2611 }
 0x5c0   :  { %v1284_v54 = vmul.f32 %v2612_v2, %v1283_v7  ;;  %v2505_v7 = vmul.f32 -1.442695, %v1616_v55 }
 0x5c2   :  { %v1286_v57 = vadd.f32 %v1285_v37, %v1284_v54  ;;  %2615 = vpow2.f32 %v2505_v7 }
 0x5c3   :  { %v2614_v54 = vpop.eup %2613 }
 0x5c4   :  { %1390 = vmatmul.f32.gmra.mxu2 %v1286_v57  ;;  %1431 = vmatmul.f32.gmra.mxu3 %v1286_v57  ;;  %v1623_v37 = vadd.f32 1.0, %v2614_v54  ;;  %v4134_v54 = vld [vmem:[%s4570_s8] ss:$0 sm:$0xff] }
 0x5c5   :  { %1472 = vmatmul.f32.gmra.mxu0 %v1286_v57 }
 0x5c6   :  { %2617 = vrcp.f32 %v1623_v37  ;;  %v1636_v7 = vand.u32 2147483648, %v1623_v37  ;;  %vm1630_vm1 = vweird.f32 %v1623_v37 }
 0x5c8   :  { %v2616_v57 = vpop.eup %2615  ;;  %v1637_v61 = vor.u32 1.1754944e-38, %v1636_v7 }
 0x5c9   :  { %v1624_v3 = vadd.f32 1.0, %v2616_v57  ;;  %v1634_v57 = vand.u32 2147483647, %v1623_v37 }
 0x5cb   :  { %2619 = vrcp.f32 %v1624_v3  ;;  %vm1635_vm3 = vcmp.eq.f32.partialorder %v1634_v57, 8.507059e+37  ;;  %v1651_v25 = vand.u32 2147483648, %v1624_v3  ;;  %vm1645_vm5 = vweird.f32 %v1624_v3 }
 0x5cc   :  { %1611 = vmatmul.f32.vlgmr.msrb.gmra.mxu2 %v4693_v34  ;;  %v4108_v34 = vpop.f32.mrf.mxu2  ;;  %v2618_v59 = vpop.eup %2617 }
 0x5cd   :  { %1908 = vmatpush.msrb.mxu2 %v3842_v20  ;;  %4704 = vst [vmem:[#allocation38_spill] sm:$0xff] %v4108_v34  ;;  %vm1631_vm0 = vweird.f32 %v2618_v59  ;;  %v1452_v34 = vpop.f32.mrf.mxu0 }
 0x5ce   :  { %vm1632_vm2 = vmor %vm1630_vm1, %vm1631_vm0 }
 0x5cf   :  { %1909 = vmatpush.msrb.mxu2 %v3848_v45 }
 0x5d1   :  { %1910 = vmatpush.msrb.mxu2 %v3852_v23 }
 0x5d3   :  { %1911 = vmatpush.msrb.mxu2 %v3857_v27 }
 0x5d4   :  { %v4113_v16 = vpop.f32.mrf.mxu2 }
 0x5d5   :  { %1912 = vmatpush.msrb.mxu2 %v3862_v40  ;;  %4705 = vst [vmem:[#allocation26_spill] sm:$0xff] %v4113_v16  ;;  %v2620_v16 = vpop.eup %2619 }
 0x5d6   :  { %v1641_v14 = vmul.f32 %v2620_v16, %v1624_v3  ;;  %vm1646_vm4 = vweird.f32 %v2620_v16 }
 0x5d7   :  { %1913 = vmatpush.msrb.mxu2 %v3869_v47  ;;  %vm1647_vm6 = vmor %vm1645_vm5, %vm1646_vm4 }
 0x5d8   :  { %v1642_v55 = vsub.f32 1.0, %v1641_v14 }
 0x5d9   :  { %1914 = vmatpush.msrb.mxu2 %v3873_v58 }
 0x5db   :  { %1915 = vmatpush.msrb.mxu2 %v3878_v13 }
 0x5dc   :  { %v4120_v63 = vpop.f32.mrf.mxu2 }
 0x5dd   :  { %1916 = vmatpush.msrb.mxu2 %v3883_v29  ;;  %4708 = vst [vmem:[#allocation34_spill] sm:$0xff] %v4120_v63  ;;  %v1626_v63 = vmul.f32 %v2618_v59, %v1623_v37  ;;  %v1649_v37 = vand.u32 2147483647, %v1624_v3 }
 0x5df   :  { %1917 = vmatpush.msrb.mxu2 %v3889_v28  ;;  %v1627_v9 = vsub.f32 1.0, %v1626_v63  ;;  %vm1650_vm7 = vcmp.eq.f32.partialorder %v1649_v37, 8.507059e+37  ;;  %v4729_v37 = vld [vmem:[#allocation38_spill] sm:$0xff] }
 0x5e1   :  { %1918 = vmatpush.msrb.mxu2 %v3894_v36  ;;  %v1628_v31 = vmul.f32 %v2618_v59, %v1627_v9 }
 0x5e3   :  { %1919 = vmatpush.msrb.mxu2 %v3899_v44 }
 0x5e4   :  { %v4123_v2 = vpop.f32.mrf.mxu2 }
 0x5e5   :  { %1920 = vmatpush.msrb.mxu2 %v3904_v33  ;;  %4709 = vst [vmem:[#allocation28_spill] sm:$0xff] %v4123_v2  ;;  %v1629_v2 = vadd.f32 %v2618_v59, %v1628_v31 }
 0x5e7   :  { %1921 = vmatpush.msrb.mxu2 %v3910_v43  ;;  %v1633_v63 = vsel %vm1632_vm2, %v2618_v59, %v1629_v2  ;;  %v1652_v2 = vor.u32 1.1754944e-38, %v1651_v25 }
 0x5e8   :  { %v1638_v31 = vsel %vm1635_vm3, %v1637_v61, %v1633_v63 }
 0x5e9   :  { %1922 = vmatpush.msrb.mxu2 %v3917_v53 }
 0x5eb   :  { %1923 = vmatpush.msrb.mxu2 %v3922_v56 }
 0x5ec   :  { %v4125_v38 = vpop.f32.mrf.mxu2 }
 0x5ed   :  { %4710 = vst [vmem:[#allocation19_spill] sm:$0xff] %v4125_v38  ;;  %v1643_v38 = vmul.f32 %v2620_v16, %v1642_v55 }
 0x5f4   :  { %v4127_v35 = vpop.f32.mrf.mxu2 }
 0x5f5   :  { %4711 = vst [vmem:[#allocation36_spill] sm:$0xff] %v4127_v35  ;;  %v4136_v35 = vperm.slane %v1345_v4, 2 }
 0x5f7   :  { %v1453_v1 = vadd.f32 %v1452_v34, %v4136_v35 }
 0x647   :  { %v4129_v41 = vpop.f32.mrf.mxu2 }
 0x648   :  { %4712 = vst [vmem:[#allocation35_spill] sm:$0xff] %v4129_v41  ;;  %v1644_v41 = vadd.f32 %v2620_v16, %v1643_v38  ;;  %v4727_v38 = vld [vmem:[#allocation27_spill] sm:$0xff] }
 0x64a   :  { %v1648_v4 = vsel %vm1647_vm6, %v2620_v16, %v1644_v41 }
 0x64b   :  { %v1653_v59 = vsel %vm1650_vm7, %v1652_v2, %v1648_v4 }
 0x64c   :  { %v1659_v7 = vsub.f32 1.0, %v1653_v59 }
 0x64f   :  { %v1612_v9 = vpop.f32.mrf.mxu2 }
 0x650   :  { %v1655_v14 = vadd.f32 %v4134_v54, %v1612_v9  ;;  %v1661_v9 = vmul.f32 0.0, %v1653_v59 }
 0x652   :  { %v1656_v56 = vmul.f32 %v1655_v14, %v1638_v31  ;;  %v4728_v31 = vld [vmem:[#allocation17_spill] sm:$0xff] }
 0x654   :  { %v1657_v55 = vadd.f32 %v1656_v56, %v1453_v1 }
 0x656   :  { %2621 = vtanh.f32 %v1657_v55  ;;  %v1374_v55 = vadd.f32 %v4729_v37, %v4728_v31 }
 0x65c   :  { %v2622_v57 = vpop.eup %2621 }
 0x65d   :  { %v1660_v53 = vmul.f32 %v2622_v57, %v1659_v7 }
 0x65f   :  { %v4140_v61 = vadd.f32 %v1661_v9, %v1660_v53 }
 0x661   :  { %1682 = vmatmul.f32.vlgmr.msra.gmra.mxu3 %v4140_v61  ;;  %1702 = vmatmul.f32.vlgmr.msra.gmra.mxu0 %v4140_v61 }
 0x662   :  { %1722 = vmatmul.f32.vlgmr.msrb.gmra.mxu1 %v4140_v61  ;;  %1928 = vmatpush.msra.mxu3 %v3912_v52 }
 0x663   :  { %1999 = vmatpush.msra.mxu0 %v3786_v39  ;;  %2019 = vmatpush.msrb.mxu1 %v3842_v20  ;;  %v4713_v39 = vld [vmem:[#allocation24_spill] sm:$0xff] }
 0x664   :  { %1929 = vmatpush.msra.mxu3 %v3963_v26 }
 0x665   :  { %2000 = vmatpush.msra.mxu0 %v3789_v50  ;;  %2020 = vmatpush.msrb.mxu1 %v3848_v45  ;;  %v4714_v50 = vld [vmem:[#allocation23_spill] sm:$0xff] }
 0x666   :  { %1930 = vmatpush.msra.mxu3 %v3965_v21 }
 0x667   :  { %2001 = vmatpush.msra.mxu0 %v3792_v5  ;;  %2021 = vmatpush.msrb.mxu1 %v3852_v23  ;;  %v4715_v5 = vld [vmem:[#allocation32_spill] sm:$0xff] }
 0x668   :  { %1931 = vmatpush.msra.mxu3 %v3975_v0 }
 0x669   :  { %2002 = vmatpush.msra.mxu0 %v3795_v15  ;;  %2022 = vmatpush.msrb.mxu1 %v3857_v27  ;;  %v4716_v15 = vld [vmem:[#allocation20_spill] sm:$0xff] }
 0x66a   :  { %1932 = vmatpush.msra.mxu3 %v3977_v30 }
 0x66b   :  { %2003 = vmatpush.msra.mxu0 %v3798_v51  ;;  %2023 = vmatpush.msrb.mxu1 %v3862_v40  ;;  %v4717_v51 = vld [vmem:[#allocation22_spill] sm:$0xff] }
 0x66c   :  { %1933 = vmatpush.msra.mxu3 %v3981_v42 }
 0x66d   :  { %2004 = vmatpush.msra.mxu0 %v3801_v12  ;;  %2024 = vmatpush.msrb.mxu1 %v3869_v47  ;;  %v4718_v12 = vld [vmem:[#allocation25_spill] sm:$0xff] }
 0x66e   :  { %1934 = vmatpush.msra.mxu3 %v3986_v49 }
 0x66f   :  { %2005 = vmatpush.msra.mxu0 %v3804_v32  ;;  %2025 = vmatpush.msrb.mxu1 %v3873_v58  ;;  %v4719_v32 = vld [vmem:[#allocation30_spill] sm:$0xff] }
 0x670   :  { %1935 = vmatpush.msra.mxu3 %v3992_v62 }
 0x671   :  { %2006 = vmatpush.msra.mxu0 %v3807_v48  ;;  %2026 = vmatpush.msrb.mxu1 %v3878_v13  ;;  %v1455_v48 = vpop.f32.mrf.mxu0 }
 0x672   :  { %1936 = vmatpush.msra.mxu3 %v3997_v46 }
 0x673   :  { %2007 = vmatpush.msra.mxu0 %v3812_v60  ;;  %2027 = vmatpush.msrb.mxu1 %v3883_v29  ;;  %v1414_v60 = vpop.f32.mrf.mxu3 }
 0x674   :  { %1937 = vmatpush.msra.mxu3 %v4009_v10  ;;  %v1415_v3 = vadd.f32 %v1414_v60, %v4727_v38 }
 0x675   :  { %2008 = vmatpush.msra.mxu0 %v3816_v22  ;;  %2028 = vmatpush.msrb.mxu1 %v3889_v28 }
 0x676   :  { %1938 = vmatpush.msra.mxu3 %v4013_v8 }
 0x677   :  { %2009 = vmatpush.msra.mxu0 %v3819_v6  ;;  %2029 = vmatpush.msrb.mxu1 %v3894_v36 }
 0x678   :  { %1939 = vmatpush.msra.mxu3 %v4018_v11 }
 0x679   :  { %2010 = vmatpush.msra.mxu0 %v3822_v19  ;;  %2030 = vmatpush.msrb.mxu1 %v3899_v44  ;;  %v4193_v22 = vpop.f32.mrf.mxu0 }
 0x67a   :  { %1940 = vmatpush.msra.mxu3 %v4713_v39 }
 0x67b   :  { %2011 = vmatpush.msra.mxu0 %v3825_v18  ;;  %2031 = vmatpush.msrb.mxu1 %v3904_v33  ;;  %v4195_v6 = vpop.f32.mrf.mxu3 }
 0x67c   :  { %1941 = vmatpush.msra.mxu3 %v4714_v50 }
 0x67d   :  { %2012 = vmatpush.msra.mxu0 %v3828_v24  ;;  %2032 = vmatpush.msrb.mxu1 %v3910_v43 }
 0x67e   :  { %1942 = vmatpush.msra.mxu3 %v4715_v5 }
 0x67f   :  { %2013 = vmatpush.msra.mxu0 %v3831_v17  ;;  %2033 = vmatpush.msrb.mxu1 %v4716_v15 }
 0x680   :  { %1943 = vmatpush.msra.mxu3 %v4717_v51 }
 0x681   :  { %2014 = vmatpush.msra.mxu0 %v4718_v12  ;;  %2034 = vmatpush.msrb.mxu1 %v4719_v32  ;;  %v4197_v19 = vpop.f32.mrf.mxu0 }
 0x683   :  { %v4199_v18 = vpop.f32.mrf.mxu3 }
 0x689   :  { %v4201_v24 = vpop.f32.mrf.mxu0 }
 0x68a   :  { %4720 = vst [vmem:[#allocation16_spill] sm:$0xff] %v4201_v24 }
 0x68b   :  { %v4203_v17 = vpop.f32.mrf.mxu3 }
 0x691   :  { %v4205_v25 = vpop.f32.mrf.mxu0 }
 0x692   :  { %4721 = vst [vmem:[#allocation15_spill] sm:$0xff] %v4205_v25 }
 0x693   :  { %v4207_v53 = vpop.f32.mrf.mxu3 }
 0x694   :  { %4722 = vst [vmem:[#allocation29_spill] sm:$0xff] %v4207_v53 }
 0x699   :  { %v4209_v56 = vpop.f32.mrf.mxu0 }
 0x69a   :  { %4723 = vst [vmem:[#allocation37_spill] sm:$0xff] %v4209_v56 }
 0x69b   :  { %v4211_v34 = vpop.f32.mrf.mxu3 }
 0x69c   :  { %4724 = vst [vmem:[#allocation18_spill] sm:$0xff] %v4211_v34 }
 0x6a1   :  { %v4213_v16 = vpop.f32.mrf.mxu0 }
 0x6a2   :  { %4725 = vst [vmem:[#allocation31_spill] sm:$0xff] %v4213_v16 }
 0x6a3   :  { %v4215_v1 = vpop.f32.mrf.mxu3 }
 0x6a4   :  { %4726 = vst [vmem:[#allocation33_spill] sm:$0xff] %v4215_v1 }
 0x6de   :  { %v1703_v41 = vpop.f32.mrf.mxu0 }
 0x6df   :  { %v1727_v63 = vadd.f32 %v1703_v41, %v1415_v3 }
 0x6e1   :  { %v2507_v14 = vmul.f32 -1.442695, %v1727_v63 }
 0x6e3   :  { %2623 = vpow2.f32 %v2507_v14 }
 0x6e4   :  { %v1683_v4 = vpop.f32.mrf.mxu3 }
 0x6e5   :  { %v1726_v2 = vadd.f32 %v1683_v4, %v1374_v55  ;;  %v1723_v55 = vpop.f32.mrf.mxu1 }
 0x6e7   :  { %v2506_v59 = vmul.f32 -1.442695, %v1726_v2 }
 0x6e9   :  { %v2624_v7 = vpop.eup %2623  ;;  %2625 = vpow2.f32 %v2506_v59  ;;  %v1766_v59 = vadd.f32 %v4134_v54, %v1723_v55 }
 0x6ea   :  { %v1735_v57 = vadd.f32 1.0, %v2624_v7 }
 0x6ec   :  { %2627 = vrcp.f32 %v1735_v57  ;;  %vm1756_vm13 = vweird.f32 %v1735_v57 }
 0x6ef   :  { %v2626_v9 = vpop.eup %2625 }
 0x6f0   :  { %v1734_v12 = vadd.f32 1.0, %v2626_v9 }
 0x6f2   :  { %2629 = vrcp.f32 %v1734_v12  ;;  %v2628_v16 = vpop.eup %2627  ;;  %v1747_v63 = vand.u32 2147483648, %v1734_v12  ;;  %v1745_v14 = vand.u32 2147483647, %v1734_v12  ;;  %vm1741_vm9 = vweird.f32 %v1734_v12 }
 0x6f3   :  { %v1752_v1 = vmul.f32 %v2628_v16, %v1735_v57  ;;  %vm1757_vm12 = vweird.f32 %v2628_v16 }
 0x6f4   :  { %v1748_v2 = vor.u32 1.1754944e-38, %v1747_v63  ;;  %vm1746_vm11 = vcmp.eq.f32.partialorder %v1745_v14, 8.507059e+37  ;;  %vm1758_vm14 = vmor %vm1756_vm13, %vm1757_vm12 }
 0x6f5   :  { %v1753_v3 = vsub.f32 1.0, %v1752_v1  ;;  %v1456_v1 = vadd.f32 %v1455_v48, %v4136_v35  ;;  %v4229_v48 = vld [vmem:[#allocation9 + $0x168] sm:$0xff] }
 0x6f7   :  { %v1754_v37 = vmul.f32 %v2628_v16, %v1753_v3 }
 0x6f8   :  { %v2630_v60 = vpop.eup %2629 }
 0x6f9   :  { %v1737_v56 = vmul.f32 %v2630_v60, %v1734_v12  ;;  %vm1742_vm8 = vweird.f32 %v2630_v60  ;;  %v1755_v25 = vadd.f32 %v2628_v16, %v1754_v37 }
 0x6fa   :  { %vm1743_vm10 = vmor %vm1741_vm9, %vm1742_vm8 }
 0x6fb   :  { %v1738_v41 = vsub.f32 1.0, %v1737_v56  ;;  %v1762_v56 = vand.u32 2147483648, %v1735_v57  ;;  %v1759_v24 = vsel %vm1758_vm14, %v2628_v16, %v1755_v25 }
 0x6fd   :  { %v1739_v34 = vmul.f32 %v2630_v60, %v1738_v41  ;;  %v1760_v41 = vand.u32 2147483647, %v1735_v57 }
 0x6ff   :  { %v1740_v4 = vadd.f32 %v2630_v60, %v1739_v34  ;;  %v1763_v34 = vor.u32 1.1754944e-38, %v1762_v56  ;;  %vm1761_vm15 = vcmp.eq.f32.partialorder %v1760_v41, 8.507059e+37 }
 0x701   :  { %v1744_v7 = vsel %vm1743_vm10, %v2630_v60, %v1740_v4  ;;  %v1764_v12 = vsel %vm1761_vm15, %v1763_v34, %v1759_v24  ;;  %v4234_v24 = vld [vmem:[#allocation9 + $0x150] sm:$0xff] }
 0x702   :  { %v1749_v9 = vsel %vm1746_vm11, %v1748_v2, %v1744_v7  ;;  %v1770_v63 = vsub.f32 1.0, %v1764_v12  ;;  %v1772_v14 = vmul.f32 %v1764_v12, %v4140_v61  ;;  %v4239_v61 = vld [vmem:[#allocation9 + $0x138] sm:$0xff] }
 0x703   :  { %v1767_v53 = vmul.f32 %v1766_v59, %v1749_v9 }
 0x705   :  { %v1768_v3 = vadd.f32 %v1767_v53, %v1456_v1 }
 0x707   :  { %2631 = vtanh.f32 %v1768_v3 }
 0x70d   :  { %v2632_v55 = vpop.eup %2631 }
 0x70e   :  { %v1771_v60 = vmul.f32 %v2632_v55, %v1770_v63 }
 0x710   :  { %v4223_v37 = vadd.f32 %v1772_v14, %v1771_v60 }
 0x712   :  { %1793 = vmatmul.f32.vlgmr.msra.gmra.mxu2 %v4223_v37  ;;  %1813 = vmatmul.f32.vlgmr.msrb.gmra.mxu3 %v4223_v37 }
 0x713   :  { %1833 = vmatmul.f32.vlgmr.msrb.gmra.mxu0 %v4223_v37  ;;  %2039 = vmatpush.msra.mxu2 %v3912_v52  ;;  %v4244_v52 = vld [vmem:[#allocation9 + $0x120] sm:$0xff] }
 0x714   :  { %2110 = vmatpush.msrb.mxu3 %v4229_v48  ;;  %2130 = vmatpush.msrb.mxu0 %v3842_v20  ;;  %v4249_v20 = vld [vmem:[#allocation9 + $0x108] sm:$0xff] }
 0x715   :  { %2040 = vmatpush.msra.mxu2 %v3963_v26 }
 0x716   :  { %2111 = vmatpush.msrb.mxu3 %v4234_v24  ;;  %2131 = vmatpush.msrb.mxu0 %v3848_v45  ;;  %v4254_v45 = vld [vmem:[#allocation9 + $0xf0] sm:$0xff] }
 0x717   :  { %2041 = vmatpush.msra.mxu2 %v3965_v21 }
 0x718   :  { %2112 = vmatpush.msrb.mxu3 %v4239_v61  ;;  %2132 = vmatpush.msrb.mxu0 %v3852_v23  ;;  %v4259_v23 = vld [vmem:[#allocation9 + $0xd8] sm:$0xff] }
 0x719   :  { %2042 = vmatpush.msra.mxu2 %v3975_v0 }
 0x71a   :  { %2113 = vmatpush.msrb.mxu3 %v4244_v52  ;;  %2133 = vmatpush.msrb.mxu0 %v3857_v27  ;;  %v4264_v27 = vld [vmem:[#allocation9 + $0xc0] sm:$0xff] }
 0x71b   :  { %2043 = vmatpush.msra.mxu2 %v3977_v30 }
 0x71c   :  { %2114 = vmatpush.msrb.mxu3 %v4249_v20  ;;  %2134 = vmatpush.msrb.mxu0 %v3862_v40  ;;  %v4269_v40 = vld [vmem:[#allocation9 + $0xa8] sm:$0xff] }
 0x71d   :  { %2044 = vmatpush.msra.mxu2 %v3981_v42 }
 0x71e   :  { %2115 = vmatpush.msrb.mxu3 %v4254_v45  ;;  %2135 = vmatpush.msrb.mxu0 %v3869_v47  ;;  %v4274_v47 = vld [vmem:[#allocation9 + $0x90] sm:$0xff] }
 0x71f   :  { %2045 = vmatpush.msra.mxu2 %v3986_v49 }
 0x720   :  { %2116 = vmatpush.msrb.mxu3 %v4259_v23  ;;  %2136 = vmatpush.msrb.mxu0 %v3873_v58  ;;  %v4279_v58 = vld [vmem:[#allocation9 + $0x78] sm:$0xff] }
 0x721   :  { %2046 = vmatpush.msra.mxu2 %v3992_v62 }
 0x722   :  { %2117 = vmatpush.msrb.mxu3 %v4264_v27  ;;  %2137 = vmatpush.msrb.mxu0 %v3878_v13  ;;  %v4284_v13 = vld [vmem:[#allocation9 + $0x60] sm:$0xff] }
 0x723   :  { %2047 = vmatpush.msra.mxu2 %v3997_v46 }
 0x724   :  { %2118 = vmatpush.msrb.mxu3 %v4269_v40  ;;  %2138 = vmatpush.msrb.mxu0 %v3883_v29  ;;  %v4289_v29 = vld [vmem:[#allocation9 + $0x48] sm:$0xff] }
 0x725   :  { %2048 = vmatpush.msra.mxu2 %v4009_v10 }
 0x726   :  { %2119 = vmatpush.msrb.mxu3 %v4274_v47  ;;  %2139 = vmatpush.msrb.mxu0 %v3889_v28  ;;  %v4294_v28 = vld [vmem:[#allocation9 + $0x30] sm:$0xff] }
 0x727   :  { %2049 = vmatpush.msra.mxu2 %v4013_v8 }
 0x728   :  { %2120 = vmatpush.msrb.mxu3 %v4279_v58  ;;  %2140 = vmatpush.msrb.mxu0 %v3894_v36  ;;  %v4299_v36 = vld [vmem:[#allocation9 + $0x18] sm:$0xff] }
 0x729   :  { %2050 = vmatpush.msra.mxu2 %v4018_v11 }
 0x72a   :  { %2121 = vmatpush.msrb.mxu3 %v4284_v13  ;;  %2141 = vmatpush.msrb.mxu0 %v3899_v44  ;;  %v4304_v44 = vld [vmem:[#allocation9] sm:$0xff] }
 0x72b   :  { %2051 = vmatpush.msra.mxu2 %v4713_v39 }
 0x72c   :  { %2122 = vmatpush.msrb.mxu3 %v4289_v29  ;;  %2142 = vmatpush.msrb.mxu0 %v3904_v33  ;;  %v4730_v33 = vld [vmem:[#allocation26_spill] sm:$0xff] }
 0x72d   :  { %2052 = vmatpush.msra.mxu2 %v4714_v50  ;;  %v1377_v25 = vadd.f32 %v4730_v33, %v4728_v31 }
 0x72e   :  { %2123 = vmatpush.msrb.mxu3 %v4294_v28  ;;  %2143 = vmatpush.msrb.mxu0 %v3910_v43  ;;  %v1418_v43 = vadd.f32 %v4195_v6, %v4727_v38 }
 0x72f   :  { %2053 = vmatpush.msra.mxu2 %v4715_v5 }
 0x730   :  { %2124 = vmatpush.msrb.mxu3 %v4299_v36  ;;  %2144 = vmatpush.msrb.mxu0 %v4716_v15 }
 0x731   :  { %2054 = vmatpush.msra.mxu2 %v4717_v51 }
 0x732   :  { %2125 = vmatpush.msrb.mxu3 %v4304_v44  ;;  %2145 = vmatpush.msrb.mxu0 %v4719_v32 }
 0x790   :  { %v1834_v60 = vpop.f32.mrf.mxu0 }
 0x795   :  { %v1794_v53 = vpop.f32.mrf.mxu2  ;;  %v1814_v16 = vpop.f32.mrf.mxu3 }
 0x796   :  { %v1837_v57 = vadd.f32 %v1794_v53, %v1377_v25  ;;  %v1838_v4 = vadd.f32 %v1814_v16, %v1418_v43  ;;  %v1877_v43 = vadd.f32 %v4134_v54, %v1834_v60 }
 0x798   :  { %v2508_v2 = vmul.f32 -1.442695, %v1837_v57  ;;  %v2509_v15 = vmul.f32 -1.442695, %v1838_v4  ;;  %v1459_v4 = vadd.f32 %v4193_v22, %v4136_v35  ;;  %v4321_v22 = vld [vmem:[#allocation9 + $0x178] sm:$0xff] }
 0x79a   :  { %2633 = vpow2.f32 %v2508_v2 }
 0x79b   :  { %2635 = vpow2.f32 %v2509_v15 }
 0x7a0   :  { %v2634_v59 = vpop.eup %2633 }
 0x7a1   :  { %v2636_v7 = vpop.eup %2635  ;;  %v1845_v9 = vadd.f32 1.0, %v2634_v59 }
 0x7a2   :  { %v1846_v1 = vadd.f32 1.0, %v2636_v7 }
 0x7a3   :  { %2637 = vrcp.f32 %v1845_v9  ;;  %v1858_v6 = vand.u32 2147483648, %v1845_v9  ;;  %v1856_v55 = vand.u32 2147483647, %v1845_v9  ;;  %vm1852_vm1 = vweird.f32 %v1845_v9 }
 0x7a4   :  { %2639 = vrcp.f32 %v1846_v1  ;;  %v1873_v2 = vand.u32 2147483648, %v1846_v1  ;;  %vm1867_vm5 = vweird.f32 %v1846_v1  ;;  %v1871_v59 = vand.u32 2147483647, %v1846_v1 }
 0x7a5   :  { %v1859_v25 = vor.u32 1.1754944e-38, %v1858_v6  ;;  %vm1857_vm3 = vcmp.eq.f32.partialorder %v1856_v55, 8.507059e+37  ;;  %v4340_v55 = vld [vmem:[#allocation9 + $0x128] sm:$0xff] }
 0x7a6   :  { %vm1872_vm7 = vcmp.eq.f32.partialorder %v1871_v59, 8.507059e+37 }
 0x7a9   :  { %v2638_v32 = vpop.eup %2637 }
 0x7aa   :  { %v2640_v56 = vpop.eup %2639  ;;  %v1848_v41 = vmul.f32 %v2638_v32, %v1845_v9  ;;  %vm1853_vm0 = vweird.f32 %v2638_v32  ;;  %v1874_v9 = vor.u32 1.1754944e-38, %v1873_v2 }
 0x7ab   :  { %v1863_v3 = vmul.f32 %v2640_v56, %v1846_v1  ;;  %vm1854_vm2 = vmor %vm1852_vm1, %vm1853_vm0  ;;  %vm1868_vm4 = vweird.f32 %v2640_v56  ;;  %v4325_v1 = vld [vmem:[#allocation9 + $0x170] sm:$0xff] }
 0x7ac   :  { %v1849_v34 = vsub.f32 1.0, %v1848_v41  ;;  %vm1869_vm6 = vmor %vm1867_vm5, %vm1868_vm4 }
 0x7ad   :  { %v1864_v12 = vsub.f32 1.0, %v1863_v3 }
 0x7ae   :  { %v1850_v63 = vmul.f32 %v2638_v32, %v1849_v34 }
 0x7af   :  { %v1865_v14 = vmul.f32 %v2640_v56, %v1864_v12 }
 0x7b0   :  { %v1851_v33 = vadd.f32 %v2638_v32, %v1850_v63 }
 0x7b1   :  { %v1866_v57 = vadd.f32 %v2640_v56, %v1865_v14 }
 0x7b2   :  { %v1855_v53 = vsel %vm1854_vm2, %v2638_v32, %v1851_v33 }
 0x7b3   :  { %v1860_v16 = vsel %vm1857_vm3, %v1859_v25, %v1855_v53  ;;  %v1870_v41 = vsel %vm1869_vm6, %v2640_v56, %v1866_v57  ;;  %v4335_v56 = vld [vmem:[#allocation9 + $0x140] sm:$0xff]  ;;  %v1421_v25 = vadd.f32 %v4199_v18, %v4727_v38 }
 0x7b4   :  { %v1878_v15 = vmul.f32 %v1877_v43, %v1860_v16  ;;  %v1875_v3 = vsel %vm1872_vm7, %v1874_v9, %v1870_v41 }
 0x7b5   :  { %v1881_v34 = vsub.f32 1.0, %v1875_v3  ;;  %v1883_v12 = vmul.f32 %v1875_v3, %v4223_v37  ;;  %v4330_v37 = vld [vmem:[#allocation9 + $0x158] sm:$0xff] }
 0x7b6   :  { %v1879_v7 = vadd.f32 %v1878_v15, %v1459_v4 }
 0x7b8   :  { %2641 = vtanh.f32 %v1879_v7 }
 0x7be   :  { %v2642_v32 = vpop.eup %2641 }
 0x7bf   :  { %v1882_v6 = vmul.f32 %v2642_v32, %v1881_v34 }
 0x7c1   :  { %v4316_v63 = vadd.f32 %v1883_v12, %v1882_v6 }
 0x7c3   :  { %1904 = vmatmul.f32.vlgmr.msra.gmra.mxu1 %v4316_v63  ;;  %1924 = vmatmul.f32.vlgmr.msrb.gmra.mxu2 %v4316_v63 }
 0x7c4   :  { %1944 = vmatmul.f32.vlgmr.msra.gmra.mxu3 %v4316_v63  ;;  %2150 = vmatpush.msra.mxu1 %v4321_v22 }
 0x7c5   :  { %2221 = vmatpush.msrb.mxu2 %v4229_v48  ;;  %2241 = vmatpush.msra.mxu3 %v4325_v1 }
 0x7c6   :  { %2151 = vmatpush.msra.mxu1 %v3963_v26  ;;  %v4345_v26 = vld [vmem:[#allocation9 + $0x110] sm:$0xff] }
 0x7c7   :  { %2222 = vmatpush.msrb.mxu2 %v4234_v24  ;;  %2242 = vmatpush.msra.mxu3 %v4330_v37 }
 0x7c8   :  { %2152 = vmatpush.msra.mxu1 %v3965_v21  ;;  %v4350_v21 = vld [vmem:[#allocation9 + $0xf8] sm:$0xff] }
 0x7c9   :  { %2223 = vmatpush.msrb.mxu2 %v4239_v61  ;;  %2243 = vmatpush.msra.mxu3 %v4335_v56 }
 0x7ca   :  { %2153 = vmatpush.msra.mxu1 %v3975_v0  ;;  %v4355_v0 = vld [vmem:[#allocation9 + $0xe0] sm:$0xff] }
 0x7cb   :  { %2224 = vmatpush.msrb.mxu2 %v4244_v52  ;;  %2244 = vmatpush.msra.mxu3 %v4340_v55 }
 0x7cc   :  { %2154 = vmatpush.msra.mxu1 %v3977_v30  ;;  %v4360_v30 = vld [vmem:[#allocation9 + $0xc8] sm:$0xff] }
 0x7cd   :  { %2225 = vmatpush.msrb.mxu2 %v4249_v20  ;;  %2245 = vmatpush.msra.mxu3 %v4345_v26 }
 0x7ce   :  { %2155 = vmatpush.msra.mxu1 %v3981_v42  ;;  %v4365_v42 = vld [vmem:[#allocation9 + $0xb0] sm:$0xff] }
 0x7cf   :  { %2226 = vmatpush.msrb.mxu2 %v4254_v45  ;;  %2246 = vmatpush.msra.mxu3 %v4350_v21 }
 0x7d0   :  { %2156 = vmatpush.msra.mxu1 %v3986_v49  ;;  %v4370_v49 = vld [vmem:[#allocation9 + $0x98] sm:$0xff] }
 0x7d1   :  { %2227 = vmatpush.msrb.mxu2 %v4259_v23  ;;  %2247 = vmatpush.msra.mxu3 %v4355_v0 }
 0x7d2   :  { %2157 = vmatpush.msra.mxu1 %v3992_v62  ;;  %v4375_v62 = vld [vmem:[#allocation9 + $0x80] sm:$0xff] }
 0x7d3   :  { %2228 = vmatpush.msrb.mxu2 %v4264_v27  ;;  %2248 = vmatpush.msra.mxu3 %v4360_v30 }
 0x7d4   :  { %2158 = vmatpush.msra.mxu1 %v3997_v46  ;;  %v4380_v46 = vld [vmem:[#allocation9 + $0x68] sm:$0xff] }
 0x7d5   :  { %2229 = vmatpush.msrb.mxu2 %v4269_v40  ;;  %2249 = vmatpush.msra.mxu3 %v4365_v42 }
 0x7d6   :  { %2159 = vmatpush.msra.mxu1 %v4009_v10  ;;  %v4385_v10 = vld [vmem:[#allocation9 + $0x50] sm:$0xff] }
 0x7d7   :  { %2230 = vmatpush.msrb.mxu2 %v4274_v47  ;;  %2250 = vmatpush.msra.mxu3 %v4370_v49 }
 0x7d8   :  { %2160 = vmatpush.msra.mxu1 %v4013_v8  ;;  %v4390_v8 = vld [vmem:[#allocation9 + $0x38] sm:$0xff] }
 0x7d9   :  { %2231 = vmatpush.msrb.mxu2 %v4279_v58  ;;  %2251 = vmatpush.msra.mxu3 %v4375_v62 }
 0x7da   :  { %2161 = vmatpush.msra.mxu1 %v4018_v11  ;;  %v4395_v11 = vld [vmem:[#allocation9 + $0x20] sm:$0xff] }
 0x7db   :  { %2232 = vmatpush.msrb.mxu2 %v4284_v13  ;;  %2252 = vmatpush.msra.mxu3 %v4380_v46 }
 0x7dc   :  { %2162 = vmatpush.msra.mxu1 %v4713_v39  ;;  %v4400_v39 = vld [vmem:[#allocation9 + $0x8] sm:$0xff] }
 0x7dd   :  { %2233 = vmatpush.msrb.mxu2 %v4289_v29  ;;  %2253 = vmatpush.msra.mxu3 %v4385_v10 }
 0x7de   :  { %2163 = vmatpush.msra.mxu1 %v4714_v50  ;;  %v4731_v50 = vld [vmem:[#allocation34_spill] sm:$0xff] }
 0x7df   :  { %2234 = vmatpush.msrb.mxu2 %v4294_v28  ;;  %2254 = vmatpush.msra.mxu3 %v4390_v8  ;;  %v1380_v60 = vadd.f32 %v4731_v50, %v4728_v31 }
 0x7e0   :  { %2164 = vmatpush.msra.mxu1 %v4715_v5 }
 0x7e1   :  { %2235 = vmatpush.msrb.mxu2 %v4299_v36  ;;  %2255 = vmatpush.msra.mxu3 %v4395_v11 }
 0x7e2   :  { %2165 = vmatpush.msra.mxu1 %v4717_v51 }
 0x7e3   :  { %2236 = vmatpush.msrb.mxu2 %v4304_v44  ;;  %2256 = vmatpush.msra.mxu3 %v4400_v39 }
 0x840   :  { %v1905_v14 = vpop.f32.mrf.mxu1 }
 0x841   :  { %v1948_v33 = vadd.f32 %v1905_v14, %v1380_v60 }
 0x843   :  { %v2510_v5 = vmul.f32 -1.442695, %v1948_v33  ;;  %v1462_v33 = vadd.f32 %v4197_v19, %v4136_v35 }
 0x845   :  { %2643 = vpow2.f32 %v2510_v5 }
 0x846   :  { %v1925_v43 = vpop.f32.mrf.mxu2 }
 0x847   :  { %v1949_v53 = vadd.f32 %v1925_v43, %v1421_v25  ;;  %v1945_v18 = vpop.f32.mrf.mxu3 }
 0x848   :  { %v1988_v14 = vadd.f32 %v4134_v54, %v1945_v18 }
 0x849   :  { %v2511_v16 = vmul.f32 -1.442695, %v1949_v53 }
 0x84b   :  { %v2644_v51 = vpop.eup %2643  ;;  %2645 = vpow2.f32 %v2511_v16 }
 0x84c   :  { %v1956_v57 = vadd.f32 1.0, %v2644_v51 }
 0x84e   :  { %2647 = vrcp.f32 %v1956_v57  ;;  %v1969_v41 = vand.u32 2147483648, %v1956_v57  ;;  %v1967_v3 = vand.u32 2147483647, %v1956_v57  ;;  %vm1963_vm9 = vweird.f32 %v1956_v57 }
 0x850   :  { %v1970_v12 = vor.u32 1.1754944e-38, %v1969_v41  ;;  %vm1968_vm11 = vcmp.eq.f32.partialorder %v1967_v3, 8.507059e+37 }
 0x851   :  { %v2646_v4 = vpop.eup %2645 }
 0x852   :  { %v1957_v2 = vadd.f32 1.0, %v2646_v4 }
 0x854   :  { %v2648_v15 = vpop.eup %2647  ;;  %2649 = vrcp.f32 %v1957_v2  ;;  %v1984_v43 = vand.u32 2147483648, %v1957_v2  ;;  %v1982_v16 = vand.u32 2147483647, %v1957_v2  ;;  %vm1978_vm13 = vweird.f32 %v1957_v2 }
 0x855   :  { %v1959_v59 = vmul.f32 %v2648_v15, %v1956_v57  ;;  %vm1964_vm8 = vweird.f32 %v2648_v15 }
 0x856   :  { %vm1965_vm10 = vmor %vm1963_vm9, %vm1964_vm8  ;;  %v1985_v57 = vor.u32 1.1754944e-38, %v1984_v43  ;;  %vm1983_vm15 = vcmp.eq.f32.partialorder %v1982_v16, 8.507059e+37 }
 0x857   :  { %v1960_v7 = vsub.f32 1.0, %v1959_v59 }
 0x859   :  { %v1961_v9 = vmul.f32 %v2648_v15, %v1960_v7 }
 0x85a   :  { %v2650_v34 = vpop.eup %2649 }
 0x85b   :  { %v1974_v32 = vmul.f32 %v2650_v34, %v1957_v2  ;;  %v1962_v6 = vadd.f32 %v2648_v15, %v1961_v9  ;;  %vm1979_vm12 = vweird.f32 %v2650_v34  ;;  %v4419_v2 = vld [vmem:[#allocation9 + $0x160] sm:$0xff] }
 0x85c   :  { %vm1980_vm14 = vmor %vm1978_vm13, %vm1979_vm12 }
 0x85d   :  { %v1975_v50 = vsub.f32 1.0, %v1974_v32  ;;  %v1966_v60 = vsel %vm1965_vm10, %v2648_v15, %v1962_v6 }
 0x85e   :  { %v1971_v5 = vsel %vm1968_vm11, %v1970_v12, %v1966_v60 }
 0x85f   :  { %v1976_v25 = vmul.f32 %v2650_v34, %v1975_v50  ;;  %v1989_v53 = vmul.f32 %v1988_v14, %v1971_v5 }
 0x861   :  { %v1977_v51 = vadd.f32 %v2650_v34, %v1976_v25  ;;  %v1990_v4 = vadd.f32 %v1989_v53, %v1462_v33  ;;  %v4733_v25 = vld [vmem:[#allocation16_spill] sm:$0xff] }
 0x862   :  { %v1465_v43 = vadd.f32 %v4733_v25, %v4136_v35 }
 0x863   :  { %v1981_v59 = vsel %vm1980_vm14, %v2650_v34, %v1977_v51  ;;  %2651 = vtanh.f32 %v1990_v4  ;;  %v4429_v34 = vld [vmem:[#allocation9 + $0x130] sm:$0xff] }
 0x864   :  { %v1986_v15 = vsel %vm1983_vm15, %v1985_v57, %v1981_v59 }
 0x865   :  { %v1992_v7 = vsub.f32 1.0, %v1986_v15  ;;  %v1994_v19 = vmul.f32 %v1986_v15, %v4316_v63  ;;  %v4424_v63 = vld [vmem:[#allocation9 + $0x148] sm:$0xff] }
 0x869   :  { %v2652_v41 = vpop.eup %2651 }
 0x86a   :  { %v1993_v9 = vmul.f32 %v2652_v41, %v1992_v7 }
 0x86c   :  { %v4411_v3 = vadd.f32 %v1994_v19, %v1993_v9 }
 0x86e   :  { %2015 = vmatmul.f32.vlgmr.msra.gmra.mxu0 %v4411_v3  ;;  %2035 = vmatmul.f32.vlgmr.msrb.gmra.mxu1 %v4411_v3 }
 0x86f   :  { %2055 = vmatmul.f32.vlgmr.msra.gmra.mxu2 %v4411_v3  ;;  %2261 = vmatpush.msra.mxu0 %v4321_v22 }
 0x870   :  { %2332 = vmatpush.msrb.mxu1 %v4229_v48  ;;  %2352 = vmatpush.msra.mxu2 %v4325_v1  ;;  %v4434_v48 = vld [vmem:[#allocation9 + $0x118] sm:$0xff]  ;;  %v1424_v1 = vadd.f32 %v4203_v17, %v4727_v38 }
 0x871   :  { %2262 = vmatpush.msra.mxu0 %v4419_v2 }
 0x872   :  { %2333 = vmatpush.msrb.mxu1 %v4234_v24  ;;  %2353 = vmatpush.msra.mxu2 %v4330_v37  ;;  %v4439_v24 = vld [vmem:[#allocation9 + $0x100] sm:$0xff] }
 0x873   :  { %2263 = vmatpush.msra.mxu0 %v4424_v63 }
 0x874   :  { %2334 = vmatpush.msrb.mxu1 %v4239_v61  ;;  %2354 = vmatpush.msra.mxu2 %v4335_v56  ;;  %v4444_v61 = vld [vmem:[#allocation9 + $0xe8] sm:$0xff] }
 0x875   :  { %2264 = vmatpush.msra.mxu0 %v4429_v34 }
 0x876   :  { %2335 = vmatpush.msrb.mxu1 %v4244_v52  ;;  %2355 = vmatpush.msra.mxu2 %v4340_v55  ;;  %v4449_v52 = vld [vmem:[#allocation9 + $0xd0] sm:$0xff] }
 0x877   :  { %2265 = vmatpush.msra.mxu0 %v4434_v48 }
 0x878   :  { %2336 = vmatpush.msrb.mxu1 %v4249_v20  ;;  %2356 = vmatpush.msra.mxu2 %v4345_v26  ;;  %v4454_v20 = vld [vmem:[#allocation9 + $0xb8] sm:$0xff] }
 0x879   :  { %2266 = vmatpush.msra.mxu0 %v4439_v24 }
 0x87a   :  { %2337 = vmatpush.msrb.mxu1 %v4254_v45  ;;  %2357 = vmatpush.msra.mxu2 %v4350_v21  ;;  %v4459_v45 = vld [vmem:[#allocation9 + $0xa0] sm:$0xff] }
 0x87b   :  { %2267 = vmatpush.msra.mxu0 %v4444_v61 }
 0x87c   :  { %2338 = vmatpush.msrb.mxu1 %v4259_v23  ;;  %2358 = vmatpush.msra.mxu2 %v4355_v0  ;;  %v4464_v23 = vld [vmem:[#allocation9 + $0x88] sm:$0xff] }
 0x87d   :  { %2268 = vmatpush.msra.mxu0 %v4449_v52 }
 0x87e   :  { %2339 = vmatpush.msrb.mxu1 %v4264_v27  ;;  %2359 = vmatpush.msra.mxu2 %v4360_v30  ;;  %v4469_v27 = vld [vmem:[#allocation9 + $0x70] sm:$0xff] }
 0x87f   :  { %2269 = vmatpush.msra.mxu0 %v4454_v20 }
 0x880   :  { %2340 = vmatpush.msrb.mxu1 %v4269_v40  ;;  %2360 = vmatpush.msra.mxu2 %v4365_v42  ;;  %v4474_v40 = vld [vmem:[#allocation9 + $0x58] sm:$0xff] }
 0x881   :  { %2270 = vmatpush.msra.mxu0 %v4459_v45 }
 0x882   :  { %2341 = vmatpush.msrb.mxu1 %v4274_v47  ;;  %2361 = vmatpush.msra.mxu2 %v4370_v49  ;;  %v4479_v47 = vld [vmem:[#allocation9 + $0x40] sm:$0xff] }
 0x883   :  { %2271 = vmatpush.msra.mxu0 %v4464_v23 }
 0x884   :  { %2342 = vmatpush.msrb.mxu1 %v4279_v58  ;;  %2362 = vmatpush.msra.mxu2 %v4375_v62  ;;  %v4484_v58 = vld [vmem:[#allocation9 + $0x28] sm:$0xff] }
 0x885   :  { %2272 = vmatpush.msra.mxu0 %v4469_v27 }
 0x886   :  { %2343 = vmatpush.msrb.mxu1 %v4284_v13  ;;  %2363 = vmatpush.msra.mxu2 %v4380_v46  ;;  %v4489_v13 = vld [vmem:[#allocation9 + $0x10] sm:$0xff] }
 0x887   :  { %2273 = vmatpush.msra.mxu0 %v4474_v40 }
 0x888   :  { %2344 = vmatpush.msrb.mxu1 %v4289_v29  ;;  %2364 = vmatpush.msra.mxu2 %v4385_v10  ;;  %v4732_v29 = vld [vmem:[#allocation28_spill] sm:$0xff] }
 0x889   :  { %2274 = vmatpush.msra.mxu0 %v4479_v47 }
 0x88a   :  { %2345 = vmatpush.msrb.mxu1 %v4294_v28  ;;  %2365 = vmatpush.msra.mxu2 %v4390_v8  ;;  %v1383_v28 = vadd.f32 %v4732_v29, %v4728_v31 }
 0x88b   :  { %2275 = vmatpush.msra.mxu0 %v4484_v58 }
 0x88c   :  { %2346 = vmatpush.msrb.mxu1 %v4299_v36  ;;  %2366 = vmatpush.msra.mxu2 %v4395_v11 }
 0x88d   :  { %2276 = vmatpush.msra.mxu0 %v4489_v13 }
 0x88e   :  { %2347 = vmatpush.msrb.mxu1 %v4304_v44  ;;  %2367 = vmatpush.msra.mxu2 %v4400_v39 }
 0x8eb   :  { %v2016_v37 = vpop.f32.mrf.mxu0  ;;  %v2036_v56 = vpop.f32.mrf.mxu1 }
 0x8ec   :  { %v2059_v55 = vadd.f32 %v2016_v37, %v1383_v28  ;;  %v2060_v36 = vadd.f32 %v2036_v56, %v1424_v1 }
 0x8ee   :  { %v2512_v26 = vmul.f32 -1.442695, %v2059_v55  ;;  %v2513_v21 = vmul.f32 -1.442695, %v2060_v36 }
 0x8f0   :  { %2653 = vpow2.f32 %v2512_v26 }
 0x8f1   :  { %2655 = vpow2.f32 %v2513_v21 }
 0x8f2   :  { %v2056_v6 = vpop.f32.mrf.mxu2 }
 0x8f3   :  { %v2099_v14 = vadd.f32 %v4134_v54, %v2056_v6 }
 0x8f6   :  { %v2654_v0 = vpop.eup %2653 }
 0x8f7   :  { %v2656_v30 = vpop.eup %2655  ;;  %v2067_v42 = vadd.f32 1.0, %v2654_v0 }
 0x8f8   :  { %v2068_v44 = vadd.f32 1.0, %v2656_v30  ;;  %v4530_v30 = vld [vmem:[%s4570_s8] ss:$0 sm:$0xff] }
 0x8f9   :  { %2657 = vrcp.f32 %v2067_v42  ;;  %v2080_v11 = vand.u32 2147483648, %v2067_v42  ;;  %v2078_v18 = vand.u32 2147483647, %v2067_v42  ;;  %vm2074_vm1 = vweird.f32 %v2067_v42 }
 0x8fa   :  { %2659 = vrcp.f32 %v2068_v44  ;;  %v2095_v16 = vand.u32 2147483648, %v2068_v44  ;;  %vm2089_vm5 = vweird.f32 %v2068_v44  ;;  %v2093_v51 = vand.u32 2147483647, %v2068_v44 }
 0x8fb   :  { %v2081_v50 = vor.u32 1.1754944e-38, %v2080_v11  ;;  %vm2079_vm3 = vcmp.eq.f32.partialorder %v2078_v18, 8.507059e+37 }
 0x8fc   :  { %v2096_v59 = vor.u32 1.1754944e-38, %v2095_v16  ;;  %vm2094_vm7 = vcmp.eq.f32.partialorder %v2093_v51, 8.507059e+37 }
 0x8ff   :  { %v2658_v49 = vpop.eup %2657 }
 0x900   :  { %v2660_v62 = vpop.eup %2659  ;;  %v2070_v46 = vmul.f32 %v2658_v49, %v2067_v42  ;;  %vm2075_vm0 = vweird.f32 %v2658_v49 }
 0x901   :  { %v2085_v10 = vmul.f32 %v2660_v62, %v2068_v44  ;;  %vm2076_vm2 = vmor %vm2074_vm1, %vm2075_vm0  ;;  %vm2090_vm4 = vweird.f32 %v2660_v62 }
 0x902   :  { %v2071_v8 = vsub.f32 1.0, %v2070_v46  ;;  %vm2091_vm6 = vmor %vm2089_vm5, %vm2090_vm4  ;;  %v4736_v46 = vld [vmem:[#allocation15_spill] sm:$0xff] }
 0x903   :  { %v2086_v17 = vsub.f32 1.0, %v2085_v10  ;;  %v1468_v10 = vadd.f32 %v4736_v46, %v4136_v35  ;;  %v2454_v46 = vld [vmem:[#allocation11 + $0x70] sm:$0xff] }
 0x904   :  { %v2072_v39 = vmul.f32 %v2658_v49, %v2071_v8 }
 0x905   :  { %v2087_v32 = vmul.f32 %v2660_v62, %v2086_v17 }
 0x906   :  { %v2073_v12 = vadd.f32 %v2658_v49, %v2072_v39 }
 0x907   :  { %v2088_v5 = vadd.f32 %v2660_v62, %v2087_v32 }
 0x908   :  { %v2077_v60 = vsel %vm2076_vm2, %v2658_v49, %v2073_v12 }
 0x909   :  { %v2082_v33 = vsel %vm2079_vm3, %v2081_v50, %v2077_v60  ;;  %v2092_v57 = vsel %vm2091_vm6, %v2660_v62, %v2088_v5  ;;  %v4737_v5 = vld [vmem:[#allocation36_spill] sm:$0xff] }
 0x90a   :  { %v2100_v53 = vmul.f32 %v2099_v14, %v2082_v33  ;;  %v2097_v15 = vsel %vm2094_vm7, %v2096_v59, %v2092_v57  ;;  %v1389_v25 = vadd.f32 %v4737_v5, %v4728_v31  ;;  %v4741_v5 = vld [vmem:[#allocation33_spill] sm:$0xff] }
 0x90b   :  { %v2103_v7 = vsub.f32 1.0, %v2097_v15  ;;  %v2105_v9 = vmul.f32 %v2097_v15, %v4411_v3 }
 0x90c   :  { %v2101_v4 = vadd.f32 %v2100_v53, %v1465_v43  ;;  %v4738_v43 = vld [vmem:[#allocation18_spill] sm:$0xff] }
 0x90d   :  { %v1430_v53 = vadd.f32 %v4738_v43, %v4727_v38  ;;  %v2445_v43 = vld [vmem:[#allocation11 + $0x28] sm:$0xff] }
 0x90e   :  { %2661 = vtanh.f32 %v2101_v4 }
 0x914   :  { %v2662_v41 = vpop.eup %2661 }
 0x915   :  { %v2104_v54 = vmul.f32 %v2662_v41, %v2103_v7 }
 0x917   :  { %v4502_v19 = vadd.f32 %v2105_v9, %v2104_v54 }
 0x919   :  { %2126 = vmatmul.f32.vlgmr.msrb.gmra.mxu3 %v4502_v19  ;;  %2146 = vmatmul.f32.vlgmr.msrb.gmra.mxu0 %v4502_v19 }
 0x91a   :  { %2166 = vmatmul.f32.vlgmr.msra.gmra.mxu1 %v4502_v19  ;;  %2372 = vmatpush.msrb.mxu3 %v4321_v22  ;;  %v4734_v22 = vld [vmem:[#allocation29_spill] sm:$0xff] }
 0x91b   :  { %v1427_v3 = vadd.f32 %v4734_v22, %v4727_v38 }
 0x91c   :  { %2373 = vmatpush.msrb.mxu3 %v4419_v2 }
 0x91e   :  { %2374 = vmatpush.msrb.mxu3 %v4424_v63 }
 0x920   :  { %2375 = vmatpush.msrb.mxu3 %v4429_v34 }
 0x922   :  { %2376 = vmatpush.msrb.mxu3 %v4434_v48  ;;  %v4735_v48 = vld [vmem:[#allocation19_spill] sm:$0xff] }
 0x924   :  { %2377 = vmatpush.msrb.mxu3 %v4439_v24  ;;  %v1386_v24 = vadd.f32 %v4735_v48, %v4728_v31 }
 0x926   :  { %2378 = vmatpush.msrb.mxu3 %v4444_v61 }
 0x928   :  { %2379 = vmatpush.msrb.mxu3 %v4449_v52 }
 0x92a   :  { %2380 = vmatpush.msrb.mxu3 %v4454_v20 }
 0x92c   :  { %2381 = vmatpush.msrb.mxu3 %v4459_v45 }
 0x92e   :  { %2382 = vmatpush.msrb.mxu3 %v4464_v23 }
 0x930   :  { %2383 = vmatpush.msrb.mxu3 %v4469_v27 }
 0x932   :  { %2384 = vmatpush.msrb.mxu3 %v4474_v40 }
 0x934   :  { %2385 = vmatpush.msrb.mxu3 %v4479_v47 }
 0x936   :  { %2386 = vmatpush.msrb.mxu3 %v4484_v58 }
 0x938   :  { %2387 = vmatpush.msrb.mxu3 %v4489_v13 }
 0x996   :  { %v2147_v2 = vpop.f32.mrf.mxu0 }
 0x997   :  { %v2171_v63 = vadd.f32 %v2147_v2, %v1427_v3  ;;  %v2167_v26 = vpop.f32.mrf.mxu1 }
 0x998   :  { %v2210_v42 = vadd.f32 %v4530_v30, %v2167_v26 }
 0x999   :  { %v2515_v34 = vmul.f32 -1.442695, %v2171_v63 }
 0x99b   :  { %2663 = vpow2.f32 %v2515_v34 }
 0x99c   :  { %v2127_v61 = vpop.f32.mrf.mxu3 }
 0x99d   :  { %v2170_v52 = vadd.f32 %v2127_v61, %v1386_v24 }
 0x99f   :  { %v2514_v20 = vmul.f32 -1.442695, %v2170_v52 }
 0x9a1   :  { %v2664_v45 = vpop.eup %2663  ;;  %2665 = vpow2.f32 %v2514_v20 }
 0x9a2   :  { %v2179_v23 = vadd.f32 1.0, %v2664_v45 }
 0x9a4   :  { %2667 = vrcp.f32 %v2179_v23  ;;  %v2206_v8 = vand.u32 2147483648, %v2179_v23  ;;  %vm2200_vm13 = vweird.f32 %v2179_v23  ;;  %v2204_v11 = vand.u32 2147483647, %v2179_v23 }
 0x9a6   :  { %v2207_v32 = vor.u32 1.1754944e-38, %v2206_v8  ;;  %vm2205_vm15 = vcmp.eq.f32.partialorder %v2204_v11, 8.507059e+37  ;;  %v2452_v8 = vld [vmem:[#allocation11 + $0x60] sm:$0xff]  ;;  %v2450_v11 = vld [vmem:[#allocation11 + $0x50] sm:$0xff] }
 0x9a7   :  { %v2666_v27 = vpop.eup %2665 }
 0x9a8   :  { %v2178_v40 = vadd.f32 1.0, %v2666_v27 }
 0x9aa   :  { %2669 = vrcp.f32 %v2178_v40  ;;  %v2668_v47 = vpop.eup %2667  ;;  %v2191_v37 = vand.u32 2147483648, %v2178_v40  ;;  %v2189_v55 = vand.u32 2147483647, %v2178_v40  ;;  %vm2185_vm9 = vweird.f32 %v2178_v40 }
 0x9ab   :  { %v2196_v58 = vmul.f32 %v2668_v47, %v2179_v23  ;;  %vm2201_vm12 = vweird.f32 %v2668_v47 }
 0x9ac   :  { %v2192_v0 = vor.u32 1.1754944e-38, %v2191_v37  ;;  %vm2190_vm11 = vcmp.eq.f32.partialorder %v2189_v55, 8.507059e+37  ;;  %vm2202_vm14 = vmor %vm2200_vm13, %vm2201_vm12 }
 0x9ad   :  { %v2197_v28 = vsub.f32 1.0, %v2196_v58 }
 0x9af   :  { %v2198_v36 = vmul.f32 %v2668_v47, %v2197_v28 }
 0x9b0   :  { %v2670_v13 = vpop.eup %2669 }
 0x9b1   :  { %v2181_v29 = vmul.f32 %v2670_v13, %v2178_v40  ;;  %vm2186_vm8 = vweird.f32 %v2670_v13  ;;  %v2199_v49 = vadd.f32 %v2668_v47, %v2198_v36 }
 0x9b2   :  { %vm2187_vm10 = vmor %vm2185_vm9, %vm2186_vm8 }
 0x9b3   :  { %v2182_v1 = vsub.f32 1.0, %v2181_v29  ;;  %v2203_v18 = vsel %vm2202_vm14, %v2668_v47, %v2199_v49 }
 0x9b4   :  { %v2208_v6 = vsel %vm2205_vm15, %v2207_v32, %v2203_v18  ;;  %v4740_v18 = vld [vmem:[#allocation35_spill] sm:$0xff] }
 0x9b5   :  { %v2183_v56 = vmul.f32 %v2670_v13, %v2182_v1  ;;  %v2214_v12 = vsub.f32 1.0, %v2208_v6  ;;  %v2216_v14 = vmul.f32 %v2208_v6, %v4502_v19  ;;  %v1392_v32 = vadd.f32 %v4740_v18, %v4728_v31  ;;  %v2448_v6 = vld [vmem:[#allocation11 + $0x40] sm:$0xff] }
 0x9b7   :  { %v2184_v21 = vadd.f32 %v2670_v13, %v2183_v56 }
 0x9b9   :  { %v2188_v44 = vsel %vm2187_vm10, %v2670_v13, %v2184_v21  ;;  %v4739_v13 = vld [vmem:[#allocation37_spill] sm:$0xff] }
 0x9ba   :  { %v2193_v62 = vsel %vm2190_vm11, %v2192_v0, %v2188_v44  ;;  %v1471_v29 = vadd.f32 %v4739_v13, %v4136_v35 }
 0x9bb   :  { %v2211_v17 = vmul.f32 %v2210_v42, %v2193_v62  ;;  %v2455_v62 = vld [vmem:[#allocation11 + $0x78] sm:$0xff] }
 0x9bc   :  { %2460 = vmatpush.msrb.mxu0 %v2455_v62 }
 0x9bd   :  { %v2212_v39 = vadd.f32 %v2211_v17, %v1468_v10  ;;  %v2453_v10 = vld [vmem:[#allocation11 + $0x68] sm:$0xff]  ;;  %v2451_v17 = vld [vmem:[#allocation11 + $0x58] sm:$0xff] }
 0x9be   :  { %2461 = vmatpush.msrb.mxu0 %v2454_v46 }
 0x9bf   :  { %2671 = vtanh.f32 %v2212_v39  ;;  %v2449_v39 = vld [vmem:[#allocation11 + $0x48] sm:$0xff] }
 0x9c0   :  { %2462 = vmatpush.msrb.mxu0 %v2453_v10 }
 0x9c2   :  { %2463 = vmatpush.msrb.mxu0 %v2452_v8 }
 0x9c4   :  { %2464 = vmatpush.msrb.mxu0 %v2451_v17 }
 0x9c5   :  { %v2672_v50 = vpop.eup %2671 }
 0x9c6   :  { %v2215_v60 = vmul.f32 %v2672_v50, %v2214_v12  ;;  %2465 = vmatpush.msrb.mxu0 %v2450_v11 }
 0x9c8   :  { %v2217_v33 = vadd.f32 %v2216_v14, %v2215_v60  ;;  %2466 = vmatpush.msrb.mxu0 %v2449_v39  ;;  %v2447_v60 = vld [vmem:[#allocation11 + $0x38] sm:$0xff] }
 0x9ca   :  { %2237 = vmatmul.f32.vlgmr.msrb.gmra.mxu2 %v2217_v33  ;;  %2257 = vmatmul.f32.vlgmr.msra.gmra.mxu3 %v2217_v33 }
 0x9cb   :  { %2277 = vmatmul.f32.vlgmr.msra.gmra.mxu0 %v2217_v33 }
 0x9cc   :  { %2467 = vmatpush.msrb.mxu0 %v2448_v6 }
 0x9ce   :  { %2468 = vmatpush.msrb.mxu0 %v2447_v60 }
 0xa48   :  { %v2278_v52 = vpop.f32.mrf.mxu0 }
 0xa49   :  { %v2321_v27 = vadd.f32 %v4530_v30, %v2278_v52 }
 0xa4d   :  { %v2238_v16 = vpop.f32.mrf.mxu2  ;;  %v2258_v51 = vpop.f32.mrf.mxu3 }
 0xa4e   :  { %v2281_v4 = vadd.f32 %v2238_v16, %v1389_v25  ;;  %v2282_v57 = vadd.f32 %v2258_v51, %v1430_v53  ;;  %v1433_v25 = vadd.f32 %v4741_v5, %v4727_v38  ;;  %v2444_v51 = vld [vmem:[#allocation11 + $0x20] sm:$0xff] }
 0xa50   :  { %v2516_v59 = vmul.f32 -1.442695, %v2281_v4  ;;  %v2517_v15 = vmul.f32 -1.442695, %v2282_v57  ;;  %v2443_v4 = vld [vmem:[#allocation11 + $0x18] sm:$0xff]  ;;  %v2442_v57 = vld [vmem:[#allocation11 + $0x10] sm:$0xff] }
 0xa52   :  { %2673 = vpow2.f32 %v2516_v59 }
 0xa53   :  { %2675 = vpow2.f32 %v2517_v15  ;;  %v2441_v15 = vld [vmem:[#allocation11 + $0x8] sm:$0xff] }
 0xa58   :  { %v2674_v7 = vpop.eup %2673 }
 0xa59   :  { %v2676_v41 = vpop.eup %2675  ;;  %v2289_v54 = vadd.f32 1.0, %v2674_v7 }
 0xa5a   :  { %v2290_v9 = vadd.f32 1.0, %v2676_v41  ;;  %v2440_v41 = vld [vmem:[#allocation11] sm:$0xff] }
 0xa5b   :  { %2677 = vrcp.f32 %v2289_v54  ;;  %v2302_v34 = vand.u32 2147483648, %v2289_v54  ;;  %v2300_v61 = vand.u32 2147483647, %v2289_v54  ;;  %vm2296_vm1 = vweird.f32 %v2289_v54 }
 0xa5c   :  { %2679 = vrcp.f32 %v2290_v9  ;;  %v2317_v28 = vand.u32 2147483648, %v2290_v9  ;;  %vm2311_vm5 = vweird.f32 %v2290_v9  ;;  %v2315_v37 = vand.u32 2147483647, %v2290_v9 }
 0xa5d   :  { %v2303_v23 = vor.u32 1.1754944e-38, %v2302_v34  ;;  %vm2301_vm3 = vcmp.eq.f32.partialorder %v2300_v61, 8.507059e+37 }
 0xa5e   :  { %v2318_v36 = vor.u32 1.1754944e-38, %v2317_v28  ;;  %vm2316_vm7 = vcmp.eq.f32.partialorder %v2315_v37, 8.507059e+37 }
 0xa61   :  { %v2678_v19 = vpop.eup %2677 }
 0xa62   :  { %v2680_v22 = vpop.eup %2679  ;;  %v2292_v3 = vmul.f32 %v2678_v19, %v2289_v54  ;;  %vm2297_vm0 = vweird.f32 %v2678_v19 }
 0xa63   :  { %v2307_v2 = vmul.f32 %v2680_v22, %v2290_v9  ;;  %vm2298_vm2 = vmor %vm2296_vm1, %vm2297_vm0  ;;  %vm2312_vm4 = vweird.f32 %v2680_v22 }
 0xa64   :  { %v2293_v63 = vsub.f32 1.0, %v2292_v3  ;;  %vm2313_vm6 = vmor %vm2311_vm5, %vm2312_vm4 }
 0xa65   :  { %v2308_v48 = vsub.f32 1.0, %v2307_v2 }
 0xa66   :  { %v2294_v24 = vmul.f32 %v2678_v19, %v2293_v63 }
 0xa67   :  { %v2309_v20 = vmul.f32 %v2680_v22, %v2308_v48 }
 0xa68   :  { %v2295_v45 = vadd.f32 %v2678_v19, %v2294_v24 }
 0xa69   :  { %v2310_v58 = vadd.f32 %v2680_v22, %v2309_v20 }
 0xa6a   :  { %v2299_v40 = vsel %vm2298_vm2, %v2678_v19, %v2295_v45 }
 0xa6b   :  { %v2304_v47 = vsel %vm2301_vm3, %v2303_v23, %v2299_v40  ;;  %v2314_v55 = vsel %vm2313_vm6, %v2680_v22, %v2310_v58 }
 0xa6c   :  { %v2322_v1 = vmul.f32 %v2321_v27, %v2304_v47  ;;  %v2319_v26 = vsel %vm2316_vm7, %v2318_v36, %v2314_v55  ;;  %v4742_v27 = vld [vmem:[#allocation31_spill] sm:$0xff] }
 0xa6d   :  { %v2325_v21 = vsub.f32 1.0, %v2319_v26  ;;  %v2327_v44 = vmul.f32 %v2319_v26, %v2217_v33  ;;  %v2446_v33 = vld [vmem:[#allocation11 + $0x30] sm:$0xff]  ;;  %v1474_v40 = vadd.f32 %v4742_v27, %v4136_v35 }
 0xa6e   :  { %v2323_v56 = vadd.f32 %v2322_v1, %v1471_v29  ;;  %2469 = vmatpush.msrb.mxu0 %v2446_v33 }
 0xa70   :  { %2681 = vtanh.f32 %v2323_v56  ;;  %2470 = vmatpush.msrb.mxu0 %v2445_v43 }
 0xa72   :  { %2471 = vmatpush.msrb.mxu0 %v2444_v51 }
 0xa74   :  { %2472 = vmatpush.msrb.mxu0 %v2443_v4 }
 0xa76   :  { %v2682_v0 = vpop.eup %2681  ;;  %2473 = vmatpush.msrb.mxu0 %v2442_v57 }
 0xa77   :  { %v2326_v42 = vmul.f32 %v2682_v0, %v2325_v21 }
 0xa78   :  { %2474 = vmatpush.msrb.mxu0 %v2441_v15 }
 0xa79   :  { %v4543_v49 = vadd.f32 %v2327_v44, %v2326_v42  ;;  %v2532_v42 = vld [vmem:[%s4572_s10] ss:$0 sm:$0xff] }
 0xa7a   :  { %2475 = vmatpush.msrb.mxu0 %v2440_v41 }
 0xa7b   :  { %2348 = vmatmul.f32.vlgmr.msrb.gmra.mxu1 %v4543_v49  ;;  %2368 = vmatmul.f32.vlgmr.msra.gmra.mxu2 %v4543_v49 }
 0xa7c   :  { %2388 = vmatmul.f32.vlgmr.msrb.gmra.mxu3 %v4543_v49 }
 0xaf8   :  { %v2349_v12 = vpop.f32.mrf.mxu1 }
 0xaf9   :  { %v2392_v50 = vadd.f32 %v2349_v12, %v1392_v32 }
 0xafb   :  { %v2518_v14 = vmul.f32 -1.442695, %v2392_v50 }
 0xafd   :  { %2683 = vpow2.f32 %v2518_v14 }
 0xafe   :  { %v2369_v53 = vpop.f32.mrf.mxu2 }
 0xaff   :  { %v2393_v16 = vadd.f32 %v2369_v53, %v1433_v25  ;;  %v2389_v48 = vpop.f32.mrf.mxu3 }
 0xb00   :  { %v2432_v23 = vadd.f32 %v4530_v30, %v2389_v48 }
 0xb01   :  { %v2519_v31 = vmul.f32 -1.442695, %v2393_v16 }
 0xb03   :  { %v2684_v59 = vpop.eup %2683  ;;  %2685 = vpow2.f32 %v2519_v31 }
 0xb04   :  { %v2400_v7 = vadd.f32 1.0, %v2684_v59 }
 0xb06   :  { %2687 = vrcp.f32 %v2400_v7  ;;  %v2413_v3 = vand.u32 2147483648, %v2400_v7  ;;  %v2411_v63 = vand.u32 2147483647, %v2400_v7  ;;  %vm2407_vm9 = vweird.f32 %v2400_v7 }
 0xb08   :  { %v2414_v52 = vor.u32 1.1754944e-38, %v2413_v3  ;;  %vm2412_vm11 = vcmp.eq.f32.partialorder %v2411_v63, 8.507059e+37 }
 0xb09   :  { %v2686_v38 = vpop.eup %2685 }
 0xb0a   :  { %v2401_v54 = vadd.f32 1.0, %v2686_v38 }
 0xb0c   :  { %v2688_v9 = vpop.eup %2687  ;;  %2689 = vrcp.f32 %v2401_v54  ;;  %v2428_v13 = vand.u32 2147483648, %v2401_v54  ;;  %v2426_v28 = vand.u32 2147483647, %v2401_v54  ;;  %vm2422_vm13 = vweird.f32 %v2401_v54 }
 0xb0d   :  { %v2403_v19 = vmul.f32 %v2688_v9, %v2400_v7  ;;  %vm2408_vm8 = vweird.f32 %v2688_v9 }
 0xb0e   :  { %vm2409_vm10 = vmor %vm2407_vm9, %vm2408_vm8  ;;  %v2429_v56 = vor.u32 1.1754944e-38, %v2428_v13  ;;  %vm2427_vm15 = vcmp.eq.f32.partialorder %v2426_v28, 8.507059e+37 }
 0xb0f   :  { %v2404_v22 = vsub.f32 1.0, %v2403_v19 }
 0xb11   :  { %v2405_v2 = vmul.f32 %v2688_v9, %v2404_v22 }
 0xb12   :  { %v2690_v34 = vpop.eup %2689 }
 0xb13   :  { %v2418_v24 = vmul.f32 %v2690_v34, %v2401_v54  ;;  %v2406_v61 = vadd.f32 %v2688_v9, %v2405_v2  ;;  %vm2423_vm12 = vweird.f32 %v2690_v34 }
 0xb14   :  { %vm2424_vm14 = vmor %vm2422_vm13, %vm2423_vm12 }
 0xb15   :  { %v2419_v20 = vsub.f32 1.0, %v2418_v24  ;;  %v2410_v45 = vsel %vm2409_vm10, %v2688_v9, %v2406_v61 }
 0xb16   :  { %v2415_v47 = vsel %vm2412_vm11, %v2414_v52, %v2410_v45 }
 0xb17   :  { %v2420_v58 = vmul.f32 %v2690_v34, %v2419_v20  ;;  %v2433_v29 = vmul.f32 %v2432_v23, %v2415_v47 }
 0xb19   :  { %v2421_v1 = vadd.f32 %v2690_v34, %v2420_v58  ;;  %v2434_v37 = vadd.f32 %v2433_v29, %v1474_v40 }
 0xb1b   :  { %v2425_v55 = vsel %vm2424_vm14, %v2690_v34, %v2421_v1  ;;  %2691 = vtanh.f32 %v2434_v37 }
 0xb1c   :  { %v2430_v36 = vsel %vm2427_vm15, %v2429_v56, %v2425_v55 }
 0xb1d   :  { %v2436_v26 = vsub.f32 1.0, %v2430_v36  ;;  %v2438_v35 = vmul.f32 %v2430_v36, %v4543_v49 }
 0xb21   :  { %v2692_v30 = vpop.eup %2691 }
 0xb22   :  { %v2437_v21 = vmul.f32 %v2692_v30, %v2436_v26 }
 0xb24   :  { %v2439_v0 = vadd.f32 %v2438_v35, %v2437_v21 }
 0xb26   :  { %2476 = vmatmul.f32.vlgmr.msrb.gmra.mxu0 %v2439_v0 }
 0xba3   :  { %v2477_v44 = vpop.f32.mrf.mxu0 }
 0xba4   :  { %v2478_v62 = vadd.f32 %v2532_v42, %v2477_v44 }
 0xba6   :  { %2480 = vst [vmem:[%s4573_s11] sm:$0xff] %v2478_v62 }
 0xba7   :  { %2485 = vsyncpa [#allocation5], 1 }
 0xba8   :  { %2486 = vsyncpa [#allocation7], 1 }
 0xba9   :  { %2487 = vsyncpa [#allocation10], 1 }

</bundles_post_ra>
